<compile_context>
chip_gen: v5e
topology: v5e:2x2
jax: 0.10.0
libtpu: 0.0.40
codegen_flags: <defaults>
</compile_context>

<pallas_src>
import jax
import jax.numpy as jnp
from jax.experimental import pallas as pl
from jax.experimental.pallas import tpu as pltpu


# ----------------------------------------------------------------------------- #
# Fused Conv2d(3x3, stride=1, bias=False) + BatchNorm (folded) + SiLU kernel
# ----------------------------------------------------------------------------- #
def _make_conv_bn_act_kernel(c_in, c_out, h_out, w_out, kh_sz, kw_sz, activation):
    hw_out = h_out * w_out

    def kernel(xp_ref, w_ref, scale_ref, bias_ref, o_ref):
        # xp_ref   : (1, Hp, Wp, C_in)   zero-padded NHWC input, one image per step
        # w_ref    : (KH*KW, C_in, C_out) one (C_in, C_out) matrix per kernel tap
        # scale_ref: (1, C_out)           folded BN scale
        # bias_ref : (1, C_out)           folded BN bias
        # o_ref    : (1, H*W, C_out)      channels-last output (channels on lanes)
        xp = xp_ref[...][0]                                   # (Hp, Wp, C_in)
        acc = jnp.zeros((hw_out, c_out), jnp.float32)
        for kh in range(kh_sz):
            for kw in range(kw_sz):
                patch = xp[kh:kh + h_out, kw:kw + w_out, :]   # (H, W, C_in)
                # Merge (H, W) into the sublane axis (layout-preserving, cheap).
                patch = patch.reshape(hw_out, c_in)
                w_k = w_ref[kh * kw_sz + kw]                  # (C_in, C_out)
                acc = acc + jnp.dot(patch, w_k,
                                    preferred_element_type=jnp.float32)
        y = acc * scale_ref[...] + bias_ref[...]              # folded BatchNorm
        if activation:
            y = y * (1.0 / (1.0 + jnp.exp(-y)))               # SiLU (exp -> EUP)
        o_ref[...] = y.reshape(1, hw_out, c_out).astype(o_ref.dtype)

    return kernel


def conv_bn_act(x, weight, scale, bias, *, padding=1, activation=True):
    """x: (N, C_in, H, W) NCHW.  weight: (C_out, C_in, KH, KW).  Returns NCHW."""
    n, c_in, h, w = x.shape
    c_out, c_in_w, kh_sz, kw_sz = weight.shape
    assert c_in == c_in_w, (c_in, c_in_w)
    p = int(padding)
    h_out = h + 2 * p - kh_sz + 1
    w_out = w + 2 * p - kw_sz + 1
    hp, wp = h + 2 * p, w + 2 * p
    hw_out = h_out * w_out

    # NCHW -> NHWC (channels on lanes) + spatial zero padding: cheap XLA preproc.
    x_nhwc = jnp.transpose(x, (0, 2, 3, 1))
    x_pad = jnp.pad(x_nhwc, ((0, 0), (p, p), (p, p), (0, 0)))

    # (C_out, C_in, KH, KW) -> (KH*KW, C_in, C_out): one GEMM weight per tap.
    w_taps = jnp.transpose(weight, (2, 3, 1, 0)).reshape(kh_sz * kw_sz, c_in, c_out)
    w_taps = w_taps.astype(jnp.float32)
    scale_r = scale.reshape(1, c_out).astype(jnp.float32)
    bias_r = bias.reshape(1, c_out).astype(jnp.float32)

    itemsize = jnp.dtype(x.dtype).itemsize
    cost = pl.CostEstimate(
        flops=2 * n * hw_out * c_out * c_in * kh_sz * kw_sz,
        transcendentals=(n * hw_out * c_out) if activation else 0,
        bytes_accessed=(x_pad.size + w_taps.size + n * hw_out * c_out) * itemsize,
    )

    kernel = _make_conv_bn_act_kernel(c_in, c_out, h_out, w_out, kh_sz, kw_sz,
                                      activation)

    out = pl.pallas_call(
        kernel,
        out_shape=jax.ShapeDtypeStruct((n, hw_out, c_out), x.dtype),
        grid_spec=pltpu.PrefetchScalarGridSpec(
            num_scalar_prefetch=0,
            grid=(n,),  # one full padded image (all channels) per grid step
            in_specs=[
                pl.BlockSpec((1, hp, wp, c_in), lambda i: (i, 0, 0, 0)),
                pl.BlockSpec((kh_sz * kw_sz, c_in, c_out), lambda i: (0, 0, 0)),
                pl.BlockSpec((1, c_out), lambda i: (0, 0)),
                pl.BlockSpec((1, c_out), lambda i: (0, 0)),
            ],
            out_specs=pl.BlockSpec((1, hw_out, c_out), lambda i: (i, 0, 0)),
        ),
        compiler_params=pltpu.CompilerParams(
            dimension_semantics=("parallel",),  # shard images across TCs on v7x
        ),
        cost_estimate=cost,
    )(x_pad, w_taps, scale_r, bias_r)

    # (N, H*W, C_out) -> (N, C_out, H, W)
    return jnp.transpose(out.reshape(n, h_out, w_out, c_out), (0, 3, 1, 2))


# ----------------------------------------------------------------------------- #
# Lane-dense residual add kernel: out = a + b
# ----------------------------------------------------------------------------- #
def _add_kernel(a_ref, b_ref, o_ref):
    o_ref[...] = a_ref[...] + b_ref[...]


def residual_add(a, b):
    assert a.shape == b.shape and a.dtype == b.dtype
    total = int(a.size)

    # Present a lane-dense 2-D view: last dim a large multiple of 128 so stores
    # are full-lane unmasked vst (the biggest measured store-throughput lever).
    lanes = None
    for cand in (2048, 1024, 512, 256, 128):
        if total % cand == 0:
            lanes = cand
            break
    if lanes is None:
        # TODO(synk): sizes not divisible by 128 fall back to XLA's fused add.
        return a + b

    rows = total // lanes
    itemsize = jnp.dtype(a.dtype).itemsize
    # ~4 MiB blocks: big enough to amortize the ~0.35 us per-step overhead,
    # small enough that double-buffered in/out fits VMEM on v7x (64 MiB) too.
    target = max(8, (4 << 20) // (lanes * itemsize))
    if rows <= target:
        br = rows
    else:
        br = (target // 8) * 8
        while br >= 8 and rows % br != 0:
            br -= 8
        if br < 8:
            br = rows

    a2 = a.reshape(rows, lanes)
    b2 = b.reshape(rows, lanes)

    cost = pl.CostEstimate(flops=total, transcendentals=0,
                           bytes_accessed=3 * total * itemsize)

    out = pl.pallas_call(
        _add_kernel,
        out_shape=jax.ShapeDtypeStruct((rows, lanes), a.dtype),
        grid_spec=pltpu.PrefetchScalarGridSpec(
            num_scalar_prefetch=0,
            grid=(rows // br,),
            in_specs=[
                pl.BlockSpec((br, lanes), lambda i: (i, 0)),
                pl.BlockSpec((br, lanes), lambda i: (i, 0)),
            ],
            out_specs=pl.BlockSpec((br, lanes), lambda i: (i, 0)),
        ),
        compiler_params=pltpu.CompilerParams(dimension_semantics=("parallel",)),
        cost_estimate=cost,
    )(a2, b2)
    return out.reshape(a.shape)


# ----------------------------------------------------------------------------- #
# Module ports
# ----------------------------------------------------------------------------- #
class Conv:
    """Conv2d(bias=False) + BatchNorm2d (inference, folded) + SiLU, fused in Pallas."""

    def __init__(self, key, in_channels, out_channels, kernel_size=3, stride=1,
                 padding=1, activation=True):
        assert stride == 1, "only stride=1 (as used by Bottleneck) is implemented"
        k_w, k_g, k_b, k_m, k_v = jax.random.split(key, 5)
        fan_in = in_channels * kernel_size * kernel_size
        self.weight = (jax.random.normal(
            k_w, (out_channels, in_channels, kernel_size, kernel_size),
            jnp.float32) / jnp.sqrt(float(fan_in)))
        # BatchNorm parameters / running stats (inference-mode folding).
        self.gamma = 1.0 + 0.1 * jax.random.normal(k_g, (out_channels,), jnp.float32)
        self.beta = 0.1 * jax.random.normal(k_b, (out_channels,), jnp.float32)
        self.running_mean = 0.1 * jax.random.normal(k_m, (out_channels,), jnp.float32)
        self.running_var = jnp.abs(
            1.0 + 0.1 * jax.random.normal(k_v, (out_channels,), jnp.float32))
        self.eps = 1e-5
        self.padding = int(padding)
        self.activation = bool(activation)

    def fused_scale_bias(self):
        scale = self.gamma / jnp.sqrt(self.running_var + self.eps)
        bias = self.beta - self.running_mean * scale
        return scale, bias

    def __call__(self, x):
        scale, bias = self.fused_scale_bias()
        return conv_bn_act(x, self.weight, scale, bias,
                           padding=self.padding, activation=self.activation)


class Bottleneck:
    """Port of the reference PyTorch Bottleneck.

    NOTE: the reference forward computes conv1(x) and conv2(x) but never assigns
    the results, so the returned value is exactly x_in + x (== 2*x) when
    shortcut=True.  We mirror that data flow: both fused conv kernels are run
    (same compute as PyTorch performs), but only the residual add feeds the output.
    """

    def __init__(self, key, in_channels, out_channels, kernel_size=3, stride=1,
                 padding=1, shortcut=True):
        k1, k2 = jax.random.split(key)
        self.conv1 = Conv(k1, in_channels, out_channels, kernel_size, stride, padding)
        self.conv2 = Conv(k2, out_channels, out_channels, kernel_size, stride, padding)
        self.shortcut = shortcut

    def __call__(self, x):
        x_in = x
        _ = self.conv1(x)   # result intentionally discarded, as in the reference
        _ = self.conv2(x)   # result intentionally discarded, as in the reference
        if self.shortcut:
            x = residual_add(x_in, x)
        return x


# ----------------------------------------------------------------------------- #
if __name__ == "__main__":
    key = jax.random.PRNGKey(0)
    k_x, k_m = jax.random.split(key)

    N, C, H, W = 2, 4, 16, 16
    x = jax.random.uniform(k_x, (N, C, H, W), dtype=jnp.float32)

    model = Bottleneck(k_m, in_channels=C, out_channels=C,
                       kernel_size=3, stride=1, padding=1, shortcut=True)

    # --- Validate the fused Conv+BN+SiLU Pallas kernel against a pure-JAX reference ---
    conv = model.conv1
    y_kernel = jax.block_until_ready(conv(x))
    scale, bias = conv.fused_scale_bias()
    y_ref = jax.lax.conv_general_dilated(
        x, conv.weight, window_strides=(1, 1),
        padding=[(conv.padding, conv.padding)] * 2,
        dimension_numbers=("NCHW", "OIHW", "NCHW"))
    y_ref = y_ref * scale[None, :, None, None] + bias[None, :, None, None]
    y_ref = y_ref * jax.nn.sigmoid(y_ref)
    assert y_kernel.shape == y_ref.shape, (y_kernel.shape, y_ref.shape)
    assert jnp.allclose(y_kernel, y_ref, atol=1e-4, rtol=1e-4), \
        float(jnp.max(jnp.abs(y_kernel - y_ref)))

    # --- Full Bottleneck forward (literal reference semantics: output == x + x) ---
    y = model(x)
    y = jax.block_until_ready(y)
    assert y.shape == x.shape, y.shape
    assert jnp.allclose(y, x + x, atol=1e-6), \
        float(jnp.max(jnp.abs(y - (x + x))))

    print("KERNEL_OK")
</pallas_src>

<mosaic_0001>
module attributes {stable_mosaic.version = 11 : i64} {
  func.func @kernel(%arg0: i32, %arg1: memref<1x18x18x4xf32, #tpu.memory_space<vmem>>, %arg2: memref<9x4x4xf32, #tpu.memory_space<vmem>>, %arg3: memref<1x4xf32, #tpu.memory_space<vmem>>, %arg4: memref<1x4xf32, #tpu.memory_space<vmem>>, %arg5: memref<1x256x4xf32, #tpu.memory_space<vmem>>) attributes {dimension_semantics = [#tpu.dimension_semantics<parallel>], iteration_bounds = array<i64: 2>, scalar_prefetch = 0 : i64, scratch_operands = 0 : i64, tpu.core_type = #tpu.core_type<tc>, window_params = [{transform_indices = @transform_0, window_bounds = array<i64: 1, 18, 18, 4>}, {pipeline_mode = #tpu.pipeline_mode<synchronous>, transform_indices = @transform_1, window_bounds = array<i64: 9, 4, 4>}, {pipeline_mode = #tpu.pipeline_mode<synchronous>, transform_indices = @transform_2, window_bounds = array<i64: 1, 4>}, {pipeline_mode = #tpu.pipeline_mode<synchronous>, transform_indices = @transform_3, window_bounds = array<i64: 1, 4>}, {transform_indices = @transform_4, window_bounds = array<i64: 1, 256, 4>}]} {
    %c0 = arith.constant 0 : index
    %c0_0 = arith.constant 0 : index
    %c0_1 = arith.constant 0 : index
    %c0_2 = arith.constant 0 : index
    %0 = vector.load %arg1[%c0, %c0_0, %c0_1, %c0_2] : memref<1x18x18x4xf32, #tpu.memory_space<vmem>>, vector<1x18x18x4xf32>
    %1 = vector.shape_cast %0 : vector<1x18x18x4xf32> to vector<18x18x4xf32>
    %cst = arith.constant 0.000000e+00 : f32
    %2 = vector.broadcast %cst : f32 to vector<256x4xf32>
    %3 = vector.extract_strided_slice %1 {offsets = [0, 0, 0], sizes = [16, 16, 4], strides = [1, 1, 1]} : vector<18x18x4xf32> to vector<16x16x4xf32>
    %4 = vector.shape_cast %3 : vector<16x16x4xf32> to vector<256x4xf32>
    %c0_3 = arith.constant 0 : index
    %c0_4 = arith.constant 0 : index
    %c0_5 = arith.constant 0 : index
    %5 = vector.load %arg2[%c0_3, %c0_4, %c0_5] : memref<9x4x4xf32, #tpu.memory_space<vmem>>, vector<1x4x4xf32>
    %6 = vector.shape_cast %5 : vector<1x4x4xf32> to vector<4x4xf32>
    %cst_6 = arith.constant dense<0.000000e+00> : vector<256x4xf32>
    %7 = tpu.matmul %4, %6, %cst_6 {dimension_numbers = #tpu.dot_dimension_numbers<[1], [0], [0], [1], [0, 0, 1, 1], [], []>} : vector<256x4xf32>, vector<4x4xf32>, vector<256x4xf32> -> vector<256x4xf32>
    %8 = arith.addf %2, %7 : vector<256x4xf32>
    %9 = vector.extract_strided_slice %1 {offsets = [0, 1, 0], sizes = [16, 16, 4], strides = [1, 1, 1]} : vector<18x18x4xf32> to vector<16x16x4xf32>
    %10 = vector.shape_cast %9 : vector<16x16x4xf32> to vector<256x4xf32>
    %c1 = arith.constant 1 : index
    %c0_7 = arith.constant 0 : index
    %c0_8 = arith.constant 0 : index
    %11 = vector.load %arg2[%c1, %c0_7, %c0_8] : memref<9x4x4xf32, #tpu.memory_space<vmem>>, vector<1x4x4xf32>
    %12 = vector.shape_cast %11 : vector<1x4x4xf32> to vector<4x4xf32>
    %cst_9 = arith.constant dense<0.000000e+00> : vector<256x4xf32>
    %13 = tpu.matmul %10, %12, %cst_9 {dimension_numbers = #tpu.dot_dimension_numbers<[1], [0], [0], [1], [0, 0, 1, 1], [], []>} : vector<256x4xf32>, vector<4x4xf32>, vector<256x4xf32> -> vector<256x4xf32>
    %14 = arith.addf %8, %13 : vector<256x4xf32>
    %15 = vector.extract_strided_slice %1 {offsets = [0, 2, 0], sizes = [16, 16, 4], strides = [1, 1, 1]} : vector<18x18x4xf32> to vector<16x16x4xf32>
    %16 = vector.shape_cast %15 : vector<16x16x4xf32> to vector<256x4xf32>
    %c2 = arith.constant 2 : index
    %c0_10 = arith.constant 0 : index
    %c0_11 = arith.constant 0 : index
    %17 = vector.load %arg2[%c2, %c0_10, %c0_11] : memref<9x4x4xf32, #tpu.memory_space<vmem>>, vector<1x4x4xf32>
    %18 = vector.shape_cast %17 : vector<1x4x4xf32> to vector<4x4xf32>
    %cst_12 = arith.constant dense<0.000000e+00> : vector<256x4xf32>
    %19 = tpu.matmul %16, %18, %cst_12 {dimension_numbers = #tpu.dot_dimension_numbers<[1], [0], [0], [1], [0, 0, 1, 1], [], []>} : vector<256x4xf32>, vector<4x4xf32>, vector<256x4xf32> -> vector<256x4xf32>
    %20 = arith.addf %14, %19 : vector<256x4xf32>
    %21 = vector.extract_strided_slice %1 {offsets = [1, 0, 0], sizes = [16, 16, 4], strides = [1, 1, 1]} : vector<18x18x4xf32> to vector<16x16x4xf32>
    %22 = vector.shape_cast %21 : vector<16x16x4xf32> to vector<256x4xf32>
    %c3 = arith.constant 3 : index
    %c0_13 = arith.constant 0 : index
    %c0_14 = arith.constant 0 : index
    %23 = vector.load %arg2[%c3, %c0_13, %c0_14] : memref<9x4x4xf32, #tpu.memory_space<vmem>>, vector<1x4x4xf32>
    %24 = vector.shape_cast %23 : vector<1x4x4xf32> to vector<4x4xf32>
    %cst_15 = arith.constant dense<0.000000e+00> : vector<256x4xf32>
    %25 = tpu.matmul %22, %24, %cst_15 {dimension_numbers = #tpu.dot_dimension_numbers<[1], [0], [0], [1], [0, 0, 1, 1], [], []>} : vector<256x4xf32>, vector<4x4xf32>, vector<256x4xf32> -> vector<256x4xf32>
    %26 = arith.addf %20, %25 : vector<256x4xf32>
    %27 = vector.extract_strided_slice %1 {offsets = [1, 1, 0], sizes = [16, 16, 4], strides = [1, 1, 1]} : vector<18x18x4xf32> to vector<16x16x4xf32>
    %28 = vector.shape_cast %27 : vector<16x16x4xf32> to vector<256x4xf32>
    %c4 = arith.constant 4 : index
    %c0_16 = arith.constant 0 : index
    %c0_17 = arith.constant 0 : index
    %29 = vector.load %arg2[%c4, %c0_16, %c0_17] : memref<9x4x4xf32, #tpu.memory_space<vmem>>, vector<1x4x4xf32>
    %30 = vector.shape_cast %29 : vector<1x4x4xf32> to vector<4x4xf32>
    %cst_18 = arith.constant dense<0.000000e+00> : vector<256x4xf32>
    %31 = tpu.matmul %28, %30, %cst_18 {dimension_numbers = #tpu.dot_dimension_numbers<[1], [0], [0], [1], [0, 0, 1, 1], [], []>} : vector<256x4xf32>, vector<4x4xf32>, vector<256x4xf32> -> vector<256x4xf32>
    %32 = arith.addf %26, %31 : vector<256x4xf32>
    %33 = vector.extract_strided_slice %1 {offsets = [1, 2, 0], sizes = [16, 16, 4], strides = [1, 1, 1]} : vector<18x18x4xf32> to vector<16x16x4xf32>
    %34 = vector.shape_cast %33 : vector<16x16x4xf32> to vector<256x4xf32>
    %c5 = arith.constant 5 : index
    %c0_19 = arith.constant 0 : index
    %c0_20 = arith.constant 0 : index
    %35 = vector.load %arg2[%c5, %c0_19, %c0_20] : memref<9x4x4xf32, #tpu.memory_space<vmem>>, vector<1x4x4xf32>
    %36 = vector.shape_cast %35 : vector<1x4x4xf32> to vector<4x4xf32>
    %cst_21 = arith.constant dense<0.000000e+00> : vector<256x4xf32>
    %37 = tpu.matmul %34, %36, %cst_21 {dimension_numbers = #tpu.dot_dimension_numbers<[1], [0], [0], [1], [0, 0, 1, 1], [], []>} : vector<256x4xf32>, vector<4x4xf32>, vector<256x4xf32> -> vector<256x4xf32>
    %38 = arith.addf %32, %37 : vector<256x4xf32>
    %39 = vector.extract_strided_slice %1 {offsets = [2, 0, 0], sizes = [16, 16, 4], strides = [1, 1, 1]} : vector<18x18x4xf32> to vector<16x16x4xf32>
    %40 = vector.shape_cast %39 : vector<16x16x4xf32> to vector<256x4xf32>
    %c6 = arith.constant 6 : index
    %c0_22 = arith.constant 0 : index
    %c0_23 = arith.constant 0 : index
    %41 = vector.load %arg2[%c6, %c0_22, %c0_23] : memref<9x4x4xf32, #tpu.memory_space<vmem>>, vector<1x4x4xf32>
    %42 = vector.shape_cast %41 : vector<1x4x4xf32> to vector<4x4xf32>
    %cst_24 = arith.constant dense<0.000000e+00> : vector<256x4xf32>
    %43 = tpu.matmul %40, %42, %cst_24 {dimension_numbers = #tpu.dot_dimension_numbers<[1], [0], [0], [1], [0, 0, 1, 1], [], []>} : vector<256x4xf32>, vector<4x4xf32>, vector<256x4xf32> -> vector<256x4xf32>
    %44 = arith.addf %38, %43 : vector<256x4xf32>
    %45 = vector.extract_strided_slice %1 {offsets = [2, 1, 0], sizes = [16, 16, 4], strides = [1, 1, 1]} : vector<18x18x4xf32> to vector<16x16x4xf32>
    %46 = vector.shape_cast %45 : vector<16x16x4xf32> to vector<256x4xf32>
    %c7 = arith.constant 7 : index
    %c0_25 = arith.constant 0 : index
    %c0_26 = arith.constant 0 : index
    %47 = vector.load %arg2[%c7, %c0_25, %c0_26] : memref<9x4x4xf32, #tpu.memory_space<vmem>>, vector<1x4x4xf32>
    %48 = vector.shape_cast %47 : vector<1x4x4xf32> to vector<4x4xf32>
    %cst_27 = arith.constant dense<0.000000e+00> : vector<256x4xf32>
    %49 = tpu.matmul %46, %48, %cst_27 {dimension_numbers = #tpu.dot_dimension_numbers<[1], [0], [0], [1], [0, 0, 1, 1], [], []>} : vector<256x4xf32>, vector<4x4xf32>, vector<256x4xf32> -> vector<256x4xf32>
    %50 = arith.addf %44, %49 : vector<256x4xf32>
    %51 = vector.extract_strided_slice %1 {offsets = [2, 2, 0], sizes = [16, 16, 4], strides = [1, 1, 1]} : vector<18x18x4xf32> to vector<16x16x4xf32>
    %52 = vector.shape_cast %51 : vector<16x16x4xf32> to vector<256x4xf32>
    %c8 = arith.constant 8 : index
    %c0_28 = arith.constant 0 : index
    %c0_29 = arith.constant 0 : index
    %53 = vector.load %arg2[%c8, %c0_28, %c0_29] : memref<9x4x4xf32, #tpu.memory_space<vmem>>, vector<1x4x4xf32>
    %54 = vector.shape_cast %53 : vector<1x4x4xf32> to vector<4x4xf32>
    %cst_30 = arith.constant dense<0.000000e+00> : vector<256x4xf32>
    %55 = tpu.matmul %52, %54, %cst_30 {dimension_numbers = #tpu.dot_dimension_numbers<[1], [0], [0], [1], [0, 0, 1, 1], [], []>} : vector<256x4xf32>, vector<4x4xf32>, vector<256x4xf32> -> vector<256x4xf32>
    %56 = arith.addf %50, %55 : vector<256x4xf32>
    %c0_31 = arith.constant 0 : index
    %c0_32 = arith.constant 0 : index
    %57 = vector.load %arg3[%c0_31, %c0_32] : memref<1x4xf32, #tpu.memory_space<vmem>>, vector<1x4xf32>
    %58 = vector.broadcast %57 : vector<1x4xf32> to vector<256x4xf32>
    %59 = arith.mulf %56, %58 : vector<256x4xf32>
    %c0_33 = arith.constant 0 : index
    %c0_34 = arith.constant 0 : index
    %60 = vector.load %arg4[%c0_33, %c0_34] : memref<1x4xf32, #tpu.memory_space<vmem>>, vector<1x4xf32>
    %61 = vector.broadcast %60 : vector<1x4xf32> to vector<256x4xf32>
    %62 = arith.addf %59, %61 : vector<256x4xf32>
    %cst_35 = arith.constant 0.000000e+00 : f32
    %63 = vector.broadcast %cst_35 : f32 to vector<256x4xf32>
    %64 = arith.subf %63, %62 : vector<256x4xf32>
    %65 = math.exp %64 : vector<256x4xf32>
    %cst_36 = arith.constant 1.000000e+00 : f32
    %66 = vector.broadcast %cst_36 : f32 to vector<256x4xf32>
    %67 = arith.addf %66, %65 : vector<256x4xf32>
    %cst_37 = arith.constant 1.000000e+00 : f32
    %68 = vector.broadcast %cst_37 : f32 to vector<256x4xf32>
    %69 = arith.divf %68, %67 : vector<256x4xf32>
    %70 = arith.mulf %62, %69 : vector<256x4xf32>
    %71 = vector.shape_cast %70 : vector<256x4xf32> to vector<1x256x4xf32>
    %c0_38 = arith.constant 0 : index
    %c0_39 = arith.constant 0 : index
    %c0_40 = arith.constant 0 : index
    %72 = vector.load %arg5[%c0_38, %c0_39, %c0_40] : memref<1x256x4xf32, #tpu.memory_space<vmem>>, vector<1x256x4xf32>
    tpu.vector_store %arg5[%c0_38, %c0_39, %c0_40], %71 {strides = array<i32>} : memref<1x256x4xf32, #tpu.memory_space<vmem>>, vector<1x256x4xf32>,
    return
  }
  func.func @transform_0(%arg0: i32) -> (i32, i32, i32, i32) {
    %c0_i32 = arith.constant 0 : i32
    %c0_i32_0 = arith.constant 0 : i32
    %c0_i32_1 = arith.constant 0 : i32
    %c0_i32_2 = arith.constant 0 : i32
    return %arg0, %c0_i32, %c0_i32_0, %c0_i32_1 : i32, i32, i32, i32
  }
  func.func @transform_1(%arg0: i32) -> (i32, i32, i32) {
    %c0_i32 = arith.constant 0 : i32
    %c0_i32_0 = arith.constant 0 : i32
    %c0_i32_1 = arith.constant 0 : i32
    %c0_i32_2 = arith.constant 0 : i32
    return %c0_i32, %c0_i32_0, %c0_i32_1 : i32, i32, i32
  }
  func.func @transform_2(%arg0: i32) -> (i32, i32) {
    %c0_i32 = arith.constant 0 : i32
    %c0_i32_0 = arith.constant 0 : i32
    %c0_i32_1 = arith.constant 0 : i32
    return %c0_i32, %c0_i32_0 : i32, i32
  }
  func.func @transform_3(%arg0: i32) -> (i32, i32) {
    %c0_i32 = arith.constant 0 : i32
    %c0_i32_0 = arith.constant 0 : i32
    %c0_i32_1 = arith.constant 0 : i32
    return %c0_i32, %c0_i32_0 : i32, i32
  }
  func.func @transform_4(%arg0: i32) -> (i32, i32, i32) {
    %c0_i32 = arith.constant 0 : i32
    %c0_i32_0 = arith.constant 0 : i32
    %c0_i32_1 = arith.constant 0 : i32
    return %arg0, %c0_i32, %c0_i32_0 : i32, i32, i32
  }
}

</mosaic_0001>

<bundles_post_ra>
// kernel: tpu_custom_call.1
= control target key start
LH: loop header
LB: loop body
LE: loop exit
PB: predicated region body
PF: predicated region fallthrough
CT: control target
= control target key end

     0   :  { %s3310_s15 = smov 0   ;;  %s5058_s0 = inlined_call_operand.vmem [shape: f32[2,18,18,4], index: 0, kind: input, shape index: {}]   ;;  %s5059_s1 = inlined_call_operand.vmem [shape: f32[9,4,4], index: 1, kind: input, shape index: {}]   ;;  %s5060_s2 = inlined_call_operand.vmem [shape: f32[1,4], index: 2, kind: input, shape index: {}]   ;;  %s5061_s3 = inlined_call_operand.vmem [shape: f32[1,4], index: 3, kind: input, shape index: {}]   ;;  %s5062_s4 = inlined_call_operand.vmem [shape: f32[2,256,4], index: 4, kind: output, shape index: {}]  }
   0x1 LB: > { %s2790_s16 = sadd.s32 4294967295, %s3283_s15   ;;  %p2794_p0 = scmp.ge.s32.totalorder %s3283_s15, 1  ;;  %s3283_s15 = sphi %s3310_s15, %s14_s15  }
   0x2   : > { %p162_p1 = scmp.lt.s32.totalorder %s3283_s15, 3 }
   0x4   : > { %p163_p2 = pnand %p2794_p0, %p162_p1 }
   0x6   : > { %166 = sbr.rel (%p163_p2) target bundleno = 765 (0x2fd), region = 36 }
   0xb   : > { %v2798_v0 = vld [vmem:[%s5059_s1 + $0x4] sm:$0xf]  ;;  %vm449_vm0 = vcmask 1043456   ;;  %p188_p3 = scmp.lt.s32.totalorder %s2790_s16, 1  ;;  %v2865_v1 = vld [vmem:[%s5059_s1 + $0x8] sm:$0xf] }
   0xc   : > { %3106 = vmatpush.msk.msra.mxu1 %vm449_vm0, %v2798_v0  ;;  %3107 = vmatpush.msk.msra.mxu2 %vm449_vm0, %v2798_v0  ;;  %v2899_v2 = vld [vmem:[%s5059_s1 + $0xc] sm:$0xf]  ;;  %v252_v3 = vld [vmem:[%s5059_s1] sm:$0xf]  ;;  %v2933_v4 = vld [vmem:[%s5059_s1 + $0x10] sm:$0xf] }
   0xd   : > { %s5277_s16 = smov (!%p188_p3, %s2790_s16), 1  ;;  %3108 = vmatpush.msk.msra.mxu3 %vm449_vm0, %v2798_v0  ;;  %2799 = vmatpush.msk.msra.mxu0 %vm449_vm0, %v2798_v0  ;;  %vm301_vm1 = vcmask 1046528   ;;  %vm384_vm2 = vcmask 31744   ;;  %vm746_vm3 = vcmask 1045504  }
   0xe   : > { %2866 = vmatpush.msk.msrb.mxu2 %vm449_vm0, %v2865_v1  ;;  %2832 = vmatpush.msk.msrb.mxu1 %vm449_vm0, %v252_v3  ;;  %s3109_s27 = smul.u32 432, %s5277_s16  ;;  %s3105_s19 = sshll.u32 %s5277_s16, 8 }
   0xf   : > { %2900 = vmatpush.msk.msrb.mxu3 %vm449_vm0, %v2899_v2  ;;  %2934 = vmatpush.msk.msrb.mxu0 %vm449_vm0, %v2933_v4  ;;  %s4494_s21 = scalar_lea.vmem %s5062_s4, %s3105_s19 }
  0x10   : > { %s3347_s30 = scalar_lea.vmem %s5058_s0, %s3109_s27 }
  0x11   : > { %v3350_v5 = vld [vmem:[%s3347_s30 + $0x60] sm:$0xff]  ;;  %v3353_v6 = vld [vmem:[%s3347_s30 + $0x68] sm:$0xff]  ;;  %v3374_v17 = vld [vmem:[%s3347_s30 + $0x70] sm:$0x3] }
  0x12   : > { %v3356_v7 = vld [vmem:[%s3347_s30 + $0xc0] sm:$0xff]  ;;  %v322_v8 = vrot.slane %v3350_v5, 1  ;;  %v323_v9 = vrot.slane %v3353_v6, 1  ;;  %v3361_v10 = vld [vmem:[%s3347_s30 + $0xc8] sm:$0xff]  ;;  %v3383_v20 = vld [vmem:[%s3347_s30 + $0xd0] sm:$0x3] }
  0x13   : > { %v342_v11 = vrot.slane %v3356_v7, 1  ;;  %v3365_v12 = vld [vmem:[%s3347_s30 + $0x120] sm:$0xff]  ;;  %v3368_v13 = vld [vmem:[%s3347_s30 + $0x128] sm:$0xff]  ;;  %v343_v14 = vrot.slane %v3361_v10, 1  ;;  %v3399_v26 = vld [vmem:[%s3347_s30 + $0x130] sm:$0x3] }
  0x14   : > { %5138 = vst [vmem:[#allocation2_spill] sm:$0xff] %v3365_v12  ;;  %v362_v15 = vrot.slane %v3365_v12, 1  ;;  %v363_v16 = vrot.slane %v3368_v13, 1  ;;  %v3377_v18 = vld [vmem:[%s3347_s30] sm:$0xff]  ;;  %v3380_v19 = vsel %vm301_vm1, %v322_v8, %v323_v9  ;;  %v3386_v21 = vld [vmem:[%s3347_s30 + $0x8] sm:$0xff]  ;;  %v325_v27 = vrot.slane %v3374_v17, 1 }
  0x15   : > { %5139 = vst [vmem:[#allocation3_spill] sm:$0xff] %v3368_v13  ;;  %v302_v22 = vrot.slane %v3377_v18, 1  ;;  %2808 = vmatmul.msk.f32.vlgmr.msra.gmra.mxu1 %vm384_vm2, %v3380_v19  ;;  %v3392_v23 = vsel %vm301_vm1, %v342_v11, %v343_v14  ;;  %v303_v25 = vrot.slane %v3386_v21, 1  ;;  %v3407_v28 = vld [vmem:[%s3347_s30 + $0x10] sm:$0x3]  ;;  %v345_v29 = vrot.slane %v3383_v20, 1 }
  0x16   : > { %5140 = vst [vmem:[#allocation4_spill] sm:$0xff] %v3392_v23  ;;  %v3395_v24 = vsel %vm301_vm1, %v362_v15, %v363_v16  ;;  %2816 = vmatmul.msk.f32.vlgmr.msra.gmra.mxu2 %vm384_vm2, %v3392_v23  ;;  %v365_v31 = vrot.slane %v3399_v26, 1  ;;  %v305_v32 = vrot.slane %v3407_v28, 1  ;;  %v3415_v33 = vsel %vm301_vm1, %v323_v9, %v325_v27  ;;  %v3424_v36 = vld [vmem:[%s3347_s30 + $0x78] sm:$0xff]  ;;  %v3427_v37 = vld [vmem:[%s3347_s30 + $0x80] sm:$0xff]  ;;  %v3509_v4 = vld [vmem:[%s3347_s30 + $0x90] sm:$0xff] }
  0x17   : > { %5141 = vst [vmem:[#allocation5_spill] sm:$0xff] %v3395_v24  ;;  %2824 = vmatmul.msk.f32.vlgmr.msra.gmra.mxu3 %vm384_vm2, %v3395_v24  ;;  %v304_v30 = vsel %vm301_vm1, %v302_v22, %v303_v25  ;;  %v3418_v34 = vsel %vm301_vm1, %v343_v14, %v345_v29  ;;  %v3430_v38 = vld [vmem:[%s3347_s30 + $0xd8] sm:$0xff]  ;;  %v3433_v39 = vld [vmem:[%s3347_s30 + $0xe0] sm:$0xff]  ;;  %v327_v43 = vrot.slane %v3424_v36, 1  ;;  %v328_v44 = vrot.slane %v3427_v37, 1  ;;  %v3515_v9 = vld [vmem:[%s3347_s30 + $0xf0] sm:$0xff] }
  0x18   : > { %5142 = vst [vmem:[#allocation6_spill] sm:$0xff] %v3399_v26  ;;  %2800 = vmatmul.msk.f32.vlgmr.msra.gmra.mxu0 %vm384_vm2, %v304_v30  ;;  %v3421_v35 = vsel %vm301_vm1, %v363_v16, %v365_v31  ;;  %v3436_v40 = vld [vmem:[%s3347_s30 + $0x138] sm:$0xff]  ;;  %v3439_v41 = vld [vmem:[%s3347_s30 + $0x140] sm:$0xff]  ;;  %v306_v42 = vsel %vm301_vm1, %v303_v25, %v305_v32  ;;  %v347_v47 = vrot.slane %v3430_v38, 1  ;;  %v348_v48 = vrot.slane %v3433_v39, 1  ;;  %v3521_v14 = vld [vmem:[%s3347_s30 + $0x150] sm:$0xff] }
  0x19   : > { %5143 = vst [vmem:[#allocation7_spill] sm:$0xff] %v3415_v33  ;;  %v3451_v45 = vld [vmem:[%s3347_s30 + $0x18] sm:$0xff]  ;;  %v3454_v46 = vld [vmem:[%s3347_s30 + $0x20] sm:$0xff]  ;;  %v367_v49 = vrot.slane %v3436_v40, 1  ;;  %v368_v50 = vrot.slane %v3439_v41, 1  ;;  %v3464_v53 = vsel %vm301_vm1, %v327_v43, %v328_v44  ;;  %v332_v22 = vrot.slane %v3509_v4, 1 }
  0x1a   : > { %5144 = vst [vmem:[#allocation8_spill] sm:$0xff] %v3418_v34  ;;  %v307_v51 = vrot.slane %v3451_v45, 1  ;;  %v308_v52 = vrot.slane %v3454_v46, 1  ;;  %v3467_v54 = vsel %vm301_vm1, %v347_v47, %v348_v48  ;;  %v3473_v56 = vld [vmem:[%s3347_s30 + $0x88] sm:$0x3]  ;;  %v3512_v8 = vld [vmem:[%s3347_s30 + $0x98] sm:$0xff] }
  0x1b   : > { %5145 = vst [vmem:[#allocation9_spill] sm:$0xff] %v3421_v35  ;;  %v3470_v55 = vsel %vm301_vm1, %v367_v49, %v368_v50  ;;  %v3476_v57 = vld [vmem:[%s3347_s30 + $0xe8] sm:$0x3]  ;;  %v330_v60 = vrot.slane %v3473_v56, 1  ;;  %v3518_v11 = vld [vmem:[%s3347_s30 + $0xf8] sm:$0xff]  ;;  %v333_v25 = vrot.slane %v3512_v8, 1 }
  0x1c   : > { %5146 = vst [vmem:[#allocation10_spill] sm:$0xff] %v3436_v40  ;;  %v3479_v58 = vld [vmem:[%s3347_s30 + $0x148] sm:$0x3]  ;;  %v3484_v59 = vsel %vm301_vm1, %v307_v51, %v308_v52  ;;  %v350_v62 = vrot.slane %v3476_v57, 1  ;;  %v3524_v15 = vld [vmem:[%s3347_s30 + $0x158] sm:$0xff]  ;;  %v3538_v27 = vld [vmem:[%s3347_s30 + $0x30] sm:$0xff] }
  0x1d   : > { %5147 = vst [vmem:[#allocation11_spill] sm:$0xff] %v3439_v41  ;;  %2809 = vmatmul.msk.f32.gmra.mxu1 %vm384_vm2, %v3415_v33  ;;  %v3492_v61 = vld [vmem:[%s3347_s30 + $0x28] sm:$0x3]  ;;  %v370_v63 = vrot.slane %v3479_v58, 1  ;;  %v3500_v1 = vsel %vm301_vm1, %v328_v44, %v330_v60  ;;  %v3541_v29 = vld [vmem:[%s3347_s30 + $0x38] sm:$0xff]  ;;  %v352_v30 = vrot.slane %v3515_v9, 1  ;;  %v3552_v47 = vsel %vm301_vm1, %v332_v22, %v333_v25 }
  0x1e   : > { %2817 = vmatmul.msk.f32.gmra.mxu2 %vm384_vm2, %v3418_v34  ;;  %5148 = vst [vmem:[#allocation12_spill] sm:$0xff] %v3464_v53  ;;  %v310_v0 = vrot.slane %v3492_v61, 1  ;;  %v3503_v2 = vsel %vm301_vm1, %v348_v48, %v350_v62  ;;  %v353_v31 = vrot.slane %v3518_v11, 1  ;;  %v372_v32 = vrot.slane %v3521_v14, 1  ;;  %v3555_v48 = vld [vmem:[%s3347_s30 + $0xa0] sm:$0x3] }
  0x1f   : > { %2825 = vmatmul.msk.f32.gmra.mxu3 %vm384_vm2, %v3421_v35  ;;  %5149 = vst [vmem:[#allocation13_spill] sm:$0xff] %v3470_v55  ;;  %v3506_v3 = vsel %vm301_vm1, %v368_v50, %v370_v63  ;;  %v312_v43 = vrot.slane %v3538_v27, 1  ;;  %v313_v44 = vrot.slane %v3541_v29, 1  ;;  %v3564_v51 = vld [vmem:[%s3347_s30 + $0x100] sm:$0x3]  ;;  %v335_v60 = vrot.slane %v3555_v48, 1 }
  0x20   : > { %2801 = vmatmul.msk.f32.gmra.mxu0 %vm384_vm2, %v306_v42  ;;  %5150 = vst [vmem:[#allocation14_spill] sm:$0xff] %v3479_v58  ;;  %v3529_v16 = vsel %vm301_vm1, %v308_v52, %v310_v0  ;;  %v373_v42 = vrot.slane %v3524_v15, 1  ;;  %v3558_v49 = vsel %vm301_vm1, %v352_v30, %v353_v31  ;;  %v3567_v52 = vld [vmem:[%s3347_s30 + $0x160] sm:$0x3]  ;;  %v3001_v0 = vld [vmem:[%s5059_s1 + $0x18] sm:$0xf] }
  0x21   : > { %5151 = vst [vmem:[#allocation15_spill] sm:$0xff] %v3500_v1  ;;  %v3573_v62 = vsel %vm301_vm1, %v312_v43, %v313_v44  ;;  %v3576_v63 = vld [vmem:[%s3347_s30 + $0x40] sm:$0x3]  ;;  %v3035_v22 = vld [vmem:[%s5059_s1 + $0x1c] sm:$0xf]  ;;  %v375_v43 = vrot.slane %v3567_v52, 1  ;;  %3002 = vmatpush.msk.msra.mxu2 %vm449_vm0, %v3001_v0 }
  0x22   : > { %5152 = vst [vmem:[#allocation16_spill] sm:$0xff] %v3506_v3  ;;  %v3561_v50 = vsel %vm301_vm1, %v372_v32, %v373_v42  ;;  %v2967_v30 = vld [vmem:[%s5059_s1 + $0x14] sm:$0xf]  ;;  %v355_v32 = vrot.slane %v3564_v51, 1  ;;  %3036 = vmatpush.msk.msra.mxu3 %vm449_vm0, %v3035_v22  ;;  %v3609_v0 = vld [vmem:[%s3347_s30 + $0xa8] sm:$0xff] }
  0x23   : > { %5153 = vst [vmem:[#allocation17_spill] sm:$0xff] %v3521_v14  ;;  %2968 = vmatpush.msk.msra.mxu1 %vm449_vm0, %v2967_v30  ;;  %v3612_v22 = vld [vmem:[%s3347_s30 + $0xb0] sm:$0xff]  ;;  %v3615_v14 = vld [vmem:[%s3347_s30 + $0x108] sm:$0xff]  ;;  %v3668_v24 = vld [vmem:[%s3347_s30 + $0x118] sm:$0x3] }
  0x24   : > { %5154 = vst [vmem:[#allocation18_spill] sm:$0xff] %v3524_v15  ;;  %v315_v15 = vrot.slane %v3576_v63, 1  ;;  %v3603_v58 = vsel %vm301_vm1, %v353_v31, %v355_v32  ;;  %v3618_v30 = vld [vmem:[%s3347_s30 + $0x110] sm:$0xff]  ;;  %v337_v31 = vrot.slane %v3609_v0, 1 }
  0x25   : > { %2810 = vmatmul.msk.f32.gmra.mxu1 %vm384_vm2, %v3464_v53  ;;  %5155 = vst [vmem:[#allocation19_spill] sm:$0xff] %v3552_v47  ;;  %v3624_v41 = vld [vmem:[%s3347_s30 + $0x170] sm:$0xff] }
  0x26   : > { %2818 = vmatmul.msk.f32.gmra.mxu2 %vm384_vm2, %v3467_v54  ;;  %5156 = vst [vmem:[#allocation20_spill] sm:$0xff] %v3561_v50  ;;  %v3641_v32 = vld [vmem:[%s3347_s30 + $0x50] sm:$0xff] }
  0x27   : > { %2826 = vmatmul.msk.f32.gmra.mxu3 %vm384_vm2, %v3470_v55  ;;  %5157 = vst [vmem:[#allocation21_spill] sm:$0xff] %v3564_v51  ;;  %v378_v55 = vrot.slane %v3624_v41, 1  ;;  %v318_v40 = vrot.slane %v3641_v32, 1 }
  0x28   : > { %2802 = vmatmul.msk.f32.gmra.mxu0 %vm384_vm2, %v3484_v59  ;;  %5158 = vst [vmem:[#allocation22_spill] sm:$0xff] %v3567_v52  ;;  %v3606_v52 = vsel %vm301_vm1, %v373_v42, %v375_v43  ;;  %v338_v42 = vrot.slane %v3612_v22, 1  ;;  %v358_v43 = vrot.slane %v3618_v30, 1 }
  0x29   : > { %5160 = vst [vmem:[#allocation24_spill] sm:$0xff] %v3606_v52 }
  0x2a   : > { %5161 = vst [vmem:[#allocation25_spill] sm:$0xff] %v3618_v30  ;;  %v3656_v35 = vsel %vm301_vm1, %v337_v31, %v338_v42  ;;  %v3684_v31 = vld [vmem:[%s3347_s30 + $0x58] sm:$0x3] }
  0x2b   : > { %5163 = vst [vmem:[#allocation27_spill] sm:$0xff] %v3624_v41  ;;  %v3665_v41 = vld [vmem:[%s3347_s30 + $0xb8] sm:$0x3] }
  0x2c   : > { %5164 = vst [vmem:[#allocation28_spill] sm:$0xff] %v3656_v35 }
  0x2d   : > { %2811 = vmatmul.msk.f32.gmra.mxu1 %vm384_vm2, %v3500_v1  ;;  %5167 = vst [vmem:[#allocation31_spill] sm:$0xff] %v3668_v24 }
  0x2e   : > { %2819 = vmatmul.msk.f32.gmra.mxu2 %vm384_vm2, %v3503_v2 }
  0x2f   : > { %2827 = vmatmul.msk.f32.gmra.mxu3 %vm384_vm2, %v3506_v3  ;;  %v3621_v3 = vld [vmem:[%s3347_s30 + $0x168] sm:$0xff] }
  0x30   : > { %2803 = vmatmul.msk.f32.gmra.mxu0 %vm384_vm2, %v3529_v16  ;;  %5162 = vst [vmem:[#allocation26_spill] sm:$0xff] %v3621_v3 }
  0x35   : > { %2812 = vmatmul.msk.f32.gmra.mxu1 %vm384_vm2, %v3552_v47 }
  0x36   : > { %2820 = vmatmul.msk.f32.gmra.mxu2 %vm384_vm2, %v3558_v49 }
  0x37   : > { %2828 = vmatmul.msk.f32.gmra.mxu3 %vm384_vm2, %v3561_v50  ;;  %v3600_v50 = vsel %vm301_vm1, %v333_v25, %v335_v60  ;;  %v3629_v25 = vsel %vm301_vm1, %v313_v44, %v315_v15  ;;  %v3638_v60 = vld [vmem:[%s3347_s30 + $0x48] sm:$0xff]  ;;  %v3069_v15 = vld [vmem:[%s5059_s1 + $0x20] sm:$0xf]  ;;  %v357_v44 = vrot.slane %v3615_v14, 1 }
  0x38   : > { %2804 = vmatmul.msk.f32.gmra.mxu0 %vm384_vm2, %v3573_v62  ;;  %5159 = vst [vmem:[#allocation23_spill] sm:$0xff] %v3600_v50  ;;  %v317_v26 = vrot.slane %v3638_v60, 1 }
  0x39   : > { %3070 = vmatpush.msk.msra.mxu0 %vm449_vm0, %v3069_v15  ;;  %v3659_v13 = vsel %vm301_vm1, %v357_v44, %v358_v43  ;;  %v3671_v15 = vld [vmem:[%s3347_s30 + $0x178] sm:$0x3]  ;;  %v360_v44 = vrot.slane %v3668_v24, 1 }
  0x3a   : > { %5165 = vst [vmem:[#allocation29_spill] sm:$0xff] %v3659_v13  ;;  %v3676_v12 = vsel %vm301_vm1, %v317_v26, %v318_v40  ;;  %v380_v30 = vrot.slane %v3671_v15, 1  ;;  %v320_v26 = vrot.slane %v3684_v31, 1 }
  0x3c   : > { %v3703_v24 = vsel %vm301_vm1, %v318_v40, %v320_v26  ;;  %v750_v40 = vrot.slane %v3407_v28, 2  ;;  %v762_v26 = vrot.slane %v3638_v60, 2 }
  0x3d   : > { %2813 = vmatmul.msk.f32.gmra.mxu1 %vm384_vm2, %v3600_v50 }
  0x3e   : > { %2821 = vmatmul.msk.f32.gmra.mxu2 %vm384_vm2, %v3603_v58 }
  0x3f   : > { %2829 = vmatmul.msk.f32.gmra.mxu3 %vm384_vm2, %v3606_v52  ;;  %v377_v52 = vrot.slane %v3621_v3, 1 }
  0x40   : > { %2805 = vmatmul.msk.f32.gmra.mxu0 %vm384_vm2, %v3629_v25 }
  0x41   : > { %v3662_v3 = vsel %vm301_vm1, %v377_v52, %v378_v55  ;;  %v340_v52 = vrot.slane %v3665_v41, 1 }
  0x42   : > { %5166 = vst [vmem:[#allocation30_spill] sm:$0xff] %v3662_v3 }
  0x43   : > { %v3692_v51 = vsel %vm301_vm1, %v338_v42, %v340_v52  ;;  %v747_v42 = vrot.slane %v3377_v18, 2  ;;  %v753_v52 = vrot.slane %v3454_v46, 2 }
  0x44   : > { %5168 = vst [vmem:[#allocation32_spill] sm:$0xff] %v3692_v51 }
  0x45   : > { %2814 = vmatmul.msk.f32.gmra.mxu1 %vm384_vm2, %v3656_v35 }
  0x46   : > { %2822 = vmatmul.msk.f32.gmra.mxu2 %vm384_vm2, %v3659_v13  ;;  %v3695_v13 = vsel %vm301_vm1, %v358_v43, %v360_v44  ;;  %v748_v43 = vrot.slane %v3386_v21, 2 }
  0x47   : > { %2830 = vmatmul.msk.f32.gmra.mxu3 %vm384_vm2, %v3662_v3  ;;  %v3698_v3 = vsel %vm301_vm1, %v378_v55, %v380_v30 }
  0x48   : > { %2806 = vmatmul.msk.f32.gmra.mxu0 %vm384_vm2, %v3676_v12  ;;  %5169 = vst [vmem:[#allocation33_spill] sm:$0xff] %v3698_v3  ;;  %v749_v55 = vsel %vm746_vm3, %v747_v42, %v748_v43  ;;  %v751_v30 = vsel %vm746_vm3, %v748_v43, %v750_v40  ;;  %v763_v42 = vrot.slane %v3641_v32, 2  ;;  %v765_v43 = vrot.slane %v3684_v31, 2 }
  0x49   : > { %v767_v40 = vrot.slane %v3350_v5, 2 }
  0x4d   : > { %2815 = vmatmul.msk.f32.gmra.mxu1 %vm384_vm2, %v3692_v51 }
  0x4e   : > { %2823 = vmatmul.msk.f32.gmra.mxu2 %vm384_vm2, %v3695_v13 }
  0x4f   : > { %2831 = vmatmul.msk.f32.gmra.mxu3 %vm384_vm2, %v3698_v3 }
  0x50   : > { %2807 = vmatmul.msk.f32.gmra.mxu0 %vm384_vm2, %v3703_v24 }
  0x55   : > { %2833 = vmatmul.msk.f32.vlgmr.msrb.gmra.mxu1 %vm384_vm2, %v3377_v18  ;;  %v752_v18 = vrot.slane %v3451_v45, 2 }
  0x56   : > { %2867 = vmatmul.msk.f32.vlgmr.msrb.gmra.mxu2 %vm384_vm2, %v749_v55  ;;  %v3795_v55 = vsel %vm746_vm3, %v763_v42, %v765_v43 }
  0x57   : > { %2901 = vmatmul.msk.f32.vlgmr.msrb.gmra.mxu3 %vm384_vm2, %v3451_v45  ;;  %v3733_v28 = vsel %vm746_vm3, %v752_v18, %v753_v52 }
  0x58   : > { %2935 = vmatmul.msk.f32.vlgmr.msrb.gmra.mxu0 %vm384_vm2, %v3484_v59 }
  0x5d   : > { %2834 = vmatmul.msk.f32.gmra.mxu1 %vm384_vm2, %v3386_v21  ;;  %v755_v21 = vrot.slane %v3492_v61, 2 }
  0x5e   : > { %2868 = vmatmul.msk.f32.gmra.mxu2 %vm384_vm2, %v751_v30  ;;  %v768_v30 = vrot.slane %v3353_v6, 2 }
  0x5f   : > { %2902 = vmatmul.msk.f32.gmra.mxu3 %vm384_vm2, %v3454_v46  ;;  %v3745_v59 = vsel %vm746_vm3, %v753_v52, %v755_v21  ;;  %v770_v21 = vrot.slane %v3374_v17, 2  ;;  %v772_v17 = vrot.slane %v3424_v36, 2 }
  0x60   : > { %2936 = vmatmul.msk.f32.gmra.mxu0 %vm384_vm2, %v3529_v16  ;;  %v758_v16 = vrot.slane %v3541_v29, 2  ;;  %v3810_v18 = vsel %vm746_vm3, %v767_v40, %v768_v30 }
  0x61   : > { %5170 = vst [vmem:[#allocation34_spill] sm:$0xff] %v3810_v18 }
  0x65   : > { %2835 = vmatmul.msk.f32.gmra.mxu1 %vm384_vm2, %v3451_v45  ;;  %v757_v45 = vrot.slane %v3538_v27, 2 }
  0x66   : > { %2869 = vmatmul.msk.f32.gmra.mxu2 %vm384_vm2, %v3733_v28 }
  0x67   : > { %2903 = vmatmul.msk.f32.gmra.mxu3 %vm384_vm2, %v3538_v27  ;;  %v3758_v61 = vsel %vm746_vm3, %v757_v45, %v758_v16 }
  0x68   : > { %2937 = vmatmul.msk.f32.gmra.mxu0 %vm384_vm2, %v3573_v62 }
  0x6d   : > { %2836 = vmatmul.msk.f32.gmra.mxu1 %vm384_vm2, %v3454_v46  ;;  %v760_v46 = vrot.slane %v3576_v63, 2  ;;  %v3783_v63 = vsel %vm746_vm3, %v762_v26, %v763_v42  ;;  %v773_v42 = vrot.slane %v3427_v37, 2 }
  0x6e   : > { %2870 = vmatmul.msk.f32.gmra.mxu2 %vm384_vm2, %v3745_v59 }
  0x6f   : > { %2904 = vmatmul.msk.f32.gmra.mxu3 %vm384_vm2, %v3541_v29  ;;  %v3770_v44 = vsel %vm746_vm3, %v758_v16, %v760_v46 }
  0x70   : > { %2938 = vmatmul.msk.f32.gmra.mxu0 %vm384_vm2, %v3629_v25 }
  0x75   : > { %2837 = vmatmul.msk.f32.gmra.mxu1 %vm384_vm2, %v3538_v27 }
  0x76   : > { %2871 = vmatmul.msk.f32.gmra.mxu2 %vm384_vm2, %v3758_v61 }
  0x77   : > { %2905 = vmatmul.msk.f32.gmra.mxu3 %vm384_vm2, %v3638_v60 }
  0x78   : > { %2939 = vmatmul.msk.f32.gmra.mxu0 %vm384_vm2, %v3676_v12 }
  0x7d   : > { %2838 = vmatmul.msk.f32.gmra.mxu1 %vm384_vm2, %v3541_v29 }
  0x7e   : > { %2872 = vmatmul.msk.f32.gmra.mxu2 %vm384_vm2, %v3770_v44 }
  0x7f   : > { %2906 = vmatmul.msk.f32.gmra.mxu3 %vm384_vm2, %v3641_v32 }
  0x80   : > { %2940 = vmatmul.msk.f32.gmra.mxu0 %vm384_vm2, %v3703_v24 }
  0x85   : > { %2839 = vmatmul.msk.f32.gmra.mxu1 %vm384_vm2, %v3638_v60 }
  0x86   : > { %2873 = vmatmul.msk.f32.gmra.mxu2 %vm384_vm2, %v3783_v63 }
  0x87   : > { %2907 = vmatmul.msk.f32.gmra.mxu3 %vm384_vm2, %v3350_v5 }
  0x88   : > { %2941 = vmatmul.msk.f32.gmra.mxu0 %vm384_vm2, %v3380_v19 }
  0x8d   : > { %2840 = vmatmul.msk.f32.gmra.mxu1 %vm384_vm2, %v3641_v32 }
  0x8e   : > { %2874 = vmatmul.msk.f32.gmra.mxu2 %vm384_vm2, %v3795_v55 }
  0x8f   : > { %2908 = vmatmul.msk.f32.gmra.mxu3 %vm384_vm2, %v3353_v6 }
  0x90   : > { %2942 = vmatmul.msk.f32.gmra.mxu0 %vm384_vm2, %v3415_v33 }
  0x92   : > { %v3807_v31 = vpop.f32.mrf.mxu1 }
  0x95   : > { %2841 = vmatmul.msk.f32.gmra.mxu1 %vm384_vm2, %v3350_v5  ;;  %v3814_v52 = vpop.f32.mrf.mxu0  ;;  %v3830_v5 = vsel %vm746_vm3, %v768_v30, %v770_v21  ;;  %v3851_v30 = vsel %vm746_vm3, %v772_v17, %v773_v42 }
  0x96   : > { %2875 = vmatmul.msk.f32.gmra.mxu2 %vm384_vm2, %v3810_v18  ;;  %5172 = vst [vmem:[#allocation36_spill] sm:$0xff] %v3830_v5 }
  0x97   : > { %2909 = vmatmul.msk.f32.gmra.mxu3 %vm384_vm2, %v3424_v36  ;;  %5174 = vst [vmem:[#allocation38_spill] sm:$0xff] %v3851_v30 }
  0x98   : > { %2943 = vmatmul.msk.f32.gmra.mxu0 %vm384_vm2, %v3464_v53 }
  0x99   : > { %v3823_v45 = vpop.f32.mrf.mxu2 }
  0x9a   : > { %v3825_v16 = vpop.f32.mrf.mxu3  ;;  %v3827_v46 = vpop.f32.mrf.mxu1 }
  0x9b   : > { %5171 = vst [vmem:[#allocation35_spill] sm:$0xff] %v3825_v16  ;;  %v775_v16 = vrot.slane %v3473_v56, 2  ;;  %v777_v56 = vrot.slane %v3509_v4, 2 }
  0x9d   : > { %2842 = vmatmul.msk.f32.gmra.mxu1 %vm384_vm2, %v3353_v6  ;;  %v3834_v26 = vpop.f32.mrf.mxu0 }
  0x9e   : > { %2876 = vmatmul.msk.f32.gmra.mxu2 %vm384_vm2, %v3830_v5 }
  0x9f   : > { %2910 = vmatmul.msk.f32.gmra.mxu3 %vm384_vm2, %v3427_v37 }
  0xa0   : > { %2944 = vmatmul.msk.f32.gmra.mxu0 %vm384_vm2, %v3500_v1 }
  0xa1   : > { %v3844_v43 = vpop.f32.mrf.mxu2 }
  0xa2   : > { %v3846_v40 = vpop.f32.mrf.mxu3  ;;  %v3848_v6 = vpop.f32.mrf.mxu1 }
  0xa3   : > { %5173 = vst [vmem:[#allocation37_spill] sm:$0xff] %v3846_v40 }
  0xa5   : > { %2843 = vmatmul.msk.f32.gmra.mxu1 %vm384_vm2, %v3424_v36  ;;  %v3855_v21 = vpop.f32.mrf.mxu0  ;;  %v3871_v36 = vsel %vm746_vm3, %v773_v42, %v775_v16 }
  0xa6   : > { %2877 = vmatmul.msk.f32.gmra.mxu2 %vm384_vm2, %v3851_v30  ;;  %5176 = vst [vmem:[#allocation40_spill] sm:$0xff] %v3871_v36 }
  0xa7   : > { %2911 = vmatmul.msk.f32.gmra.mxu3 %vm384_vm2, %v3509_v4 }
  0xa8   : > { %2945 = vmatmul.msk.f32.gmra.mxu0 %vm384_vm2, %v3552_v47 }
  0xa9   : > { %v3864_v40 = vpop.f32.mrf.mxu2 }
  0xaa   : > { %v3866_v17 = vpop.f32.mrf.mxu3  ;;  %v3868_v1 = vpop.f32.mrf.mxu1 }
  0xab   : > { %5175 = vst [vmem:[#allocation39_spill] sm:$0xff] %v3866_v17  ;;  %v778_v17 = vrot.slane %v3512_v8, 2 }
  0xad   : > { %2844 = vmatmul.msk.f32.gmra.mxu1 %vm384_vm2, %v3427_v37  ;;  %v3875_v30 = vpop.f32.mrf.mxu0  ;;  %v3892_v47 = vsel %vm746_vm3, %v777_v56, %v778_v17 }
  0xae   : > { %2878 = vmatmul.msk.f32.gmra.mxu2 %vm384_vm2, %v3871_v36  ;;  %5178 = vst [vmem:[#allocation42_spill] sm:$0xff] %v3892_v47 }
  0xaf   : > { %2912 = vmatmul.msk.f32.gmra.mxu3 %vm384_vm2, %v3512_v8 }
  0xb0   : > { %2946 = vmatmul.msk.f32.gmra.mxu0 %vm384_vm2, %v3600_v50  ;;  %v780_v50 = vrot.slane %v3555_v48, 2  ;;  %v782_v48 = vrot.slane %v3609_v0, 2 }
  0xb1   : > { %v3885_v16 = vpop.f32.mrf.mxu2 }
  0xb2   : > { %v3887_v42 = vpop.f32.mrf.mxu3  ;;  %v3889_v37 = vpop.f32.mrf.mxu1 }
  0xb3   : > { %5177 = vst [vmem:[#allocation41_spill] sm:$0xff] %v3887_v42 }
  0xb5   : > { %2845 = vmatmul.msk.f32.gmra.mxu1 %vm384_vm2, %v3509_v4  ;;  %v3896_v36 = vpop.f32.mrf.mxu0  ;;  %v3912_v4 = vsel %vm746_vm3, %v778_v17, %v780_v50 }
  0xb6   : > { %2879 = vmatmul.msk.f32.gmra.mxu2 %vm384_vm2, %v3892_v47  ;;  %5180 = vst [vmem:[#allocation44_spill] sm:$0xff] %v3912_v4 }
  0xb7   : > { %2913 = vmatmul.msk.f32.gmra.mxu3 %vm384_vm2, %v3609_v0 }
  0xb8   : > { %2947 = vmatmul.msk.f32.gmra.mxu0 %vm384_vm2, %v3656_v35 }
  0xb9   : > { %v3905_v42 = vpop.f32.mrf.mxu2 }
  0xba   : > { %v3907_v56 = vpop.f32.mrf.mxu3  ;;  %v3909_v53 = vpop.f32.mrf.mxu1 }
  0xbb   : > { %5179 = vst [vmem:[#allocation43_spill] sm:$0xff] %v3907_v56  ;;  %v783_v56 = vrot.slane %v3612_v22, 2 }
  0xbd   : > { %2846 = vmatmul.msk.f32.gmra.mxu1 %vm384_vm2, %v3512_v8  ;;  %v3916_v47 = vpop.f32.mrf.mxu0  ;;  %v3933_v35 = vsel %vm746_vm3, %v782_v48, %v783_v56 }
  0xbe   : > { %2880 = vmatmul.msk.f32.gmra.mxu2 %vm384_vm2, %v3912_v4  ;;  %5183 = vst [vmem:[#allocation47_spill] sm:$0xff] %v3933_v35 }
  0xbf   : > { %2914 = vmatmul.msk.f32.gmra.mxu3 %vm384_vm2, %v3612_v22 }
  0xc0   : > { %2948 = vmatmul.msk.f32.gmra.mxu0 %vm384_vm2, %v3692_v51  ;;  %v785_v51 = vrot.slane %v3665_v41, 2  ;;  %v787_v41 = vrot.slane %v3356_v7, 2 }
  0xc1   : > { %v3926_v50 = vpop.f32.mrf.mxu2 }
  0xc2   : > { %5181 = vst [vmem:[#allocation45_spill] sm:$0xff] %v3926_v50  ;;  %v3928_v17 = vpop.f32.mrf.mxu3  ;;  %v3930_v8 = vpop.f32.mrf.mxu1 }
  0xc3   : > { %5182 = vst [vmem:[#allocation46_spill] sm:$0xff] %v3928_v17 }
  0xc5   : > { %2847 = vmatmul.msk.f32.gmra.mxu1 %vm384_vm2, %v3609_v0  ;;  %v3937_v4 = vpop.f32.mrf.mxu0  ;;  %v3953_v0 = vsel %vm746_vm3, %v783_v56, %v785_v51 }
  0xc6   : > { %2881 = vmatmul.msk.f32.gmra.mxu2 %vm384_vm2, %v3933_v35  ;;  %5186 = vst [vmem:[#allocation50_spill] sm:$0xff] %v3953_v0 }
  0xc7   : > { %2915 = vmatmul.msk.f32.gmra.mxu3 %vm384_vm2, %v3356_v7 }
  0xc8   : > { %2949 = vmatmul.msk.f32.gmra.mxu0 %vm384_vm2, %v3392_v23 }
  0xc9   : > { %v3946_v17 = vpop.f32.mrf.mxu2 }
  0xca   : > { %5184 = vst [vmem:[#allocation48_spill] sm:$0xff] %v3946_v17  ;;  %v3948_v48 = vpop.f32.mrf.mxu3  ;;  %v3950_v5 = vpop.f32.mrf.mxu1 }
  0xcb   : > { %5185 = vst [vmem:[#allocation49_spill] sm:$0xff] %v3948_v48  ;;  %v788_v48 = vrot.slane %v3361_v10, 2 }
  0xcd   : > { %2848 = vmatmul.msk.f32.gmra.mxu1 %vm384_vm2, %v3612_v22  ;;  %v3957_v35 = vpop.f32.mrf.mxu0  ;;  %v3972_v23 = vsel %vm746_vm3, %v787_v41, %v788_v48 }
  0xce   : > { %2882 = vmatmul.msk.f32.gmra.mxu2 %vm384_vm2, %v3953_v0  ;;  %5189 = vst [vmem:[#allocation53_spill] sm:$0xff] %v3972_v23 }
  0xcf   : > { %2916 = vmatmul.msk.f32.gmra.mxu3 %vm384_vm2, %v3361_v10 }
  0xd0   : > { %2950 = vmatmul.msk.f32.gmra.mxu0 %vm384_vm2, %v3418_v34  ;;  %v790_v34 = vrot.slane %v3383_v20, 2  ;;  %v792_v20 = vrot.slane %v3430_v38, 2 }
  0xd1   : > { %v3967_v51 = vpop.f32.mrf.mxu2 }
  0xd2   : > { %5187 = vst [vmem:[#allocation51_spill] sm:$0xff] %v3967_v51  ;;  %v3969_v56 = vpop.f32.mrf.mxu3  ;;  %v650_v22 = vpop.f32.mrf.mxu1 }
  0xd3   : > { %5188 = vst [vmem:[#allocation52_spill] sm:$0xff] %v3969_v56  ;;  %v651_v51 = vadd.f32 %v650_v22, %v3814_v52  ;;  %v793_v52 = vrot.slane %v3433_v39, 2 }
  0xd5   : > { %2849 = vmatmul.msk.f32.gmra.mxu1 %vm384_vm2, %v3356_v7  ;;  %v1229_v0 = vpop.f32.mrf.mxu0  ;;  %v3985_v7 = vsel %vm746_vm3, %v788_v48, %v790_v34 }
  0xd6   : > { %2883 = vmatmul.msk.f32.gmra.mxu2 %vm384_vm2, %v3972_v23 }
  0xd7   : > { %2917 = vmatmul.msk.f32.gmra.mxu3 %vm384_vm2, %v3430_v38 }
  0xd8   : > { %2951 = vmatmul.msk.f32.gmra.mxu0 %vm384_vm2, %v3467_v54 }
  0xd9   : > { %v913_v56 = vpop.f32.mrf.mxu2 }
  0xda   : > { %v1069_v41 = vpop.f32.mrf.mxu3  ;;  %v1009_v17 = vadd.f32 %v913_v56, %v651_v51  ;;  %v653_v50 = vpop.f32.mrf.mxu1 }
  0xdb   : > { %v654_v34 = vadd.f32 %v653_v50, %v3834_v26  ;;  %v795_v26 = vrot.slane %v3476_v57, 2  ;;  %v797_v57 = vrot.slane %v3515_v9, 2 }
  0xdc   : > { %v1165_v33 = vadd.f32 %v1069_v41, %v1009_v17 }
  0xdd   : > { %2850 = vmatmul.msk.f32.gmra.mxu1 %vm384_vm2, %v3361_v10  ;;  %v1232_v23 = vpop.f32.mrf.mxu0 }
  0xde   : > { %v3989_v18 = vadd.f32 %v1229_v0, %v1165_v33  ;;  %2884 = vmatmul.msk.f32.gmra.mxu2 %vm384_vm2, %v3985_v7  ;;  %v4001_v0 = vsel %vm746_vm3, %v792_v20, %v793_v52 }
  0xdf   : > { %2918 = vmatmul.msk.f32.gmra.mxu3 %vm384_vm2, %v3433_v39 }
  0xe0   : > { %2952 = vmatmul.msk.f32.gmra.mxu0 %vm384_vm2, %v3503_v2 }
  0xe1   : > { %v916_v17 = vpop.f32.mrf.mxu2 }
  0xe2   : > { %v1072_v10 = vpop.f32.mrf.mxu3  ;;  %v1010_v48 = vadd.f32 %v916_v17, %v654_v34  ;;  %v656_v33 = vpop.f32.mrf.mxu1 }
  0xe3   : > { %v657_v50 = vadd.f32 %v656_v33, %v3855_v21  ;;  %v798_v21 = vrot.slane %v3518_v11, 2 }
  0xe4   : > { %v1166_v51 = vadd.f32 %v1072_v10, %v1010_v48 }
  0xe5   : > { %2851 = vmatmul.msk.f32.gmra.mxu1 %vm384_vm2, %v3430_v38  ;;  %v1235_v56 = vpop.f32.mrf.mxu0 }
  0xe6   : > { %v4005_v22 = vadd.f32 %v1232_v23, %v1166_v51  ;;  %2885 = vmatmul.msk.f32.gmra.mxu2 %vm384_vm2, %v4001_v0  ;;  %v4016_v23 = vsel %vm746_vm3, %v793_v52, %v795_v26  ;;  %v4032_v26 = vsel %vm746_vm3, %v797_v57, %v798_v21 }
  0xe7   : > { %2919 = vmatmul.msk.f32.gmra.mxu3 %vm384_vm2, %v3515_v9 }
  0xe8   : > { %2953 = vmatmul.msk.f32.gmra.mxu0 %vm384_vm2, %v3558_v49 }
  0xe9   : > { %v919_v41 = vpop.f32.mrf.mxu2 }
  0xea   : > { %v1075_v20 = vpop.f32.mrf.mxu3  ;;  %v1011_v34 = vadd.f32 %v919_v41, %v657_v50  ;;  %v659_v38 = vpop.f32.mrf.mxu1 }
  0xeb   : > { %v660_v52 = vadd.f32 %v659_v38, %v3875_v30  ;;  %v5191_v30 = vld [vmem:[#allocation21_spill] sm:$0xff] }
  0xec   : > { %v1167_v17 = vadd.f32 %v1075_v20, %v1011_v34  ;;  %v800_v34 = vrot.slane %v5191_v30, 2 }
  0xed   : > { %2852 = vmatmul.msk.f32.gmra.mxu1 %vm384_vm2, %v3433_v39  ;;  %v1238_v10 = vpop.f32.mrf.mxu0 }
  0xee   : > { %v4020_v48 = vadd.f32 %v1235_v56, %v1167_v17  ;;  %2886 = vmatmul.msk.f32.gmra.mxu2 %vm384_vm2, %v4016_v23  ;;  %v5192_v17 = vld [vmem:[#allocation29_spill] sm:$0xff] }
  0xef   : > { %2920 = vmatmul.msk.f32.gmra.mxu3 %vm384_vm2, %v3518_v11 }
  0xf0   : > { %2954 = vmatmul.msk.f32.gmra.mxu0 %vm384_vm2, %v3603_v58 }
  0xf1   : > { %v922_v33 = vpop.f32.mrf.mxu2 }
  0xf2   : > { %v1078_v39 = vpop.f32.mrf.mxu3  ;;  %v1012_v51 = vadd.f32 %v922_v33, %v660_v52  ;;  %v662_v56 = vpop.f32.mrf.mxu1 }
  0xf3   : > { %v663_v38 = vadd.f32 %v662_v56, %v3896_v36  ;;  %v5194_v36 = vld [vmem:[#allocation25_spill] sm:$0xff]  ;;  %v802_v56 = vrot.slane %v3615_v14, 2 }
  0xf4   : > { %v1168_v50 = vadd.f32 %v1078_v39, %v1012_v51  ;;  %v803_v30 = vrot.slane %v5194_v36, 2 }
  0xf5   : > { %2853 = vmatmul.msk.f32.gmra.mxu1 %vm384_vm2, %v3515_v9  ;;  %v1241_v41 = vpop.f32.mrf.mxu0 }
  0xf6   : > { %v4036_v20 = vadd.f32 %v1238_v10, %v1168_v50  ;;  %2887 = vmatmul.msk.f32.gmra.mxu2 %vm384_vm2, %v4032_v26  ;;  %v4047_v10 = vsel %vm746_vm3, %v798_v21, %v800_v34 }
  0xf7   : > { %2921 = vmatmul.msk.f32.gmra.mxu3 %vm384_vm2, %v3615_v14 }
  0xf8   : > { %5190 = vst [vmem:[#allocation54_spill] sm:$0xff] %v4036_v20  ;;  %2955 = vmatmul.msk.f32.gmra.mxu0 %vm384_vm2, %v5192_v17 }
  0xf9   : > { %v925_v57 = vpop.f32.mrf.mxu2 }
  0xfa   : > { %v1081_v52 = vpop.f32.mrf.mxu3  ;;  %v1013_v33 = vadd.f32 %v925_v57, %v663_v38  ;;  %v665_v9 = vpop.f32.mrf.mxu1  ;;  %v4063_v57 = vsel %vm746_vm3, %v802_v56, %v803_v30 }
  0xfb   : > { %v666_v21 = vadd.f32 %v665_v9, %v3916_v47  ;;  %v5196_v47 = vld [vmem:[#allocation2_spill] sm:$0xff]  ;;  %v5197_v9 = vld [vmem:[#allocation31_spill] sm:$0xff] }
  0xfc   : > { %v1169_v39 = vadd.f32 %v1081_v52, %v1013_v33 }
  0xfd   : > { %2854 = vmatmul.msk.f32.gmra.mxu1 %vm384_vm2, %v3518_v11  ;;  %v1244_v51 = vpop.f32.mrf.mxu0 }
  0xfe   : > { %v4051_v50 = vadd.f32 %v1241_v41, %v1169_v39  ;;  %2888 = vmatmul.msk.f32.gmra.mxu2 %vm384_vm2, %v4047_v10 }
  0xff   : > { %2922 = vmatmul.msk.f32.gmra.mxu3 %vm384_vm2, %v5194_v36 }
 0x100   : > { %5193 = vst [vmem:[#allocation21_spill] sm:$0xff] %v4051_v50  ;;  %2956 = vmatmul.msk.f32.gmra.mxu0 %vm384_vm2, %v3695_v13  ;;  %v805_v50 = vrot.slane %v5197_v9, 2 }
 0x101   : > { %v928_v34 = vpop.f32.mrf.mxu2 }
 0x102   : > { %v1084_v11 = vpop.f32.mrf.mxu3  ;;  %v1014_v38 = vadd.f32 %v928_v34, %v666_v21  ;;  %v668_v41 = vpop.f32.mrf.mxu1  ;;  %v5198_v34 = vld [vmem:[#allocation5_spill] sm:$0xff] }
 0x103   : > { %v669_v21 = vadd.f32 %v668_v41, %v3937_v4  ;;  %v5200_v4 = vld [vmem:[#allocation3_spill] sm:$0xff]  ;;  %v807_v41 = vrot.slane %v5196_v47, 2 }
 0x104   : > { %v1170_v52 = vadd.f32 %v1084_v11, %v1014_v38  ;;  %v808_v9 = vrot.slane %v5200_v4, 2 }
 0x105   : > { %2855 = vmatmul.msk.f32.gmra.mxu1 %vm384_vm2, %v3615_v14  ;;  %v1247_v33 = vpop.f32.mrf.mxu0 }
 0x106   : > { %v4067_v39 = vadd.f32 %v1244_v51, %v1170_v52  ;;  %2889 = vmatmul.msk.f32.gmra.mxu2 %vm384_vm2, %v4063_v57  ;;  %v4078_v51 = vsel %vm746_vm3, %v803_v30, %v805_v50  ;;  %v5201_v30 = vld [vmem:[#allocation9_spill] sm:$0xff] }
 0x107   : > { %2923 = vmatmul.msk.f32.gmra.mxu3 %vm384_vm2, %v5196_v47 }
 0x108   : > { %5195 = vst [vmem:[#allocation29_spill] sm:$0xff] %v4067_v39  ;;  %2957 = vmatmul.msk.f32.gmra.mxu0 %vm384_vm2, %v5198_v34 }
 0x109   : > { %v931_v56 = vpop.f32.mrf.mxu2 }
 0x10a   : > { %v1087_v11 = vpop.f32.mrf.mxu3  ;;  %v1015_v38 = vadd.f32 %v931_v56, %v669_v21  ;;  %v671_v14 = vpop.f32.mrf.mxu1 }
 0x10b   : > { %v672_v50 = vadd.f32 %v671_v14, %v3957_v35  ;;  %v5204_v35 = vld [vmem:[#allocation10_spill] sm:$0xff] }
 0x10c   : > { %v1171_v52 = vadd.f32 %v1087_v11, %v1015_v38  ;;  %v4094_v11 = vsel %vm746_vm3, %v807_v41, %v808_v9  ;;  %v5205_v14 = vld [vmem:[#allocation6_spill] sm:$0xff] }
 0x10d   : > { %2856 = vmatmul.msk.f32.gmra.mxu1 %vm384_vm2, %v5194_v36  ;;  %v1250_v39 = vpop.f32.mrf.mxu0  ;;  %5202 = vst [vmem:[#allocation2_spill] sm:$0xff] %v4094_v11 }
 0x10e   : > { %v4082_v20 = vadd.f32 %v1247_v33, %v1171_v52  ;;  %2890 = vmatmul.msk.f32.gmra.mxu2 %vm384_vm2, %v4078_v51 }
 0x10f   : > { %2924 = vmatmul.msk.f32.gmra.mxu3 %vm384_vm2, %v5200_v4 }
 0x110   : > { %5199 = vst [vmem:[#allocation25_spill] sm:$0xff] %v4082_v20  ;;  %2958 = vmatmul.msk.f32.gmra.mxu0 %vm384_vm2, %v5201_v30  ;;  %v810_v30 = vrot.slane %v5205_v14, 2 }
 0x111   : > { %v934_v21 = vpop.f32.mrf.mxu2 }
 0x112   : > { %v1090_v36 = vpop.f32.mrf.mxu3  ;;  %v1016_v56 = vadd.f32 %v934_v21, %v672_v50  ;;  %v674_v33 = vpop.f32.mrf.mxu1  ;;  %v5206_v21 = vld [vmem:[#allocation13_spill] sm:$0xff] }
 0x113   : > { %v675_v50 = vadd.f32 %v674_v33, %v3807_v31  ;;  %v5208_v31 = vld [vmem:[#allocation11_spill] sm:$0xff]  ;;  %v812_v33 = vrot.slane %v5204_v35, 2 }
 0x114   : > { %v1172_v38 = vadd.f32 %v1090_v36, %v1016_v56  ;;  %v813_v14 = vrot.slane %v5208_v31, 2 }
 0x115   : > { %2857 = vmatmul.msk.f32.gmra.mxu1 %vm384_vm2, %v5196_v47  ;;  %v1253_v52 = vpop.f32.mrf.mxu0 }
 0x116   : > { %v4098_v20 = vadd.f32 %v1250_v39, %v1172_v38  ;;  %2891 = vmatmul.msk.f32.gmra.mxu2 %vm384_vm2, %v4094_v11  ;;  %v4109_v39 = vsel %vm746_vm3, %v808_v9, %v810_v30  ;;  %v5209_v30 = vld [vmem:[#allocation16_spill] sm:$0xff] }
 0x117   : > { %2925 = vmatmul.msk.f32.gmra.mxu3 %vm384_vm2, %v5204_v35 }
 0x118   : > { %5203 = vst [vmem:[#allocation31_spill] sm:$0xff] %v4098_v20  ;;  %2959 = vmatmul.msk.f32.gmra.mxu0 %vm384_vm2, %v5206_v21 }
 0x119   : > { %v937_v41 = vpop.f32.mrf.mxu2 }
 0x11a   : > { %v1093_v36 = vpop.f32.mrf.mxu3  ;;  %v1017_v56 = vadd.f32 %v937_v41, %v675_v50  ;;  %v677_v47 = vpop.f32.mrf.mxu1 }
 0x11b   : > { %v678_v9 = vadd.f32 %v677_v47, %v3827_v46  ;;  %v5212_v46 = vld [vmem:[#allocation17_spill] sm:$0xff]  ;;  %v5213_v47 = vld [vmem:[#allocation14_spill] sm:$0xff] }
 0x11c   : > { %v1173_v38 = vadd.f32 %v1093_v36, %v1017_v56  ;;  %v4125_v36 = vsel %vm746_vm3, %v812_v33, %v813_v14 }
 0x11d   : > { %2858 = vmatmul.msk.f32.gmra.mxu1 %vm384_vm2, %v5200_v4  ;;  %v1256_v20 = vpop.f32.mrf.mxu0  ;;  %5210 = vst [vmem:[#allocation3_spill] sm:$0xff] %v4125_v36 }
 0x11e   : > { %v4113_v11 = vadd.f32 %v1253_v52, %v1173_v38  ;;  %2892 = vmatmul.msk.f32.gmra.mxu2 %vm384_vm2, %v4109_v39 }
 0x11f   : > { %2926 = vmatmul.msk.f32.gmra.mxu3 %vm384_vm2, %v5208_v31 }
 0x120   : > { %5207 = vst [vmem:[#allocation5_spill] sm:$0xff] %v4113_v11  ;;  %2960 = vmatmul.msk.f32.gmra.mxu0 %vm384_vm2, %v5209_v30  ;;  %v815_v30 = vrot.slane %v5213_v47, 2 }
 0x121   : > { %v940_v50 = vpop.f32.mrf.mxu2 }
 0x122   : > { %v1096_v4 = vpop.f32.mrf.mxu3  ;;  %v1018_v41 = vadd.f32 %v940_v50, %v678_v9  ;;  %v680_v52 = vpop.f32.mrf.mxu1  ;;  %v5214_v50 = vld [vmem:[#allocation20_spill] sm:$0xff] }
 0x123   : > { %v681_v9 = vadd.f32 %v680_v52, %v3848_v6  ;;  %v5216_v6 = vld [vmem:[#allocation18_spill] sm:$0xff]  ;;  %v817_v52 = vrot.slane %v5212_v46, 2 }
 0x124   : > { %v1174_v56 = vadd.f32 %v1096_v4, %v1018_v41  ;;  %v818_v47 = vrot.slane %v5216_v6, 2 }
 0x125   : > { %2859 = vmatmul.msk.f32.gmra.mxu1 %vm384_vm2, %v5204_v35  ;;  %v1259_v38 = vpop.f32.mrf.mxu0 }
 0x126   : > { %v4129_v11 = vadd.f32 %v1256_v20, %v1174_v56  ;;  %2893 = vmatmul.msk.f32.gmra.mxu2 %vm384_vm2, %v4125_v36  ;;  %v4140_v20 = vsel %vm746_vm3, %v813_v14, %v815_v30  ;;  %v5217_v30 = vld [vmem:[#allocation24_spill] sm:$0xff] }
 0x127   : > { %2927 = vmatmul.msk.f32.gmra.mxu3 %vm384_vm2, %v5212_v46 }
 0x128   : > { %5211 = vst [vmem:[#allocation10_spill] sm:$0xff] %v4129_v11  ;;  %2961 = vmatmul.msk.f32.gmra.mxu0 %vm384_vm2, %v5214_v50 }
 0x129   : > { %v943_v33 = vpop.f32.mrf.mxu2 }
 0x12a   : > { %v1099_v4 = vpop.f32.mrf.mxu3  ;;  %v1019_v41 = vadd.f32 %v943_v33, %v681_v9  ;;  %v683_v35 = vpop.f32.mrf.mxu1 }
 0x12b   : > { %v684_v14 = vadd.f32 %v683_v35, %v3868_v1  ;;  %v5220_v1 = vld [vmem:[#allocation26_spill] sm:$0xff] }
 0x12c   : > { %v1175_v56 = vadd.f32 %v1099_v4, %v1019_v41  ;;  %v4156_v4 = vsel %vm746_vm3, %v817_v52, %v818_v47  ;;  %v5221_v35 = vld [vmem:[#allocation22_spill] sm:$0xff] }
 0x12d   : > { %2860 = vmatmul.msk.f32.gmra.mxu1 %vm384_vm2, %v5208_v31  ;;  %v1262_v11 = vpop.f32.mrf.mxu0  ;;  %5218 = vst [vmem:[#allocation13_spill] sm:$0xff] %v4156_v4  ;;  %v5222_v52 = vld [vmem:[#allocation30_spill] sm:$0xff] }
 0x12e   : > { %v4144_v36 = vadd.f32 %v1259_v38, %v1175_v56  ;;  %2894 = vmatmul.msk.f32.gmra.mxu2 %vm384_vm2, %v4140_v20 }
 0x12f   : > { %2928 = vmatmul.msk.f32.gmra.mxu3 %vm384_vm2, %v5216_v6 }
 0x130   : > { %5215 = vst [vmem:[#allocation6_spill] sm:$0xff] %v4144_v36  ;;  %2962 = vmatmul.msk.f32.gmra.mxu0 %vm384_vm2, %v5217_v30 }
 0x131   : > { %v946_v9 = vpop.f32.mrf.mxu2 }
 0x132   : > { %v1102_v31 = vpop.f32.mrf.mxu3  ;;  %v1020_v33 = vadd.f32 %v946_v9, %v684_v14  ;;  %v686_v38 = vpop.f32.mrf.mxu1  ;;  %v820_v14 = vrot.slane %v5221_v35, 2  ;;  %v822_v35 = vrot.slane %v5220_v1, 2 }
 0x133   : > { %v687_v9 = vadd.f32 %v686_v38, %v3889_v37  ;;  %v5225_v37 = vld [vmem:[#allocation27_spill] sm:$0xff] }
 0x134   : > { %v1176_v41 = vadd.f32 %v1102_v31, %v1020_v33  ;;  %v247_v38 = vld [vmem:[%s3347_s30 + $0x188] sm:$0xff] }
 0x135   : > { %2861 = vmatmul.msk.f32.gmra.mxu1 %vm384_vm2, %v5212_v46  ;;  %v1265_v56 = vpop.f32.mrf.mxu0 }
 0x136   : > { %v4160_v36 = vadd.f32 %v1262_v11, %v1176_v41  ;;  %2895 = vmatmul.msk.f32.gmra.mxu2 %vm384_vm2, %v4156_v4  ;;  %v4171_v41 = vsel %vm746_vm3, %v818_v47, %v820_v14  ;;  %v246_v14 = vld [vmem:[%s3347_s30 + $0x180] sm:$0xff] }
 0x137   : > { %2929 = vmatmul.msk.f32.gmra.mxu3 %vm384_vm2, %v5220_v1  ;;  %5223 = vst [vmem:[#allocation17_spill] sm:$0xff] %v4171_v41 }
 0x138   : > { %5219 = vst [vmem:[#allocation11_spill] sm:$0xff] %v4160_v36  ;;  %2963 = vmatmul.msk.f32.gmra.mxu0 %vm384_vm2, %v5222_v52 }
 0x139   : > { %v949_v31 = vpop.f32.mrf.mxu2 }
 0x13a   : > { %v1105_v46 = vpop.f32.mrf.mxu3  ;;  %v1021_v33 = vadd.f32 %v949_v31, %v687_v9  ;;  %v689_v11 = vpop.f32.mrf.mxu1  ;;  %v823_v9 = vrot.slane %v5225_v37, 2  ;;  %v1199_v31 = vrot.slane %v247_v38, 1 }
 0x13b   : > { %v690_v47 = vadd.f32 %v689_v11, %v3909_v53 }
 0x13c   : > { %v1177_v36 = vadd.f32 %v1105_v46, %v1021_v33 }
 0x13d   : > { %2862 = vmatmul.msk.f32.gmra.mxu1 %vm384_vm2, %v5216_v6  ;;  %v1268_v30 = vpop.f32.mrf.mxu0 }
 0x13e   : > { %v4175_v4 = vadd.f32 %v1265_v56, %v1177_v36  ;;  %2896 = vmatmul.msk.f32.gmra.mxu2 %vm384_vm2, %v4171_v41  ;;  %v1198_v56 = vrot.slane %v246_v14, 1 }
 0x13f   : > { %2930 = vmatmul.msk.f32.gmra.mxu3 %vm384_vm2, %v5225_v37 }
 0x140   : > { %5224 = vst [vmem:[#allocation14_spill] sm:$0xff] %v4175_v4  ;;  %2964 = vmatmul.msk.f32.gmra.mxu0 %vm384_vm2, %v3698_v3  ;;  %v4189_v4 = vsel %vm746_vm3, %v822_v35, %v823_v9  ;;  %v4194_v53 = vsel %vm301_vm1, %v1198_v56, %v1199_v31 }
 0x141   : > { %v952_v36 = vpop.f32.mrf.mxu2 }
 0x142   : > { %v1108_v6 = vpop.f32.mrf.mxu3  ;;  %v1022_v46 = vadd.f32 %v952_v36, %v690_v47  ;;  %v692_v33 = vpop.f32.mrf.mxu1  ;;  %v248_v47 = vld [vmem:[%s3347_s30 + $0x190] sm:$0x3]  ;;  %v825_v36 = vrot.slane %v3671_v15, 2 }
 0x143   : > { %v693_v35 = vadd.f32 %v692_v33, %v3930_v8 }
 0x144   : > { %v1178_v52 = vadd.f32 %v1108_v6, %v1022_v46  ;;  %v1201_v46 = vrot.slane %v248_v47, 1 }
 0x145   : > { %2863 = vmatmul.msk.f32.gmra.mxu1 %vm384_vm2, %v5220_v1  ;;  %v1271_v41 = vpop.f32.mrf.mxu0 }
 0x146   : > { %v4196_v11 = vadd.f32 %v1268_v30, %v1178_v52  ;;  %2897 = vmatmul.msk.f32.gmra.mxu2 %vm384_vm2, %v4189_v4  ;;  %v4207_v30 = vsel %vm746_vm3, %v823_v9, %v825_v36  ;;  %v4212_v15 = vsel %vm301_vm1, %v1199_v31, %v1201_v46 }
 0x147   : > { %2931 = vmatmul.msk.f32.gmra.mxu3 %vm384_vm2, %v246_v14 }
 0x148   : > { %2965 = vmatmul.msk.f32.gmra.mxu0 %vm384_vm2, %v4194_v53 }
 0x149   : > { %v955_v1 = vpop.f32.mrf.mxu2 }
 0x14a   : > { %v1111_v6 = vpop.f32.mrf.mxu3  ;;  %v1023_v56 = vadd.f32 %v955_v1, %v693_v35  ;;  %v695_v3 = vpop.f32.mrf.mxu1 }
 0x14b   : > { %v696_v33 = vadd.f32 %v695_v3, %v3950_v5 }
 0x14c   : > { %v1179_v52 = vadd.f32 %v1111_v6, %v1023_v56 }
 0x14d   : > { %2864 = vmatmul.msk.f32.gmra.mxu1 %vm384_vm2, %v5225_v37  ;;  %v1274_v14 = vpop.f32.mrf.mxu0 }
 0x14e   : > { %v4214_v8 = vadd.f32 %v1271_v41, %v1179_v52  ;;  %2898 = vmatmul.msk.f32.gmra.mxu2 %vm384_vm2, %v4207_v30 }
 0x14f   : > { %2932 = vmatmul.msk.f32.gmra.mxu3 %vm384_vm2, %v247_v38 }
 0x150   : > { %2966 = vmatmul.msk.f32.gmra.mxu0 %vm384_vm2, %v4212_v15 }
 0x151   : > { %v958_v9 = vpop.f32.mrf.mxu2 }
 0x152   : > { %v1114_v47 = vpop.f32.mrf.mxu3  ;;  %v1024_v36 = vadd.f32 %v958_v9, %v696_v33  ;;  %v698_v37 = vpop.f32.mrf.mxu1 }
 0x153   : > { %v699_v3 = vadd.f32 %v698_v37, %v3823_v45 }
 0x154   : > { %v1180_v35 = vadd.f32 %v1114_v47, %v1024_v36 }
 0x155   : > { %2969 = vmatmul.msk.f32.vlgmr.msra.gmra.mxu1 %vm384_vm2, %v3733_v28  ;;  %v1277_v41 = vpop.f32.mrf.mxu0 }
 0x156   : > { %v4224_v31 = vadd.f32 %v1274_v14, %v1180_v35  ;;  %3003 = vmatmul.msk.f32.vlgmr.msra.gmra.mxu2 %vm384_vm2, %v3538_v27 }
 0x157   : > { %3037 = vmatmul.msk.f32.vlgmr.msra.gmra.mxu3 %vm384_vm2, %v3573_v62 }
 0x158   : > { %3071 = vmatmul.msk.f32.vlgmr.msra.gmra.mxu0 %vm384_vm2, %v3758_v61 }
 0x159   : > { %v961_v5 = vpop.f32.mrf.mxu2 }
 0x15a   : > { %v1117_v38 = vpop.f32.mrf.mxu3  ;;  %v1025_v1 = vadd.f32 %v961_v5, %v699_v3  ;;  %v701_v6 = vpop.f32.mrf.mxu1 }
 0x15b   : > { %v702_v27 = vadd.f32 %v701_v6, %v3844_v43 }
 0x15c   : > { %v1181_v46 = vadd.f32 %v1117_v38, %v1025_v1 }
 0x15d   : > { %2970 = vmatmul.msk.f32.gmra.mxu1 %vm384_vm2, %v3745_v59  ;;  %v1280_v28 = vpop.f32.mrf.mxu0 }
 0x15e   : > { %v4235_v56 = vadd.f32 %v1277_v41, %v1181_v46  ;;  %3004 = vmatmul.msk.f32.gmra.mxu2 %vm384_vm2, %v3541_v29 }
 0x15f   : > { %3038 = vmatmul.msk.f32.gmra.mxu3 %vm384_vm2, %v3629_v25 }
 0x160   : > { %3072 = vmatmul.msk.f32.gmra.mxu0 %vm384_vm2, %v3770_v44 }
 0x161   : > { %v964_v62 = vpop.f32.mrf.mxu2 }
 0x162   : > { %v1120_v45 = vpop.f32.mrf.mxu3  ;;  %v1026_v52 = vadd.f32 %v964_v62, %v702_v27  ;;  %v704_v14 = vpop.f32.mrf.mxu1 }
 0x163   : > { %v705_v29 = vadd.f32 %v704_v14, %v3864_v40  ;;  %v5229_v14 = vld [vmem:[#allocation36_spill] sm:$0xff] }
 0x164   : > { %v1182_v33 = vadd.f32 %v1120_v45, %v1026_v52  ;;  %v3249_v45 = vld [vmem:[%s3347_s30 + $0x68] sm:$0xff] }
 0x165   : > { %2971 = vmatmul.msk.f32.gmra.mxu1 %vm384_vm2, %v3758_v61  ;;  %v1283_v59 = vpop.f32.mrf.mxu0 }
 0x166   : > { %v4246_v9 = vadd.f32 %v1280_v28, %v1182_v33  ;;  %3005 = vmatmul.msk.f32.gmra.mxu2 %vm384_vm2, %v3638_v60 }
 0x167   : > { %3039 = vmatmul.msk.f32.gmra.mxu3 %vm384_vm2, %v3676_v12 }
 0x168   : > { %3073 = vmatmul.msk.f32.gmra.mxu0 %vm384_vm2, %v3783_v63 }
 0x169   : > { %v967_v25 = vpop.f32.mrf.mxu2 }
 0x16a   : > { %v1123_v43 = vpop.f32.mrf.mxu3  ;;  %v1027_v47 = vadd.f32 %v967_v25, %v705_v29  ;;  %v707_v36 = vpop.f32.mrf.mxu1 }
 0x16b   : > { %v708_v12 = vadd.f32 %v707_v36, %v3885_v16  ;;  %v5226_v16 = vld [vmem:[#allocation34_spill] sm:$0xff]  ;;  %v3250_v36 = vld [vmem:[%s3347_s30 + $0x78] sm:$0xff] }
 0x16c   : > { %v1183_v37 = vadd.f32 %v1123_v43, %v1027_v47 }
 0x16d   : > { %2972 = vmatmul.msk.f32.gmra.mxu1 %vm384_vm2, %v3770_v44  ;;  %v1286_v61 = vpop.f32.mrf.mxu0 }
 0x16e   : > { %v4257_v35 = vadd.f32 %v1283_v59, %v1183_v37  ;;  %3006 = vmatmul.msk.f32.gmra.mxu2 %vm384_vm2, %v3641_v32  ;;  %v3248_v32 = vld [vmem:[%s3347_s30 + $0x60] sm:$0xff]  ;;  %v5230_v37 = vld [vmem:[#allocation12_spill] sm:$0xff] }
 0x16f   : > { %3040 = vmatmul.msk.f32.gmra.mxu3 %vm384_vm2, %v3703_v24 }
 0x170   : > { %3074 = vmatmul.msk.f32.gmra.mxu0 %vm384_vm2, %v3795_v55 }
 0x171   : > { %v970_v60 = vpop.f32.mrf.mxu2 }
 0x172   : > { %v1126_v40 = vpop.f32.mrf.mxu3  ;;  %v1028_v41 = vadd.f32 %v970_v60, %v708_v12  ;;  %v710_v3 = vpop.f32.mrf.mxu1  ;;  %v5232_v60 = vld [vmem:[#allocation38_spill] sm:$0xff] }
 0x173   : > { %v711_v24 = vadd.f32 %v710_v3, %v3905_v42  ;;  %v5228_v42 = vld [vmem:[#allocation45_spill] sm:$0xff] }
 0x174   : > { %v1184_v5 = vadd.f32 %v1126_v40, %v1028_v41 }
 0x175   : > { %2973 = vmatmul.msk.f32.gmra.mxu1 %vm384_vm2, %v3783_v63  ;;  %v1289_v44 = vpop.f32.mrf.mxu0 }
 0x176   : > { %v4268_v38 = vadd.f32 %v1286_v61, %v1184_v5  ;;  %3007 = vmatmul.msk.f32.gmra.mxu2 %vm384_vm2, %v3248_v32  ;;  %v5231_v61 = vld [vmem:[#allocation48_spill] sm:$0xff] }
 0x177   : > { %3041 = vmatmul.msk.f32.gmra.mxu3 %vm384_vm2, %v3380_v19  ;;  %v5227_v19 = vld [vmem:[#allocation7_spill] sm:$0xff] }
 0x178   : > { %3075 = vmatmul.msk.f32.gmra.mxu0 %vm384_vm2, %v5226_v16 }
 0x179   : > { %v973_v1 = vpop.f32.mrf.mxu2 }
 0x17a   : > { %v1129_v6 = vpop.f32.mrf.mxu3  ;;  %v1029_v46 = vadd.f32 %v973_v1, %v711_v24  ;;  %v713_v28 = vpop.f32.mrf.mxu1  ;;  %v5233_v1 = vld [vmem:[#allocation15_spill] sm:$0xff] }
 0x17b   : > { %v714_v52 = vadd.f32 %v713_v28, %v5228_v42  ;;  %v5235_v28 = vld [vmem:[#allocation40_spill] sm:$0xff] }
 0x17c   : > { %v1185_v63 = vadd.f32 %v1129_v6, %v1029_v46  ;;  %v5234_v6 = vld [vmem:[#allocation51_spill] sm:$0xff] }
 0x17d   : > { %2974 = vmatmul.msk.f32.gmra.mxu1 %vm384_vm2, %v3795_v55  ;;  %v1292_v27 = vpop.f32.mrf.mxu0 }
 0x17e   : > { %v4279_v62 = vadd.f32 %v1289_v44, %v1185_v63  ;;  %3008 = vmatmul.msk.f32.gmra.mxu2 %vm384_vm2, %v3249_v45 }
 0x17f   : > { %3042 = vmatmul.msk.f32.gmra.mxu3 %vm384_vm2, %v5227_v19 }
 0x180   : > { %3076 = vmatmul.msk.f32.gmra.mxu0 %vm384_vm2, %v5229_v14 }
 0x181   : > { %v976_v33 = vpop.f32.mrf.mxu2 }
 0x182   : > { %v1132_v59 = vpop.f32.mrf.mxu3  ;;  %v1030_v29 = vadd.f32 %v976_v33, %v714_v52  ;;  %v716_v25 = vpop.f32.mrf.mxu1  ;;  %v3252_v33 = vld [vmem:[%s3347_s30 + $0x90] sm:$0xff] }
 0x183   : > { %v717_v12 = vadd.f32 %v716_v25, %v5231_v61 }
 0x184   : > { %v1186_v55 = vadd.f32 %v1132_v59, %v1030_v29  ;;  %v5236_v59 = vld [vmem:[#allocation19_spill] sm:$0xff] }
 0x185   : > { %2975 = vmatmul.msk.f32.gmra.mxu1 %vm384_vm2, %v5226_v16  ;;  %v1295_v43 = vpop.f32.mrf.mxu0  ;;  %v3251_v16 = vld [vmem:[%s3347_s30 + $0x80] sm:$0xff]  ;;  %v5237_v29 = vld [vmem:[#allocation35_spill] sm:$0xff] }
 0x186   : > { %v4290_v47 = vadd.f32 %v1292_v27, %v1186_v55  ;;  %3009 = vmatmul.msk.f32.gmra.mxu2 %vm384_vm2, %v3250_v36  ;;  %v5238_v55 = vld [vmem:[#allocation42_spill] sm:$0xff] }
 0x187   : > { %3043 = vmatmul.msk.f32.gmra.mxu3 %vm384_vm2, %v5230_v37 }
 0x188   : > { %3077 = vmatmul.msk.f32.gmra.mxu0 %vm384_vm2, %v5232_v60 }
 0x189   : > { %v979_v40 = vpop.f32.mrf.mxu2 }
 0x18a   : > { %v1135_v41 = vpop.f32.mrf.mxu3  ;;  %v1031_v3 = vadd.f32 %v979_v40, %v717_v12  ;;  %v719_v5 = vpop.f32.mrf.mxu1 }
 0x18b   : > { %v720_v46 = vadd.f32 %v719_v5, %v5234_v6  ;;  %v5240_v5 = vld [vmem:[#allocation37_spill] sm:$0xff] }
 0x18c   : > { %v1187_v44 = vadd.f32 %v1135_v41, %v1031_v3  ;;  %v3253_v41 = vld [vmem:[%s3347_s30 + $0x98] sm:$0xff]  ;;  %v5239_v3 = vld [vmem:[#allocation23_spill] sm:$0xff] }
 0x18d   : > { %2976 = vmatmul.msk.f32.gmra.mxu1 %vm384_vm2, %v5229_v14  ;;  %v1298_v32 = vpop.f32.mrf.mxu0 }
 0x18e   : > { %v4301_v24 = vadd.f32 %v1295_v43, %v1187_v44  ;;  %3010 = vmatmul.msk.f32.gmra.mxu2 %vm384_vm2, %v3251_v16 }
 0x18f   : > { %3044 = vmatmul.msk.f32.gmra.mxu3 %vm384_vm2, %v5233_v1 }
 0x190   : > { %3078 = vmatmul.msk.f32.gmra.mxu0 %vm384_vm2, %v5235_v28 }
 0x191   : > { %v982_v63 = vpop.f32.mrf.mxu2 }
 0x192   : > { %v1138_v27 = vpop.f32.mrf.mxu3  ;;  %v1032_v45 = vadd.f32 %v982_v63, %v720_v46  ;;  %v722_v19 = vpop.f32.mrf.mxu1 }
 0x193   : > { %v723_v25 = vadd.f32 %v722_v19, %v5237_v29  ;;  %v5242_v19 = vld [vmem:[#allocation28_spill] sm:$0xff] }
 0x194   : > { %v1188_v42 = vadd.f32 %v1138_v27, %v1032_v45  ;;  %v3254_v45 = vld [vmem:[%s3347_s30 + $0xa8] sm:$0xff] }
 0x195   : > { %2977 = vmatmul.msk.f32.gmra.mxu1 %vm384_vm2, %v5232_v60  ;;  %v1301_v52 = vpop.f32.mrf.mxu0 }
 0x196   : > { %v4312_v14 = vadd.f32 %v1298_v32, %v1188_v42  ;;  %3011 = vmatmul.msk.f32.gmra.mxu2 %vm384_vm2, %v3252_v33  ;;  %v5241_v32 = vld [vmem:[#allocation44_spill] sm:$0xff]  ;;  %v5243_v42 = vld [vmem:[#allocation39_spill] sm:$0xff] }
 0x197   : > { %3045 = vmatmul.msk.f32.gmra.mxu3 %vm384_vm2, %v5236_v59  ;;  %v5244_v33 = vld [vmem:[#allocation47_spill] sm:$0xff] }
 0x198   : > { %3079 = vmatmul.msk.f32.gmra.mxu0 %vm384_vm2, %v5238_v55 }
 0x199   : > { %v985_v43 = vpop.f32.mrf.mxu2 }
 0x19a   : > { %v1141_v36 = vpop.f32.mrf.mxu3  ;;  %v1033_v37 = vadd.f32 %v985_v43, %v723_v25  ;;  %v725_v61 = vpop.f32.mrf.mxu1 }
 0x19b   : > { %v726_v44 = vadd.f32 %v725_v61, %v5240_v5  ;;  %v3255_v61 = vld [vmem:[%s3347_s30 + $0xb0] sm:$0xff] }
 0x19c   : > { %v1189_v12 = vadd.f32 %v1141_v36, %v1033_v37 }
 0x19d   : > { %2978 = vmatmul.msk.f32.gmra.mxu1 %vm384_vm2, %v5235_v28  ;;  %v1304_v60 = vpop.f32.mrf.mxu0 }
 0x19e   : > { %v4323_v40 = vadd.f32 %v1301_v52, %v1189_v12  ;;  %3012 = vmatmul.msk.f32.gmra.mxu2 %vm384_vm2, %v3253_v41  ;;  %v5245_v12 = vld [vmem:[#allocation32_spill] sm:$0xff] }
 0x19f   : > { %3046 = vmatmul.msk.f32.gmra.mxu3 %vm384_vm2, %v5239_v3  ;;  %v5247_v3 = vld [vmem:[#allocation50_spill] sm:$0xff] }
 0x1a0   : > { %3080 = vmatmul.msk.f32.gmra.mxu0 %vm384_vm2, %v5241_v32 }
 0x1a1   : > { %v988_v16 = vpop.f32.mrf.mxu2 }
 0x1a2   : > { %v1144_v1 = vpop.f32.mrf.mxu3  ;;  %v1034_v6 = vadd.f32 %v988_v16, %v726_v44  ;;  %v728_v46 = vpop.f32.mrf.mxu1 }
 0x1a3   : > { %v729_v52 = vadd.f32 %v728_v46, %v5243_v42  ;;  %v5250_v42 = vld [vmem:[#allocation53_spill] sm:$0xff] }
 0x1a4   : > { %v1190_v28 = vadd.f32 %v1144_v1, %v1034_v6 }
 0x1a5   : > { %2979 = vmatmul.msk.f32.gmra.mxu1 %vm384_vm2, %v5238_v55  ;;  %v1307_v63 = vpop.f32.mrf.mxu0 }
 0x1a6   : > { %v4334_v27 = vadd.f32 %v1304_v60, %v1190_v28  ;;  %3013 = vmatmul.msk.f32.gmra.mxu2 %vm384_vm2, %v3254_v45  ;;  %v5246_v60 = vld [vmem:[#allocation41_spill] sm:$0xff]  ;;  %v3256_v28 = vld [vmem:[%s3347_s30 + $0xc0] sm:$0xff]  ;;  %v5249_v45 = vld [vmem:[#allocation43_spill] sm:$0xff] }
 0x1a7   : > { %3047 = vmatmul.msk.f32.gmra.mxu3 %vm384_vm2, %v5242_v19 }
 0x1a8   : > { %3081 = vmatmul.msk.f32.gmra.mxu0 %vm384_vm2, %v5244_v33 }
 0x1a9   : > { %v991_v59 = vpop.f32.mrf.mxu2 }
 0x1aa   : > { %v1147_v29 = vpop.f32.mrf.mxu3  ;;  %v1035_v25 = vadd.f32 %v991_v59, %v729_v52  ;;  %v731_v43 = vpop.f32.mrf.mxu1 }
 0x1ab   : > { %v732_v41 = vadd.f32 %v731_v43, %v5246_v60 }
 0x1ac   : > { %v1191_v55 = vadd.f32 %v1147_v29, %v1035_v25 }
 0x1ad   : > { %2980 = vmatmul.msk.f32.gmra.mxu1 %vm384_vm2, %v5241_v32  ;;  %v1310_v36 = vpop.f32.mrf.mxu0 }
 0x1ae   : > { %v4345_v37 = vadd.f32 %v1307_v63, %v1191_v55  ;;  %3014 = vmatmul.msk.f32.gmra.mxu2 %vm384_vm2, %v3255_v61  ;;  %v5248_v63 = vld [vmem:[#allocation4_spill] sm:$0xff] }
 0x1af   : > { %3048 = vmatmul.msk.f32.gmra.mxu3 %vm384_vm2, %v5245_v12  ;;  %v5251_v61 = vld [vmem:[#allocation8_spill] sm:$0xff]  ;;  %v5252_v12 = vld [vmem:[#allocation46_spill] sm:$0xff] }
 0x1b0   : > { %3082 = vmatmul.msk.f32.gmra.mxu0 %vm384_vm2, %v5247_v3 }
 0x1b1   : > { %v994_v5 = vpop.f32.mrf.mxu2 }
 0x1b2   : > { %v1150_v44 = vpop.f32.mrf.mxu3  ;;  %v1036_v16 = vadd.f32 %v994_v5, %v732_v41  ;;  %v734_v1 = vpop.f32.mrf.mxu1 }
 0x1b3   : > { %v735_v19 = vadd.f32 %v734_v1, %v5249_v45 }
 0x1b4   : > { %v1192_v32 = vadd.f32 %v1150_v44, %v1036_v16 }
 0x1b5   : > { %2981 = vmatmul.msk.f32.gmra.mxu1 %vm384_vm2, %v5244_v33  ;;  %v1313_v6 = vpop.f32.mrf.mxu0 }
 0x1b6   : > { %v4356_v46 = vadd.f32 %v1310_v36, %v1192_v32  ;;  %3015 = vmatmul.msk.f32.gmra.mxu2 %vm384_vm2, %v3256_v28  ;;  %v3257_v36 = vld [vmem:[%s3347_s30 + $0xc8] sm:$0xff]  ;;  %v5253_v28 = vld [vmem:[#allocation49_spill] sm:$0xff] }
 0x1b7   : > { %3049 = vmatmul.msk.f32.gmra.mxu3 %vm384_vm2, %v5248_v63 }
 0x1b8   : > { %3083 = vmatmul.msk.f32.gmra.mxu0 %vm384_vm2, %v5250_v42 }
 0x1b9   : > { %v997_v52 = vpop.f32.mrf.mxu2 }
 0x1ba   : > { %v1153_v59 = vpop.f32.mrf.mxu3  ;;  %v1037_v29 = vadd.f32 %v997_v52, %v735_v19  ;;  %v737_v25 = vpop.f32.mrf.mxu1 }
 0x1bb   : > { %v738_v60 = vadd.f32 %v737_v25, %v5252_v12 }
 0x1bc   : > { %v1193_v33 = vadd.f32 %v1153_v59, %v1037_v29 }
 0x1bd   : > { %2982 = vmatmul.msk.f32.gmra.mxu1 %vm384_vm2, %v5247_v3  ;;  %v1316_v43 = vpop.f32.mrf.mxu0 }
 0x1be   : > { %v4367_v55 = vadd.f32 %v1313_v6, %v1193_v33  ;;  %3016 = vmatmul.msk.f32.gmra.mxu2 %vm384_vm2, %v3257_v36  ;;  %v3258_v6 = vld [vmem:[%s3347_s30 + $0xd8] sm:$0xff]  ;;  %v3259_v33 = vld [vmem:[%s3347_s30 + $0xe0] sm:$0xff] }
 0x1bf   : > { %3050 = vmatmul.msk.f32.gmra.mxu3 %vm384_vm2, %v5251_v61 }
 0x1c0   : > { %3084 = vmatmul.msk.f32.gmra.mxu0 %vm384_vm2, %v3985_v7 }
 0x1c1   : > { %v1000_v41 = vpop.f32.mrf.mxu2 }
 0x1c2   : > { %v1156_v5 = vpop.f32.mrf.mxu3  ;;  %v1038_v44 = vadd.f32 %v1000_v41, %v738_v60  ;;  %v740_v16 = vpop.f32.mrf.mxu1 }
 0x1c3   : > { %v741_v63 = vadd.f32 %v740_v16, %v5253_v28  ;;  %v4412_v28 = vld [vmem:[%s5060_s2] ss:$0 sm:$0xff] }
 0x1c4   : > { %v1194_v3 = vadd.f32 %v1156_v5, %v1038_v44  ;;  %v3260_v44 = vld [vmem:[%s3347_s30 + $0xf0] sm:$0xff] }
 0x1c5   : > { %2983 = vmatmul.msk.f32.gmra.mxu1 %vm384_vm2, %v5250_v42  ;;  %v1319_v1 = vpop.f32.mrf.mxu0 }
 0x1c6   : > { %v4378_v32 = vadd.f32 %v1316_v43, %v1194_v3  ;;  %3017 = vmatmul.msk.f32.gmra.mxu2 %vm384_vm2, %v3258_v6 }
 0x1c7   : > { %3051 = vmatmul.msk.f32.gmra.mxu3 %vm384_vm2, %v3467_v54  ;;  %v5254_v54 = vld [vmem:[#allocation52_spill] sm:$0xff] }
 0x1c8   : > { %3085 = vmatmul.msk.f32.gmra.mxu0 %vm384_vm2, %v4001_v0 }
 0x1c9   : > { %v1003_v45 = vpop.f32.mrf.mxu2 }
 0x1ca   : > { %v1159_v19 = vpop.f32.mrf.mxu3  ;;  %v1039_v52 = vadd.f32 %v1003_v45, %v741_v63  ;;  %v743_v59 = vpop.f32.mrf.mxu1  ;;  %v3261_v45 = vld [vmem:[%s3347_s30 + $0xf8] sm:$0xff] }
 0x1cb   : > { %v744_v43 = vadd.f32 %v743_v59, %v5254_v54 }
 0x1cc   : > { %v1195_v42 = vadd.f32 %v1159_v19, %v1039_v52 }
 0x1cd   : > { %2984 = vmatmul.msk.f32.gmra.mxu1 %vm384_vm2, %v3985_v7  ;;  %v1322_v29 = vpop.f32.mrf.mxu0 }
 0x1ce   : > { %v4389_v25 = vadd.f32 %v1319_v1, %v1195_v42  ;;  %3018 = vmatmul.msk.f32.gmra.mxu2 %vm384_vm2, %v3259_v33 }
 0x1cf   : > { %3052 = vmatmul.msk.f32.gmra.mxu3 %vm384_vm2, %v3503_v2 }
 0x1d0   : > { %3086 = vmatmul.msk.f32.gmra.mxu0 %vm384_vm2, %v4016_v23 }
 0x1d1   : > { %v1006_v36 = vpop.f32.mrf.mxu2 }
 0x1d2   : > { %v1162_v61 = vpop.f32.mrf.mxu3  ;;  %v1040_v12 = vadd.f32 %v1006_v36, %v744_v43  ;;  %v1388_v60 = vpop.f32.mrf.mxu1 }
 0x1d3   : > { %v1484_v2 = vadd.f32 %v1388_v60, %v3989_v18  ;;  %v4419_v18 = vld [vmem:[%s5061_s3] ss:$0 sm:$0xff] }
 0x1d4   : > { %v1196_v7 = vadd.f32 %v1162_v61, %v1040_v12  ;;  %v3262_v61 = vld [vmem:[%s3347_s30 + $0x108] sm:$0xff] }
 0x1d5   : > { %2985 = vmatmul.msk.f32.gmra.mxu1 %vm384_vm2, %v4001_v0  ;;  %v1863_v41 = vpop.f32.mrf.mxu0 }
 0x1d6   : > { %v4400_v5 = vadd.f32 %v1322_v29, %v1196_v7  ;;  %3019 = vmatmul.msk.f32.gmra.mxu2 %vm384_vm2, %v3260_v44 }
 0x1d7   : > { %3053 = vmatmul.msk.f32.gmra.mxu3 %vm384_vm2, %v3558_v49 }
 0x1d8   : > { %3087 = vmatmul.msk.f32.gmra.mxu0 %vm384_vm2, %v4032_v26 }
 0x1d9   : > { %v1544_v16 = vpop.f32.mrf.mxu2 }
 0x1da   : > { %v1704_v3 = vpop.f32.mrf.mxu3  ;;  %v1640_v1 = vadd.f32 %v1544_v16, %v1484_v2  ;;  %v1391_v6 = vpop.f32.mrf.mxu1 }
 0x1db   : > { %v1485_v19 = vadd.f32 %v1391_v6, %v4005_v22 }
 0x1dc   : > { %v1800_v0 = vadd.f32 %v1704_v3, %v1640_v1 }
 0x1dd   : > { %2986 = vmatmul.msk.f32.gmra.mxu1 %vm384_vm2, %v4016_v23  ;;  %v1866_v63 = vpop.f32.mrf.mxu0 }
 0x1de   : > { %v1959_v49 = vadd.f32 %v1863_v41, %v1800_v0  ;;  %3020 = vmatmul.msk.f32.gmra.mxu2 %vm384_vm2, %v3261_v45  ;;  %v3263_v0 = vld [vmem:[%s3347_s30 + $0x110] sm:$0xff] }
 0x1df   : > { %3054 = vmatmul.msk.f32.gmra.mxu3 %vm384_vm2, %v3603_v58 }
 0x1e0   : > { %v1995_v52 = vmul.f32 %v4412_v28, %v1959_v49  ;;  %3088 = vmatmul.msk.f32.gmra.mxu0 %vm384_vm2, %v4047_v10  ;;  %v5255_v49 = vld [vmem:[#allocation54_spill] sm:$0xff] }
 0x1e1   : > { %v1547_v23 = vpop.f32.mrf.mxu2 }
 0x1e2   : > { %v1707_v59 = vpop.f32.mrf.mxu3  ;;  %v4430_v42 = vadd.f32 %v4419_v18, %v1995_v52  ;;  %v1641_v29 = vadd.f32 %v1547_v23, %v1485_v19  ;;  %v1394_v33 = vpop.f32.mrf.mxu1 }
 0x1e3   : > { %v1486_v12 = vadd.f32 %v1394_v33, %v4020_v48 }
 0x1e4   : > { %v2063_v54 = vsub.f32 0.0, %v4430_v42  ;;  %v1801_v43 = vadd.f32 %v1707_v59, %v1641_v29 }
 0x1e5   : > { %2987 = vmatmul.msk.f32.gmra.mxu1 %vm384_vm2, %v4032_v26  ;;  %v1869_v58 = vpop.f32.mrf.mxu0 }
 0x1e6   : > { %v2095_v22 = vmul.f32 1.442695, %v2063_v54  ;;  %v1960_v36 = vadd.f32 %v1866_v63, %v1801_v43  ;;  %3021 = vmatmul.msk.f32.gmra.mxu2 %vm384_vm2, %v3262_v61 }
 0x1e7   : > { %3055 = vmatmul.msk.f32.gmra.mxu3 %vm384_vm2, %v5192_v17 }
 0x1e8   : > { %3120 = vpow2.f32 %v2095_v22  ;;  %v1996_v60 = vmul.f32 %v4412_v28, %v1960_v36  ;;  %3089 = vmatmul.msk.f32.gmra.mxu0 %vm384_vm2, %v4063_v57  ;;  %v3264_v36 = vld [vmem:[%s3347_s30 + $0x120] sm:$0xff] }
 0x1e9   : > { %v1550_v7 = vpop.f32.mrf.mxu2 }
 0x1ea   : > { %v1710_v26 = vpop.f32.mrf.mxu3  ;;  %v4444_v41 = vadd.f32 %v4419_v18, %v1996_v60  ;;  %v1642_v44 = vadd.f32 %v1550_v7, %v1486_v12  ;;  %v1397_v2 = vpop.f32.mrf.mxu1  ;;  %v5256_v7 = vld [vmem:[#allocation21_spill] sm:$0xff] }
 0x1eb   : > { %v1487_v45 = vadd.f32 %v1397_v2, %v5255_v49 }
 0x1ec   : > { %v2064_v16 = vsub.f32 0.0, %v4444_v41  ;;  %v1802_v3 = vadd.f32 %v1710_v26, %v1642_v44 }
 0x1ed   : > { %2988 = vmatmul.msk.f32.gmra.mxu1 %vm384_vm2, %v4047_v10  ;;  %v1872_v17 = vpop.f32.mrf.mxu0 }
 0x1ee   : > { %v3121_v48 = vpop.eup %3120  ;;  %v2097_v1 = vmul.f32 1.442695, %v2064_v16  ;;  %v1961_v6 = vadd.f32 %v1869_v58, %v1802_v3  ;;  %3022 = vmatmul.msk.f32.gmra.mxu2 %vm384_vm2, %v3263_v0 }
 0x1ef   : > { %3056 = vmatmul.msk.f32.gmra.mxu3 %vm384_vm2, %v3695_v13  ;;  %v2159_v63 = vadd.f32 1.0, %v3121_v48 }
 0x1f0   : > { %3122 = vpow2.f32 %v2097_v1  ;;  %v1997_v19 = vmul.f32 %v4412_v28, %v1961_v6  ;;  %3090 = vmatmul.msk.f32.gmra.mxu0 %vm384_vm2, %v4078_v51 }
 0x1f1   : > { %3124 = vrcp.f32 %v2159_v63  ;;  %v1553_v10 = vpop.f32.mrf.mxu2  ;;  %v2200_v1 = vand.u32 2147483647, %v2159_v63  ;;  %v2202_v6 = vand.u32 2147483648, %v2159_v63  ;;  %vm2196_vm5 = vweird.f32 %v2159_v63 }
 0x1f2   : > { %v1713_v52 = vpop.f32.mrf.mxu3  ;;  %v4458_v23 = vadd.f32 %v4419_v18, %v1997_v19  ;;  %v1643_v59 = vadd.f32 %v1553_v10, %v1487_v45  ;;  %v1400_v29 = vpop.f32.mrf.mxu1 }
 0x1f3   : > { %v1488_v26 = vadd.f32 %v1400_v29, %v5256_v7  ;;  %vm2201_vm7 = vcmp.eq.f32.partialorder %v2200_v1, 8.507059e+37 }
 0x1f4   : > { %v2065_v13 = vsub.f32 0.0, %v4458_v23  ;;  %v1803_v33 = vadd.f32 %v1713_v52, %v1643_v59 }
 0x1f5   : > { %2989 = vmatmul.msk.f32.gmra.mxu1 %vm384_vm2, %v4063_v57  ;;  %v1875_v54 = vpop.f32.mrf.mxu0  ;;  %v5257_v57 = vld [vmem:[#allocation2_spill] sm:$0xff] }
 0x1f6   : > { %v3123_v43 = vpop.eup %3122  ;;  %v2099_v58 = vmul.f32 1.442695, %v2065_v13  ;;  %v1962_v22 = vadd.f32 %v1872_v17, %v1803_v33  ;;  %3023 = vmatmul.msk.f32.gmra.mxu2 %vm384_vm2, %v3264_v36  ;;  %v3265_v13 = vld [vmem:[%s3347_s30 + $0x128] sm:$0xff]  ;;  %v5258_v33 = vld [vmem:[#allocation9_spill] sm:$0xff] }
 0x1f7   : > { %3057 = vmatmul.msk.f32.gmra.mxu3 %vm384_vm2, %v5198_v34  ;;  %v3125_v61 = vpop.eup %3124  ;;  %v4467_v12 = vadd.f32 1.0, %v3123_v43 }
 0x1f8   : > { %v2192_v60 = vmul.f32 %v3125_v61, %v2159_v63  ;;  %3126 = vpow2.f32 %v2099_v58  ;;  %v1998_v44 = vmul.f32 %v4412_v28, %v1962_v22  ;;  %3091 = vmatmul.msk.f32.gmra.mxu0 %vm384_vm2, %v5257_v57  ;;  %vm2197_vm4 = vweird.f32 %v3125_v61 }
 0x1f9   : > { %3128 = vrcp.f32 %v4467_v12  ;;  %v1556_v2 = vpop.f32.mrf.mxu2  ;;  %vm2198_vm6 = vmor %vm2196_vm5, %vm2197_vm4  ;;  %v2203_v58 = vor.u32 1.1754944e-38, %v2202_v6  ;;  %v2215_v6 = vand.u32 2147483647, %v4467_v12  ;;  %vm2211_vm9 = vweird.f32 %v4467_v12 }
 0x1fa   : > { %v1716_v16 = vpop.f32.mrf.mxu3  ;;  %v2193_v3 = vsub.f32 1.0, %v2192_v60  ;;  %v4475_v34 = vadd.f32 %v4419_v18, %v1998_v44  ;;  %v1644_v17 = vadd.f32 %v1556_v2, %v1488_v26  ;;  %v1403_v48 = vpop.f32.mrf.mxu1 }
 0x1fb   : > { %vm2216_vm11 = vcmp.eq.f32.partialorder %v2215_v6, 8.507059e+37  ;;  %v3267_v6 = vld [vmem:[%s3347_s30 + $0x140] sm:$0xff] }
 0x1fc   : > { %v2194_v0 = vmul.f32 %v3125_v61, %v2193_v3  ;;  %v2066_v49 = vsub.f32 0.0, %v4475_v34  ;;  %v1804_v45 = vadd.f32 %v1716_v16, %v1644_v17  ;;  %v2217_v3 = vand.u32 2147483648, %v4467_v12 }
 0x1fd   : > { %2990 = vmatmul.msk.f32.gmra.mxu1 %vm384_vm2, %v4078_v51  ;;  %v1878_v19 = vpop.f32.mrf.mxu0 }
 0x1fe   : > { %v3127_v10 = vpop.eup %3126  ;;  %v2195_v52 = vadd.f32 %v3125_v61, %v2194_v0  ;;  %v2101_v59 = vmul.f32 1.442695, %v2066_v49  ;;  %v1963_v29 = vadd.f32 %v1875_v54, %v1804_v45  ;;  %3024 = vmatmul.msk.f32.gmra.mxu2 %vm384_vm2, %v3265_v13  ;;  %v5259_v54 = vld [vmem:[#allocation29_spill] sm:$0xff] }
 0x1ff   : > { %3058 = vmatmul.msk.f32.gmra.mxu3 %vm384_vm2, %v5258_v33  ;;  %v3129_v43 = vpop.eup %3128  ;;  %v4486_v22 = vadd.f32 1.0, %v3127_v10  ;;  %v1489_v60 = vadd.f32 %v1403_v48, %v5259_v54 }
 0x200   : > { %v2199_v51 = vsel %vm2198_vm6, %v3125_v61, %v2195_v52  ;;  %v2207_v36 = vmul.f32 %v3129_v43, %v4467_v12  ;;  %3130 = vpow2.f32 %v2101_v59  ;;  %3092 = vmatmul.msk.f32.gmra.mxu0 %vm384_vm2, %v4109_v39  ;;  %v1999_v2 = vmul.f32 %v4412_v28, %v1963_v29  ;;  %v3266_v52 = vld [vmem:[%s3347_s30 + $0x138] sm:$0xff] }
 0x201   : > { %v2204_v63 = vsel %vm2201_vm7, %v2203_v58, %v2199_v51  ;;  %3132 = vrcp.f32 %v4486_v22  ;;  %v1559_v7 = vpop.f32.mrf.mxu2  ;;  %vm2212_vm8 = vweird.f32 %v3129_v43  ;;  %v2218_v29 = vor.u32 1.1754944e-38, %v2217_v3  ;;  %v5260_v51 = vld [vmem:[#allocation3_spill] sm:$0xff] }
 0x202   : > { %v1719_v61 = vpop.f32.mrf.mxu3  ;;  %v2671_v26 = vmul.f32 %v2204_v63, %v4430_v42  ;;  %v2208_v44 = vsub.f32 1.0, %v2207_v36  ;;  %v1406_v16 = vpop.f32.mrf.mxu1  ;;  %v1645_v17 = vadd.f32 %v1559_v7, %v1489_v60  ;;  %v4505_v48 = vadd.f32 %v4419_v18, %v1999_v2  ;;  %vm2213_vm10 = vmor %vm2211_vm9, %vm2212_vm8  ;;  %v5261_v63 = vld [vmem:[#allocation25_spill] sm:$0xff] }
 0x203   : > { %v2230_v3 = vand.u32 2147483647, %v4486_v22  ;;  %vm2226_vm13 = vweird.f32 %v4486_v22 }
 0x204   : > { %2703 = vst.msk [vmem:[%s4494_s21] sm:$0xff] %vm384_vm2, %v2671_v26  ;;  %v2209_v1 = vmul.f32 %v3129_v43, %v2208_v44  ;;  %v1805_v0 = vadd.f32 %v1719_v61, %v1645_v17  ;;  %v2067_v10 = vsub.f32 0.0, %v4505_v48 }
 0x205   : > { %2991 = vmatmul.msk.f32.gmra.mxu1 %vm384_vm2, %v5257_v57  ;;  %v1881_v42 = vpop.f32.mrf.mxu0  ;;  %vm2231_vm15 = vcmp.eq.f32.partialorder %v2230_v3, 8.507059e+37 }
 0x206   : > { %v3131_v49 = vpop.eup %3130  ;;  %v2210_v45 = vadd.f32 %v3129_v43, %v2209_v1  ;;  %3025 = vmatmul.msk.f32.gmra.mxu2 %vm384_vm2, %v3266_v52  ;;  %v1964_v33 = vadd.f32 %v1878_v19, %v1805_v0  ;;  %v2103_v12 = vmul.f32 1.442695, %v2067_v10  ;;  %v5262_v0 = vld [vmem:[#allocation16_spill] sm:$0xff] }
 0x207   : > { %3059 = vmatmul.msk.f32.gmra.mxu3 %vm384_vm2, %v5206_v21  ;;  %v3133_v59 = vpop.eup %3132  ;;  %v4515_v13 = vadd.f32 1.0, %v3131_v49  ;;  %v1490_v21 = vadd.f32 %v1406_v16, %v5261_v63 }
 0x208   : > { %v2214_v57 = vsel %vm2213_vm10, %v3129_v43, %v2210_v45  ;;  %v2222_v58 = vmul.f32 %v3133_v59, %v4486_v22  ;;  %3093 = vmatmul.msk.f32.gmra.mxu0 %vm384_vm2, %v5260_v51  ;;  %v2232_v43 = vand.u32 2147483648, %v4486_v22  ;;  %v2000_v26 = vmul.f32 %v4412_v28, %v1964_v33 }
 0x209   : > { %v2219_v36 = vsel %vm2216_vm11, %v2218_v29, %v2214_v57  ;;  %3134 = vrcp.f32 %v4515_v13  ;;  %v1562_v54 = vpop.f32.mrf.mxu2  ;;  %vm2227_vm12 = vweird.f32 %v3133_v59  ;;  %v5263_v57 = vld [vmem:[#allocation31_spill] sm:$0xff]  ;;  %vm2241_vm4 = vweird.f32 %v4515_v13 }
 0x20a   : > { %v1722_v60 = vpop.f32.mrf.mxu3  ;;  %v2672_v7 = vmul.f32 %v2219_v36, %v4444_v41  ;;  %v2223_v61 = vsub.f32 1.0, %v2222_v58  ;;  %3136 = vpow2.f32 %v2103_v12  ;;  %v1409_v19 = vpop.f32.mrf.mxu1  ;;  %v1646_v44 = vadd.f32 %v1562_v54, %v1490_v21  ;;  %vm2228_vm14 = vmor %vm2226_vm13, %vm2227_vm12 }
 0x20b   : > { %v4529_v16 = vadd.f32 %v4419_v18, %v2000_v26  ;;  %v2233_v45 = vor.u32 1.1754944e-38, %v2232_v43  ;;  %v1491_v22 = vadd.f32 %v1409_v19, %v5263_v57  ;;  %v2247_v19 = vand.u32 2147483648, %v4515_v13 }
 0x20c   : > { %2704 = vst.msk [vmem:[%s4494_s21 + $0x8] sm:$0xff] %vm384_vm2, %v2672_v7  ;;  %v2224_v2 = vmul.f32 %v3133_v59, %v2223_v61  ;;  %v1806_v17 = vadd.f32 %v1722_v60, %v1646_v44  ;;  %v2245_v61 = vand.u32 2147483647, %v4515_v13 }
 0x20d   : > { %2992 = vmatmul.msk.f32.gmra.mxu1 %vm384_vm2, %v4109_v39  ;;  %v1884_v41 = vpop.f32.mrf.mxu0  ;;  %v2068_v10 = vsub.f32 0.0, %v4529_v16 }
 0x20e   : > { %v2225_v1 = vadd.f32 %v3133_v59, %v2224_v2  ;;  %3026 = vmatmul.msk.f32.gmra.mxu2 %vm384_vm2, %v3267_v6  ;;  %v1965_v52 = vadd.f32 %v1881_v42, %v1806_v17  ;;  %v3268_v17 = vld [vmem:[%s3347_s30 + $0x150] sm:$0xff]  ;;  %vm2246_vm6 = vcmp.eq.f32.partialorder %v2245_v61, 8.507059e+37  ;;  %v3269_v61 = vld [vmem:[%s3347_s30 + $0x158] sm:$0xff] }
 0x20f   : > { %3060 = vmatmul.msk.f32.gmra.mxu3 %vm384_vm2, %v5262_v0  ;;  %v3135_v49 = vpop.eup %3134  ;;  %v2105_v36 = vmul.f32 1.442695, %v2068_v10  ;;  %v5264_v10 = vld [vmem:[#allocation13_spill] sm:$0xff] }
 0x210   : > { %v3137_v29 = vpop.eup %3136  ;;  %v2229_v33 = vsel %vm2228_vm14, %v3133_v59, %v2225_v1  ;;  %v2237_v39 = vmul.f32 %v3135_v49, %v4515_v13  ;;  %3094 = vmatmul.msk.f32.gmra.mxu0 %vm384_vm2, %v4140_v20  ;;  %v2001_v63 = vmul.f32 %v4412_v28, %v1965_v52  ;;  %vm2242_vm0 = vweird.f32 %v3135_v49  ;;  %v5265_v52 = vld [vmem:[#allocation5_spill] sm:$0xff] }
 0x211   : > { %v2234_v58 = vsel %vm2231_vm15, %v2233_v45, %v2229_v33  ;;  %v4543_v12 = vadd.f32 1.0, %v3137_v29  ;;  %v1565_v21 = vpop.f32.mrf.mxu2  ;;  %vm2243_vm5 = vmor %vm2241_vm4, %vm2242_vm0  ;;  %v2248_v1 = vor.u32 1.1754944e-38, %v2247_v19  ;;  %v5266_v19 = vld [vmem:[#allocation24_spill] sm:$0xff] }
 0x212   : > { %v1725_v54 = vpop.f32.mrf.mxu3  ;;  %v2673_v42 = vmul.f32 %v2234_v58, %v4458_v23  ;;  %v2238_v59 = vsub.f32 1.0, %v2237_v39  ;;  %v1647_v60 = vadd.f32 %v1565_v21, %v1491_v22  ;;  %v1412_v7 = vpop.f32.mrf.mxu1  ;;  %v4553_v26 = vadd.f32 %v4419_v18, %v2001_v63 }
 0x213   : > { %3138 = vrcp.f32 %v4543_v12  ;;  %v1492_v29 = vadd.f32 %v1412_v7, %v5265_v52  ;;  %vm2256_vm8 = vweird.f32 %v4543_v12 }
 0x214   : > { %2705 = vst.msk [vmem:[%s4494_s21 + $0x10] sm:$0xff] %vm384_vm2, %v2673_v42  ;;  %v2239_v43 = vmul.f32 %v3135_v49, %v2238_v59  ;;  %3140 = vpow2.f32 %v2105_v36  ;;  %v1807_v44 = vadd.f32 %v1725_v54, %v1647_v60  ;;  %v2069_v3 = vsub.f32 0.0, %v4553_v26 }
 0x215   : > { %2993 = vmatmul.msk.f32.gmra.mxu1 %vm384_vm2, %v5260_v51  ;;  %v1887_v23 = vpop.f32.mrf.mxu0  ;;  %v2260_v54 = vand.u32 2147483647, %v4543_v12  ;;  %v2262_v42 = vand.u32 2147483648, %v4543_v12 }
 0x216   : > { %v2240_v2 = vadd.f32 %v3135_v49, %v2239_v43  ;;  %3027 = vmatmul.msk.f32.gmra.mxu2 %vm384_vm2, %v3268_v17  ;;  %v1966_v6 = vadd.f32 %v1884_v41, %v1807_v44  ;;  %v2107_v45 = vmul.f32 1.442695, %v2069_v3  ;;  %v5267_v3 = vld [vmem:[#allocation10_spill] sm:$0xff] }
 0x217   : > { %3061 = vmatmul.msk.f32.gmra.mxu3 %vm384_vm2, %v5214_v50  ;;  %vm2261_vm10 = vcmp.eq.f32.partialorder %v2260_v54, 8.507059e+37 }
 0x218   : > { %v2244_v0 = vsel %vm2243_vm5, %v3135_v49, %v2240_v2  ;;  %3095 = vmatmul.msk.f32.gmra.mxu0 %vm384_vm2, %v5264_v10  ;;  %v2002_v33 = vmul.f32 %v4412_v28, %v1966_v6  ;;  %3142 = vpow2.f32 %v2107_v45  ;;  %v2263_v6 = vor.u32 1.1754944e-38, %v2262_v42 }
 0x219   : > { %v3139_v51 = vpop.eup %3138  ;;  %v2249_v13 = vsel %vm2246_vm6, %v2248_v1, %v2244_v0  ;;  %v1568_v39 = vpop.f32.mrf.mxu2  ;;  %v5268_v1 = vld [vmem:[#allocation17_spill] sm:$0xff] }
 0x21a   : > { %v1728_v57 = vpop.f32.mrf.mxu3  ;;  %v3141_v22 = vpop.eup %3140  ;;  %v2674_v50 = vmul.f32 %v2249_v13, %v4475_v34  ;;  %v2252_v41 = vmul.f32 %v3139_v51, %v4543_v12  ;;  %v4572_v36 = vadd.f32 %v4419_v18, %v2002_v33  ;;  %v1648_v63 = vadd.f32 %v1568_v39, %v1492_v29 }
 0x21b   : > { %v1415_v49 = vpop.f32.mrf.mxu1  ;;  %v4569_v58 = vadd.f32 1.0, %v3141_v22  ;;  %vm2257_vm7 = vweird.f32 %v3139_v51 }
 0x21c   : > { %2706 = vst.msk [vmem:[%s4494_s21 + $0x18] sm:$0xff] %vm384_vm2, %v2674_v50  ;;  %v2253_v21 = vsub.f32 1.0, %v2252_v41  ;;  %v2070_v60 = vsub.f32 0.0, %v4572_v36  ;;  %v1808_v7 = vadd.f32 %v1728_v57, %v1648_v63  ;;  %v1493_v17 = vadd.f32 %v1415_v49, %v5267_v3  ;;  %vm2258_vm9 = vmor %vm2256_vm8, %vm2257_vm7  ;;  %v3270_v63 = vld [vmem:[%s3347_s30 + $0x168] sm:$0xff] }
 0x21d   : > { %3144 = vrcp.f32 %v4569_v58  ;;  %2994 = vmatmul.msk.f32.gmra.mxu1 %vm384_vm2, %v4140_v20  ;;  %v1890_v34 = vpop.f32.mrf.mxu0  ;;  %v2277_v54 = vand.u32 2147483648, %v4569_v58  ;;  %vm2271_vm12 = vweird.f32 %v4569_v58 }
 0x21e   : > { %v2254_v59 = vmul.f32 %v3139_v51, %v2253_v21  ;;  %3028 = vmatmul.msk.f32.gmra.mxu2 %vm384_vm2, %v3269_v61  ;;  %v3143_v43 = vpop.eup %3142  ;;  %v2109_v2 = vmul.f32 1.442695, %v2070_v60  ;;  %v1967_v20 = vadd.f32 %v1887_v23, %v1808_v7  ;;  %v5269_v21 = vld [vmem:[#allocation30_spill] sm:$0xff] }
 0x21f   : > { %3062 = vmatmul.msk.f32.gmra.mxu3 %vm384_vm2, %v5266_v19  ;;  %v4590_v0 = vadd.f32 1.0, %v3143_v43 }
 0x220   : > { %v2255_v44 = vadd.f32 %v3139_v51, %v2254_v59  ;;  %3096 = vmatmul.msk.f32.gmra.mxu0 %vm384_vm2, %v5268_v1  ;;  %3146 = vpow2.f32 %v2109_v2  ;;  %v2003_v12 = vmul.f32 %v4412_v28, %v1967_v20 }
 0x221   : > { %v1571_v45 = vpop.f32.mrf.mxu2  ;;  %3148 = vrcp.f32 %v4590_v0  ;;  %vm2286_vm0 = vweird.f32 %v4590_v0 }
 0x222   : > { %v1731_v13 = vpop.f32.mrf.mxu3  ;;  %v2259_v52 = vsel %vm2258_vm9, %v3139_v51, %v2255_v44  ;;  %v1649_v29 = vadd.f32 %v1571_v45, %v1493_v17  ;;  %v4597_v50 = vadd.f32 %v4419_v18, %v2003_v12 }
 0x223   : > { %v1418_v33 = vpop.f32.mrf.mxu1  ;;  %v3145_v39 = vpop.eup %3144  ;;  %v2264_v23 = vsel %vm2261_vm10, %v2263_v6, %v2259_v52 }
 0x224   : > { %v2675_v57 = vmul.f32 %v2264_v23, %v4505_v48  ;;  %v2267_v22 = vmul.f32 %v3145_v39, %v4569_v58  ;;  %v1809_v41 = vadd.f32 %v1731_v13, %v1649_v29  ;;  %v2275_v48 = vand.u32 2147483647, %v4569_v58 }
 0x225   : > { %2995 = vmatmul.msk.f32.gmra.mxu1 %vm384_vm2, %v5264_v10  ;;  %v1893_v51 = vpop.f32.mrf.mxu0  ;;  %v2071_v42 = vsub.f32 0.0, %v4597_v50  ;;  %vm2272_vm11 = vweird.f32 %v3145_v39  ;;  %v5270_v10 = vld [vmem:[#allocation6_spill] sm:$0xff]  ;;  %v2278_v13 = vor.u32 1.1754944e-38, %v2277_v54  ;;  %v2290_v58 = vand.u32 2147483647, %v4590_v0 }
 0x226   : > { %2707 = vst.msk [vmem:[%s4494_s21 + $0x20] sm:$0xff] %vm384_vm2, %v2675_v57  ;;  %v2268_v49 = vsub.f32 1.0, %v2267_v22  ;;  %3029 = vmatmul.msk.f32.gmra.mxu2 %vm384_vm2, %v3270_v63  ;;  %v1968_v59 = vadd.f32 %v1890_v34, %v1809_v41  ;;  %v3147_v60 = vpop.eup %3146  ;;  %v1494_v61 = vadd.f32 %v1418_v33, %v5270_v10  ;;  %vm2273_vm13 = vmor %vm2271_vm12, %vm2272_vm11  ;;  %vm2276_vm14 = vcmp.eq.f32.partialorder %v2275_v48, 8.507059e+37  ;;  %v3271_v63 = vld [vmem:[%s3347_s30 + $0x170] sm:$0xff]  ;;  %v3272_v48 = vld [vmem:[%s3347_s30 + $0x180] sm:$0xff] }
 0x227   : > { %3063 = vmatmul.msk.f32.gmra.mxu3 %vm384_vm2, %v5269_v21  ;;  %v3149_v19 = vpop.eup %3148  ;;  %v4613_v43 = vadd.f32 1.0, %v3147_v60  ;;  %v2111_v44 = vmul.f32 1.442695, %v2071_v42  ;;  %v2292_v23 = vand.u32 2147483648, %v4590_v0  ;;  %v5271_v21 = vld [vmem:[#allocation33_spill] sm:$0xff]  ;;  %v1357_v54 = vrot.slane %v3272_v48, 2 }
 0x228   : > { %v2269_v7 = vmul.f32 %v3145_v39, %v2268_v49  ;;  %3097 = vmatmul.msk.f32.gmra.mxu0 %vm384_vm2, %v4189_v4  ;;  %v2004_v2 = vmul.f32 %v4412_v28, %v1968_v59  ;;  %v2282_v34 = vmul.f32 %v3149_v19, %v4590_v0  ;;  %vm2287_vm15 = vweird.f32 %v3149_v19  ;;  %v4634_v42 = vld [vmem:[%s3347_s30 + $0x188] sm:$0xff] }
 0x229   : > { %v1574_v3 = vpop.f32.mrf.mxu2  ;;  %3150 = vrcp.f32 %v4613_v43  ;;  %v1358_v59 = vrot.slane %v4634_v42, 2  ;;  %vm2288_vm4 = vmor %vm2286_vm0, %vm2287_vm15  ;;  %v2293_v10 = vor.u32 1.1754944e-38, %v2292_v23  ;;  %vm2291_vm5 = vcmp.eq.f32.partialorder %v2290_v58, 8.507059e+37 }
 0x22a   : > { %v1734_v17 = vpop.f32.mrf.mxu3  ;;  %v2270_v20 = vadd.f32 %v3145_v39, %v2269_v7  ;;  %v1650_v6 = vadd.f32 %v1574_v3, %v1494_v61  ;;  %v2283_v12 = vsub.f32 1.0, %v2282_v34  ;;  %3152 = vpow2.f32 %v2111_v44  ;;  %v5272_v61 = vld [vmem:[#allocation11_spill] sm:$0xff] }
 0x22b   : > { %v1421_v45 = vpop.f32.mrf.mxu1  ;;  %v4620_v29 = vadd.f32 %v4419_v18, %v2004_v2  ;;  %v2307_v58 = vand.u32 2147483648, %v4613_v43  ;;  %vm2301_vm7 = vweird.f32 %v4613_v43 }
 0x22c   : > { %v2274_v52 = vsel %vm2273_vm13, %v3145_v39, %v2270_v20  ;;  %v2284_v22 = vmul.f32 %v3149_v19, %v2283_v12  ;;  %v1810_v49 = vadd.f32 %v1734_v17, %v1650_v6  ;;  %v1495_v44 = vadd.f32 %v1421_v45, %v5272_v61 }
 0x22d   : > { %v2279_v33 = vsel %vm2276_vm14, %v2278_v13, %v2274_v52  ;;  %2996 = vmatmul.msk.f32.gmra.mxu1 %vm384_vm2, %v5268_v1  ;;  %v1896_v57 = vpop.f32.mrf.mxu0  ;;  %v2072_v41 = vsub.f32 0.0, %v4620_v29  ;;  %v4652_v45 = vsel %vm746_vm3, %v1357_v54, %v1358_v59 }
 0x22e   : > { %v2676_v39 = vmul.f32 %v2279_v33, %v4529_v16  ;;  %3030 = vmatmul.msk.f32.gmra.mxu2 %vm384_vm2, %v3271_v63  ;;  %v2285_v1 = vadd.f32 %v3149_v19, %v2284_v22  ;;  %v1969_v60 = vadd.f32 %v1893_v51, %v1810_v49  ;;  %v5273_v63 = vld [vmem:[#allocation14_spill] sm:$0xff] }
 0x22f   : > { %3064 = vmatmul.msk.f32.gmra.mxu3 %vm384_vm2, %v5271_v21  ;;  %v2113_v16 = vmul.f32 1.442695, %v2072_v41  ;;  %v3151_v7 = vpop.eup %3150 }
 0x230   : > { %2708 = vst.msk [vmem:[%s4494_s21 + $0x28] sm:$0xff] %vm384_vm2, %v2676_v39  ;;  %3098 = vmatmul.msk.f32.gmra.mxu0 %vm384_vm2, %v4207_v30  ;;  %v3153_v17 = vpop.eup %3152  ;;  %v2289_v20 = vsel %vm2288_vm4, %v3149_v19, %v2285_v1  ;;  %v2297_v34 = vmul.f32 %v3151_v7, %v4613_v43  ;;  %v2005_v13 = vmul.f32 %v4412_v28, %v1969_v60  ;;  %vm2302_vm6 = vweird.f32 %v3151_v7  ;;  %v4680_v60 = vld [vmem:[%s3347_s30 + $0x198] sm:$0xff] }
 0x231   : > { %v1577_v2 = vpop.f32.mrf.mxu2  ;;  %3154 = vpow2.f32 %v2113_v16  ;;  %v2294_v51 = vsel %vm2291_vm5, %v2293_v10, %v2289_v20  ;;  %v4645_v6 = vadd.f32 1.0, %v3153_v17  ;;  %v2305_v19 = vand.u32 2147483647, %v4613_v43  ;;  %vm4673_vm8 = vmor %vm2301_vm7, %vm2302_vm6  ;;  %v3274_v10 = vld [vmem:[%s3347_s30 + $0x190] sm:$0x3]  ;;  %v4687_v20 = vld [vmem:[%s3347_s30 + $0x1a0] sm:$0xff] }
 0x232   : > { %v1737_v3 = vpop.f32.mrf.mxu3  ;;  %v1651_v52 = vadd.f32 %v1577_v2, %v1495_v44  ;;  %v2677_v12 = vmul.f32 %v2294_v51, %v4553_v26  ;;  %v2298_v33 = vsub.f32 1.0, %v2297_v34  ;;  %v4662_v39 = vadd.f32 %v4419_v18, %v2005_v13 }
 0x233   : > { %v1424_v0 = vpop.f32.mrf.mxu1  ;;  %3156 = vrcp.f32 %v4645_v6  ;;  %vm2306_vm9 = vcmp.eq.f32.partialorder %v2305_v19, 8.507059e+37  ;;  %v1360_v61 = vrot.slane %v3274_v10, 2  ;;  %vm2316_vm11 = vweird.f32 %v4645_v6 }
 0x234   : > { %2709 = vst.msk [vmem:[%s4494_s21 + $0x30] sm:$0xff] %vm384_vm2, %v2677_v12  ;;  %v2299_v26 = vmul.f32 %v3151_v7, %v2298_v33  ;;  %v1811_v22 = vadd.f32 %v1737_v3, %v1651_v52  ;;  %v1496_v21 = vadd.f32 %v1424_v0, %v5273_v63  ;;  %v1673_v52 = vrot.slane %v4680_v60, 1 }
 0x235   : > { %2997 = vmatmul.msk.f32.gmra.mxu1 %vm384_vm2, %v4189_v4  ;;  %v1899_v23 = vpop.f32.mrf.mxu0  ;;  %v2073_v4 = vsub.f32 0.0, %v4662_v39  ;;  %v1674_v33 = vrot.slane %v4687_v20, 1  ;;  %v4702_v19 = vsel %vm746_vm3, %v1358_v59, %v1360_v61  ;;  %v1833_v59 = vrot.slane %v4687_v20, 2 }
 0x236   : > { %3031 = vmatmul.msk.f32.gmra.mxu2 %vm384_vm2, %v3272_v48  ;;  %v2300_v49 = vadd.f32 %v3151_v7, %v2299_v26  ;;  %v1970_v54 = vadd.f32 %v1896_v57, %v1811_v22 }
 0x237   : > { %3065 = vmatmul.msk.f32.gmra.mxu3 %vm384_vm2, %v4194_v53  ;;  %v3155_v41 = vpop.eup %3154  ;;  %v2308_v53 = vor.u32 1.1754944e-38, %v2307_v58  ;;  %v2115_v44 = vmul.f32 1.442695, %v2073_v4  ;;  %v2320_v58 = vand.u32 2147483647, %v4645_v6  ;;  %v1675_v48 = vsel %vm301_vm1, %v1673_v52, %v1674_v33 }
 0x238   : > { %3099 = vmatmul.msk.f32.gmra.mxu0 %vm384_vm2, %v4652_v45  ;;  %v4677_v1 = vadd.f32 1.0, %v3155_v41  ;;  %v2304_v57 = vsel %vm4673_vm8, %v3151_v7, %v2300_v49  ;;  %v2006_v2 = vmul.f32 %v4412_v28, %v1970_v54  ;;  %v1832_v41 = vrot.slane %v4680_v60, 2 }
 0x239   : > { %v1580_v43 = vpop.f32.mrf.mxu2  ;;  %v3157_v34 = vpop.eup %3156  ;;  %v2309_v0 = vsel %vm2306_vm9, %v2308_v53, %v2304_v57  ;;  %vm2321_vm12 = vcmp.eq.f32.partialorder %v2320_v58, 8.507059e+37 }
 0x23a   : > { %v1740_v16 = vpop.f32.mrf.mxu3  ;;  %v1652_v3 = vadd.f32 %v1580_v43, %v1496_v21  ;;  %3158 = vrcp.f32 %v4677_v1  ;;  %v2678_v51 = vmul.f32 %v2309_v0, %v4572_v36  ;;  %v2312_v13 = vmul.f32 %v3157_v34, %v4645_v6 }
 0x23b   : > { %v1427_v17 = vpop.f32.mrf.mxu1  ;;  %3160 = vpow2.f32 %v2115_v44  ;;  %v4694_v7 = vadd.f32 %v4419_v18, %v2006_v2  ;;  %vm2317_vm10 = vweird.f32 %v3157_v34  ;;  %v1834_v61 = vsel %vm746_vm3, %v1832_v41, %v1833_v59 }
 0x23c   : > { %2710 = vst.msk [vmem:[%s4494_s21 + $0x38] sm:$0xff] %vm384_vm2, %v2678_v51  ;;  %v2313_v36 = vsub.f32 1.0, %v2312_v13  ;;  %v1812_v26 = vadd.f32 %v1740_v16, %v1652_v3  ;;  %vm2318_vm13 = vmor %vm2316_vm11, %vm2317_vm10  ;;  %v2335_v51 = vand.u32 2147483647, %v4677_v1  ;;  %v2337_v13 = vand.u32 2147483648, %v4677_v1 }
 0x23d   : > { %2998 = vmatmul.msk.f32.gmra.mxu1 %vm384_vm2, %v4207_v30  ;;  %v1902_v12 = vpop.f32.mrf.mxu0  ;;  %v2322_v30 = vand.u32 2147483648, %v4645_v6  ;;  %v2074_v22 = vsub.f32 0.0, %v4694_v7  ;;  %vm2331_vm15 = vweird.f32 %v4677_v1 }
 0x23e   : > { %3032 = vmatmul.msk.f32.gmra.mxu2 %vm384_vm2, %v4634_v42  ;;  %v2314_v49 = vmul.f32 %v3157_v34, %v2313_v36  ;;  %v1971_v4 = vadd.f32 %v1899_v23, %v1812_v26  ;;  %vm2336_vm4 = vcmp.eq.f32.partialorder %v2335_v51, 8.507059e+37 }
 0x23f   : > { %3066 = vmatmul.msk.f32.gmra.mxu3 %vm384_vm2, %v4212_v15  ;;  %v2117_v42 = vmul.f32 1.442695, %v2074_v22  ;;  %v1497_v15 = vadd.f32 %v1427_v17, %v4196_v11  ;;  %v2323_v6 = vor.u32 1.1754944e-38, %v2322_v30  ;;  %v251_v17 = vld [vmem:[%s3347_s30 + $0x1a8] sm:$0x3] }
 0x240   : > { %3100 = vmatmul.msk.f32.gmra.mxu0 %vm384_vm2, %v4702_v19  ;;  %v3159_v63 = vpop.eup %3158  ;;  %v2315_v53 = vadd.f32 %v3157_v34, %v2314_v49  ;;  %v2007_v43 = vmul.f32 %v4412_v28, %v1971_v4  ;;  %v1676_v22 = vrot.slane %v251_v17, 1  ;;  %v2338_v49 = vor.u32 1.1754944e-38, %v2337_v13 }
 0x241   : > { %v1583_v21 = vpop.f32.mrf.mxu2  ;;  %v2327_v23 = vmul.f32 %v3159_v63, %v4677_v1  ;;  %v3161_v10 = vpop.eup %3160  ;;  %3162 = vpow2.f32 %v2117_v42  ;;  %vm2332_vm14 = vweird.f32 %v3159_v63 }
 0x242   : > { %v1743_v54 = vpop.f32.mrf.mxu3  ;;  %v1653_v11 = vadd.f32 %v1583_v21, %v1497_v15  ;;  %v2319_v57 = vsel %vm2318_vm13, %v3157_v34, %v2315_v53  ;;  %v4728_v2 = vadd.f32 1.0, %v3161_v10  ;;  %v4731_v3 = vadd.f32 %v4419_v18, %v2007_v43  ;;  %vm2333_vm0 = vmor %vm2331_vm15, %vm2332_vm14 }
 0x243   : > { %v1430_v16 = vpop.f32.mrf.mxu1  ;;  %v2328_v44 = vsub.f32 1.0, %v2327_v23  ;;  %v2324_v0 = vsel %vm2321_vm12, %v2323_v6, %v2319_v57  ;;  %v1835_v21 = vrot.slane %v251_v17, 2  ;;  %v1677_v23 = vsel %vm301_vm1, %v1674_v33, %v1676_v22 }
 0x244   : > { %v1813_v52 = vadd.f32 %v1743_v54, %v1653_v11  ;;  %v2679_v34 = vmul.f32 %v2324_v0, %v4597_v50  ;;  %3164 = vrcp.f32 %v4728_v2  ;;  %v2075_v26 = vsub.f32 0.0, %v4731_v3 }
 0x245   : > { %2999 = vmatmul.msk.f32.gmra.mxu1 %vm384_vm2, %v4652_v45  ;;  %v1905_v36 = vpop.f32.mrf.mxu0  ;;  %v2329_v58 = vmul.f32 %v3159_v63, %v2328_v44  ;;  %v1498_v50 = vadd.f32 %v1430_v16, %v4214_v8  ;;  %v1836_v11 = vsel %vm746_vm3, %v1833_v59, %v1835_v21  ;;  %v2350_v57 = vand.u32 2147483647, %v4728_v2 }
 0x246   : > { %3033 = vmatmul.msk.f32.gmra.mxu2 %vm384_vm2, %v4680_v60  ;;  %v1972_v30 = vadd.f32 %v1902_v12, %v1813_v52  ;;  %2711 = vst.msk [vmem:[%s4494_s21 + $0x40] sm:$0xff] %vm384_vm2, %v2679_v34  ;;  %v2119_v4 = vmul.f32 1.442695, %v2075_v26  ;;  %v2352_v44 = vand.u32 2147483648, %v4728_v2  ;;  %vm2346_vm3 = vweird.f32 %v4728_v2 }
 0x247   : > { %3067 = vmatmul.msk.f32.gmra.mxu3 %vm384_vm2, %v1675_v48  ;;  %v2330_v41 = vadd.f32 %v3159_v63, %v2329_v58  ;;  %v3163_v45 = vpop.eup %3162  ;;  %vm2351_vm6 = vcmp.eq.f32.partialorder %v2350_v57, 8.507059e+37 }
 0x248   : > { %3101 = vmatmul.msk.f32.gmra.mxu0 %vm384_vm2, %v1834_v61  ;;  %v2008_v60 = vmul.f32 %v4412_v28, %v1972_v30  ;;  %v4750_v54 = vadd.f32 1.0, %v3163_v45  ;;  %3166 = vpow2.f32 %v2119_v4 }
 0x249   : > { %v1586_v42 = vpop.f32.mrf.mxu2  ;;  %v2334_v12 = vsel %vm2333_vm0, %v3159_v63, %v2330_v41 }
 0x24a   : > { %v1746_v15 = vpop.f32.mrf.mxu3  ;;  %v1654_v48 = vadd.f32 %v1586_v42, %v1498_v50  ;;  %v2339_v53 = vsel %vm2336_vm4, %v2338_v49, %v2334_v12  ;;  %v4753_v8 = vadd.f32 %v4419_v18, %v2008_v60  ;;  %v3165_v43 = vpop.eup %3164  ;;  %3168 = vrcp.f32 %v4750_v54 }
 0x24b   : > { %v1433_v1 = vpop.f32.mrf.mxu1  ;;  %v2680_v16 = vmul.f32 %v2339_v53, %v4620_v29  ;;  %v2342_v63 = vmul.f32 %v3165_v43, %v4728_v2  ;;  %vm2347_vm1 = vweird.f32 %v3165_v43  ;;  %v2365_v60 = vand.u32 2147483647, %v4750_v54 }
 0x24c   : > { %v2076_v10 = vsub.f32 0.0, %v4753_v8  ;;  %v1814_v33 = vadd.f32 %v1746_v15, %v1654_v48  ;;  %vm2348_vm5 = vmor %vm2346_vm3, %vm2347_vm1  ;;  %v2367_v2 = vand.u32 2147483648, %v4750_v54  ;;  %vm2361_vm8 = vweird.f32 %v4750_v54 }
 0x24d   : > { %3000 = vmatmul.msk.f32.gmra.mxu1 %vm384_vm2, %v4702_v19  ;;  %v1908_v6 = vpop.f32.mrf.mxu0  ;;  %2712 = vst.msk [vmem:[%s4494_s21 + $0x48] sm:$0xff] %vm384_vm2, %v2680_v16  ;;  %v2343_v29 = vsub.f32 1.0, %v2342_v63  ;;  %v1499_v19 = vadd.f32 %v1433_v1, %v4224_v31  ;;  %vm2366_vm10 = vcmp.eq.f32.partialorder %v2365_v60, 8.507059e+37 }
 0x24e   : > { %3034 = vmatmul.msk.f32.gmra.mxu2 %vm384_vm2, %v4687_v20  ;;  %v2121_v61 = vmul.f32 1.442695, %v2076_v10  ;;  %v1973_v17 = vadd.f32 %v1905_v36, %v1814_v33  ;;  %v3167_v59 = vpop.eup %3166  ;;  %v2353_v36 = vor.u32 1.1754944e-38, %v2352_v44 }
 0x24f   : > { %3068 = vmatmul.msk.f32.gmra.mxu3 %vm384_vm2, %v1677_v23  ;;  %v2344_v0 = vmul.f32 %v3165_v43, %v2343_v29  ;;  %v4776_v52 = vadd.f32 1.0, %v3167_v59 }
 0x250   : > { %3102 = vmatmul.msk.f32.gmra.mxu0 %vm384_vm2, %v1836_v11  ;;  %3170 = vpow2.f32 %v2121_v61  ;;  %v3169_v20 = vpop.eup %3168  ;;  %v2009_v34 = vmul.f32 %v4412_v28, %v1973_v17 }
 0x251   : > { %v1589_v51 = vpop.f32.mrf.mxu2  ;;  %v2345_v30 = vadd.f32 %v3165_v43, %v2344_v0  ;;  %v2357_v31 = vmul.f32 %v3169_v20, %v4750_v54  ;;  %3172 = vrcp.f32 %v4776_v52  ;;  %vm2362_vm7 = vweird.f32 %v3169_v20 }
 0x252   : > { %v1749_v13 = vpop.f32.mrf.mxu3  ;;  %v1655_v58 = vadd.f32 %v1589_v51, %v1499_v19  ;;  %v4783_v50 = vadd.f32 %v4419_v18, %v2009_v34  ;;  %vm2363_vm9 = vmor %vm2361_vm8, %vm2362_vm7  ;;  %v2382_v17 = vand.u32 2147483648, %v4776_v52  ;;  %v2380_v0 = vand.u32 2147483647, %v4776_v52 }
 0x253   : > { %v1436_v26 = vpop.f32.mrf.mxu1  ;;  %v2349_v22 = vsel %vm2348_vm5, %v3165_v43, %v2345_v30  ;;  %v2358_v41 = vsub.f32 1.0, %v2357_v31  ;;  %vm2376_vm12 = vweird.f32 %v4776_v52 }
 0x254   : > { %v1815_v45 = vadd.f32 %v1749_v13, %v1655_v58  ;;  %v2354_v4 = vsel %vm2351_vm6, %v2353_v36, %v2349_v22  ;;  %v2077_v12 = vsub.f32 0.0, %v4783_v50  ;;  %v1500_v54 = vadd.f32 %v1436_v26, %v4235_v56 }
 0x255   : > { %v1911_v49 = vpop.f32.mrf.mxu0  ;;  %v2681_v15 = vmul.f32 %v2354_v4, %v4662_v39  ;;  %v2359_v21 = vmul.f32 %v3169_v20, %v2358_v41  ;;  %v2368_v39 = vor.u32 1.1754944e-38, %v2367_v2  ;;  %v2383_v22 = vor.u32 1.1754944e-38, %v2382_v17 }
 0x256   : > { %v3171_v42 = vpop.eup %3170  ;;  %v1974_v48 = vadd.f32 %v1908_v6, %v1815_v45  ;;  %v2123_v53 = vmul.f32 1.442695, %v2077_v12  ;;  %vm2381_vm14 = vcmp.eq.f32.partialorder %v2380_v0, 8.507059e+37 }
 0x257   : > { %v4789_v1 = vadd.f32 1.0, %v3171_v42  ;;  %2713 = vst.msk [vmem:[%s4494_s21 + $0x50] sm:$0xff] %vm384_vm2, %v2681_v15  ;;  %v2360_v18 = vadd.f32 %v3169_v20, %v2359_v21  ;;  %v3173_v63 = vpop.eup %3172 }
 0x258   : > { %v2010_v23 = vmul.f32 %v4412_v28, %v1974_v48  ;;  %v2372_v11 = vmul.f32 %v3173_v63, %v4776_v52  ;;  %v4802_v28 = vld [vmem:[%s5061_s3] ss:$0 sm:$0xff]  ;;  %vm2377_vm11 = vweird.f32 %v3173_v63 }
 0x259   : > { %v1592_v43 = vpop.f32.mrf.mxu2  ;;  %3174 = vrcp.f32 %v4789_v1  ;;  %v2364_v6 = vsel %vm2363_vm9, %v3169_v20, %v2360_v18  ;;  %vm2378_vm13 = vmor %vm2376_vm12, %vm2377_vm11  ;;  %v4821_v52 = vld [vmem:[%s5060_s2] ss:$0 sm:$0xff]  ;;  %v2395_v42 = vand.u32 2147483647, %v4789_v1  ;;  %v2397_v15 = vand.u32 2147483648, %v4789_v1 }
 0x25a   : > { %v1752_v16 = vpop.f32.mrf.mxu3  ;;  %3176 = vpow2.f32 %v2123_v53  ;;  %v2369_v33 = vsel %vm2366_vm10, %v2368_v39, %v2364_v6  ;;  %v4805_v29 = vadd.f32 %v4802_v28, %v2010_v23  ;;  %v2373_v57 = vsub.f32 1.0, %v2372_v11 }
 0x25b   : > { %v1439_v10 = vpop.f32.mrf.mxu1  ;;  %v2682_v61 = vmul.f32 %v2369_v33, %v4694_v7  ;;  %v1656_v44 = vadd.f32 %v1592_v43, %v1500_v54  ;;  %vm2391_vm0 = vweird.f32 %v4789_v1  ;;  %vm2396_vm1 = vcmp.eq.f32.partialorder %v2395_v42, 8.507059e+37 }
 0x25c   : > { %v2078_v59 = vsub.f32 0.0, %v4805_v29  ;;  %v2374_v56 = vmul.f32 %v3173_v63, %v2373_v57  ;;  %v1501_v34 = vadd.f32 %v1439_v10, %v4246_v9 }
 0x25d   : > { %v1914_v19 = vpop.f32.mrf.mxu0  ;;  %2714 = vst.msk [vmem:[%s4494_s21 + $0x58] sm:$0xff] %vm384_vm2, %v2682_v61  ;;  %v1816_v51 = vadd.f32 %v1752_v16, %v1656_v44 }
 0x25e   : > { %v2125_v20 = vmul.f32 1.442695, %v2078_v59  ;;  %v2375_v7 = vadd.f32 %v3173_v63, %v2374_v56 }
 0x25f   : > { %v3175_v13 = vpop.eup %3174  ;;  %v1975_v30 = vadd.f32 %v1911_v49, %v1816_v51 }
 0x260   : > { %v3177_v58 = vpop.eup %3176  ;;  %v2387_v26 = vmul.f32 %v3175_v13, %v4789_v1  ;;  %3178 = vpow2.f32 %v2125_v20  ;;  %v2379_v60 = vsel %vm2378_vm13, %v3173_v63, %v2375_v7  ;;  %vm2392_vm15 = vweird.f32 %v3175_v13 }
 0x261   : > { %v1595_v31 = vpop.f32.mrf.mxu2  ;;  %v4816_v41 = vadd.f32 1.0, %v3177_v58  ;;  %v2011_v49 = vmul.f32 %v4821_v52, %v1975_v30  ;;  %v2384_v2 = vsel %vm2381_vm14, %v2383_v22, %v2379_v60  ;;  %vm2393_vm4 = vmor %vm2391_vm0, %vm2392_vm15  ;;  %v2398_v63 = vor.u32 1.1754944e-38, %v2397_v15 }
 0x262   : > { %v1755_v36 = vpop.f32.mrf.mxu3  ;;  %v1657_v45 = vadd.f32 %v1595_v31, %v1501_v34  ;;  %v2388_v9 = vsub.f32 1.0, %v2387_v26  ;;  %v2683_v21 = vmul.f32 %v2384_v2, %v4731_v3 }
 0x263   : > { %v1442_v4 = vpop.f32.mrf.mxu1  ;;  %3180 = vrcp.f32 %v4816_v41  ;;  %v4829_v48 = vadd.f32 %v4802_v28, %v2011_v49  ;;  %v2412_v20 = vand.u32 2147483648, %v4816_v41  ;;  %vm2406_vm5 = vweird.f32 %v4816_v41 }
 0x264   : > { %v2389_v12 = vmul.f32 %v3175_v13, %v2388_v9  ;;  %v1817_v53 = vadd.f32 %v1755_v36, %v1657_v45  ;;  %2715 = vst.msk [vmem:[%s4494_s21 + $0x60] sm:$0xff] %vm384_vm2, %v2683_v21  ;;  %v1502_v39 = vadd.f32 %v1442_v4, %v4257_v35 }
 0x265   : > { %v1917_v18 = vpop.f32.mrf.mxu0  ;;  %v2079_v43 = vsub.f32 0.0, %v4829_v48  ;;  %v2413_v60 = vor.u32 1.1754944e-38, %v2412_v20 }
 0x266   : > { %v2390_v23 = vadd.f32 %v3175_v13, %v2389_v12  ;;  %v3179_v16 = vpop.eup %3178  ;;  %v1976_v3 = vadd.f32 %v1914_v19, %v1817_v53 }
 0x267   : > { %v4836_v6 = vadd.f32 1.0, %v3179_v16  ;;  %v2127_v11 = vmul.f32 1.442695, %v2079_v43 }
 0x268   : > { %v2394_v10 = vsel %vm2393_vm4, %v3175_v13, %v2390_v23  ;;  %v2012_v1 = vmul.f32 %v4821_v52, %v1976_v3  ;;  %v2410_v13 = vand.u32 2147483647, %v4816_v41 }
 0x269   : > { %v1598_v54 = vpop.f32.mrf.mxu2  ;;  %v3181_v61 = vpop.eup %3180  ;;  %v2399_v57 = vsel %vm2396_vm1, %v2398_v63, %v2394_v10  ;;  %3182 = vrcp.f32 %v4836_v6  ;;  %v2425_v53 = vand.u32 2147483647, %v4836_v6  ;;  %v2427_v23 = vand.u32 2147483648, %v4836_v6 }
 0x26a   : > { %v1758_v33 = vpop.f32.mrf.mxu3  ;;  %v1658_v44 = vadd.f32 %v1598_v54, %v1502_v39  ;;  %v2684_v59 = vmul.f32 %v2399_v57, %v4753_v8  ;;  %v2402_v56 = vmul.f32 %v3181_v61, %v4816_v41  ;;  %3184 = vpow2.f32 %v2127_v11 }
 0x26b   : > { %v1445_v17 = vpop.f32.mrf.mxu1  ;;  %v4845_v19 = vadd.f32 %v4802_v28, %v2012_v1  ;;  %vm2407_vm3 = vweird.f32 %v3181_v61  ;;  %vm2411_vm7 = vcmp.eq.f32.partialorder %v2410_v13, 8.507059e+37  ;;  %vm2421_vm9 = vweird.f32 %v4836_v6 }
 0x26c   : > { %2716 = vst.msk [vmem:[%s4494_s21 + $0x68] sm:$0xff] %vm384_vm2, %v2684_v59  ;;  %v2403_v35 = vsub.f32 1.0, %v2402_v56  ;;  %v1818_v0 = vadd.f32 %v1758_v33, %v1658_v44  ;;  %v1503_v7 = vadd.f32 %v1445_v17, %v4268_v38  ;;  %vm2408_vm6 = vmor %vm2406_vm5, %vm2407_vm3  ;;  %vm2426_vm11 = vcmp.eq.f32.partialorder %v2425_v53, 8.507059e+37 }
 0x26d   : > { %v1920_v51 = vpop.f32.mrf.mxu0  ;;  %v2080_v8 = vsub.f32 0.0, %v4845_v19  ;;  %v2428_v54 = vor.u32 1.1754944e-38, %v2427_v23 }
 0x26e   : > { %v2404_v34 = vmul.f32 %v3181_v61, %v2403_v35  ;;  %v1977_v58 = vadd.f32 %v1917_v18, %v1818_v0 }
 0x26f   : > { %v3183_v26 = vpop.eup %3182  ;;  %v2129_v31 = vmul.f32 1.442695, %v2080_v8 }
 0x270   : > { %v2405_v30 = vadd.f32 %v3181_v61, %v2404_v34  ;;  %v2013_v36 = vmul.f32 %v4821_v52, %v1977_v58  ;;  %v3185_v4 = vpop.eup %3184  ;;  %v2417_v9 = vmul.f32 %v3183_v26, %v4836_v6  ;;  %vm2422_vm8 = vweird.f32 %v3183_v26 }
 0x271   : > { %v1601_v22 = vpop.f32.mrf.mxu2  ;;  %v4854_v38 = vadd.f32 1.0, %v3185_v4  ;;  %3186 = vpow2.f32 %v2129_v31  ;;  %vm2423_vm10 = vmor %vm2421_vm9, %vm2422_vm8 }
 0x272   : > { %v1761_v45 = vpop.f32.mrf.mxu3  ;;  %v1659_v49 = vadd.f32 %v1601_v22, %v1503_v7  ;;  %v2409_v42 = vsel %vm2408_vm6, %v3181_v61, %v2405_v30  ;;  %v4857_v41 = vadd.f32 %v4802_v28, %v2013_v36  ;;  %v2418_v21 = vsub.f32 1.0, %v2417_v9 }
 0x273   : > { %v1448_v2 = vpop.f32.mrf.mxu1  ;;  %v2414_v15 = vsel %vm2411_vm7, %v2413_v60, %v2409_v42  ;;  %3188 = vrcp.f32 %v4854_v38  ;;  %v2440_v8 = vand.u32 2147483647, %v4854_v38  ;;  %v2442_v58 = vand.u32 2147483648, %v4854_v38 }
 0x274   : > { %v1819_v12 = vadd.f32 %v1761_v45, %v1659_v49  ;;  %v2685_v18 = vmul.f32 %v2414_v15, %v4783_v50  ;;  %v2419_v16 = vmul.f32 %v3183_v26, %v2418_v21  ;;  %v2081_v63 = vsub.f32 0.0, %v4857_v41 }
 0x275   : > { %v1923_v43 = vpop.f32.mrf.mxu0  ;;  %v1504_v33 = vadd.f32 %v1448_v2, %v4279_v62  ;;  %vm2436_vm13 = vweird.f32 %v4854_v38  ;;  %v2443_v42 = vor.u32 1.1754944e-38, %v2442_v58  ;;  %vm2441_vm15 = vcmp.eq.f32.partialorder %v2440_v8, 8.507059e+37 }
 0x276   : > { %v1978_v39 = vadd.f32 %v1920_v51, %v1819_v12  ;;  %2717 = vst.msk [vmem:[%s4494_s21 + $0x70] sm:$0xff] %vm384_vm2, %v2685_v18  ;;  %v2420_v3 = vadd.f32 %v3183_v26, %v2419_v16  ;;  %v2131_v10 = vmul.f32 1.442695, %v2081_v63 }
 0x277   : > { %v3187_v11 = vpop.eup %3186 }
 0x278   : > { %v2014_v50 = vmul.f32 %v4821_v52, %v1978_v39  ;;  %v2424_v1 = vsel %vm2423_vm10, %v3183_v26, %v2420_v3  ;;  %v4869_v44 = vadd.f32 1.0, %v3187_v11  ;;  %3190 = vpow2.f32 %v2131_v10 }
 0x279   : > { %v1604_v61 = vpop.f32.mrf.mxu2  ;;  %v3189_v59 = vpop.eup %3188  ;;  %v2429_v56 = vsel %vm2426_vm11, %v2428_v54, %v2424_v1 }
 0x27a   : > { %v1764_v57 = vpop.f32.mrf.mxu3  ;;  %v4872_v17 = vadd.f32 %v4802_v28, %v2014_v50  ;;  %v1660_v35 = vadd.f32 %v1604_v61, %v1504_v33  ;;  %v2686_v0 = vmul.f32 %v2429_v56, %v4805_v29  ;;  %v2432_v51 = vmul.f32 %v3189_v59, %v4854_v38 }
 0x27b   : > { %v1451_v6 = vpop.f32.mrf.mxu1  ;;  %3192 = vrcp.f32 %v4869_v44  ;;  %vm2437_vm12 = vweird.f32 %v3189_v59  ;;  %v2455_v3 = vand.u32 2147483647, %v4869_v44  ;;  %vm2451_vm4 = vweird.f32 %v4869_v44 }
 0x27c   : > { %v2082_v62 = vsub.f32 0.0, %v4872_v17  ;;  %2718 = vst.msk [vmem:[%s4494_s21 + $0x78] sm:$0xff] %vm384_vm2, %v2686_v0  ;;  %v2433_v20 = vsub.f32 1.0, %v2432_v51  ;;  %v1820_v34 = vadd.f32 %v1764_v57, %v1660_v35  ;;  %v1505_v29 = vadd.f32 %v1451_v6, %v4290_v47  ;;  %vm2438_vm14 = vmor %vm2436_vm13, %vm2437_vm12 }
 0x27d   : > { %v1926_v13 = vpop.f32.mrf.mxu0  ;;  %vm2456_vm3 = vcmp.eq.f32.partialorder %v2455_v3, 8.507059e+37 }
 0x27e   : > { %v2133_v7 = vmul.f32 1.442695, %v2082_v62  ;;  %v3191_v26 = vpop.eup %3190  ;;  %v2434_v30 = vmul.f32 %v3189_v59, %v2433_v20  ;;  %v1979_v31 = vadd.f32 %v1923_v43, %v1820_v34  ;;  %v2457_v43 = vand.u32 2147483648, %v4869_v44 }
 0x27f   : > { %v4883_v36 = vadd.f32 1.0, %v3191_v26 }
 0x280   : > { %3194 = vpow2.f32 %v2133_v7  ;;  %v2435_v60 = vadd.f32 %v3189_v59, %v2434_v30  ;;  %v2015_v9 = vmul.f32 %v4821_v52, %v1979_v31  ;;  %v2458_v1 = vor.u32 1.1754944e-38, %v2457_v43 }
 0x281   : > { %v1607_v22 = vpop.f32.mrf.mxu2  ;;  %v3193_v4 = vpop.eup %3192  ;;  %3196 = vrcp.f32 %v4883_v36  ;;  %v2470_v20 = vand.u32 2147483647, %v4883_v36  ;;  %v2472_v34 = vand.u32 2147483648, %v4883_v36  ;;  %vm2466_vm6 = vweird.f32 %v4883_v36 }
 0x282   : > { %v1767_v45 = vpop.f32.mrf.mxu3  ;;  %v1661_v49 = vadd.f32 %v1607_v22, %v1505_v29  ;;  %v2447_v15 = vmul.f32 %v3193_v4, %v4869_v44  ;;  %v2439_v47 = vsel %vm2438_vm14, %v3189_v59, %v2435_v60  ;;  %v4890_v21 = vadd.f32 %v4802_v28, %v2015_v9 }
 0x283   : > { %v1454_v2 = vpop.f32.mrf.mxu1  ;;  %v2444_v12 = vsel %vm2441_vm15, %v2443_v42, %v2439_v47  ;;  %vm2452_vm0 = vweird.f32 %v3193_v4  ;;  %vm2471_vm8 = vcmp.eq.f32.partialorder %v2470_v20, 8.507059e+37 }
 0x284   : > { %v2448_v18 = vsub.f32 1.0, %v2447_v15  ;;  %v1821_v53 = vadd.f32 %v1767_v45, %v1661_v49  ;;  %v2687_v23 = vmul.f32 %v2444_v12, %v4829_v48  ;;  %v2083_v16 = vsub.f32 0.0, %v4890_v21  ;;  %vm2453_vm1 = vmor %vm2451_vm4, %vm2452_vm0 }
 0x285   : > { %v1929_v38 = vpop.f32.mrf.mxu0  ;;  %v1506_v59 = vadd.f32 %v1454_v2, %v4301_v24 }
 0x286   : > { %v3195_v63 = vpop.eup %3194  ;;  %v2449_v39 = vmul.f32 %v3193_v4, %v2448_v18  ;;  %v1980_v10 = vadd.f32 %v1926_v13, %v1821_v53  ;;  %2719 = vst.msk [vmem:[%s4494_s21 + $0x80] sm:$0xff] %vm384_vm2, %v2687_v23  ;;  %v2135_v11 = vmul.f32 1.442695, %v2083_v16 }
 0x287   : > { %v4898_v50 = vadd.f32 1.0, %v3195_v63  ;;  %v3197_v54 = vpop.eup %3196 }
 0x288   : > { %v2450_v33 = vadd.f32 %v3193_v4, %v2449_v39  ;;  %v2016_v48 = vmul.f32 %v4821_v52, %v1980_v10  ;;  %v2462_v6 = vmul.f32 %v3197_v54, %v4883_v36  ;;  %vm2467_vm5 = vweird.f32 %v3197_v54 }
 0x289   : > { %v1610_v61 = vpop.f32.mrf.mxu2  ;;  %3198 = vrcp.f32 %v4898_v50  ;;  %vm2468_vm7 = vmor %vm2466_vm6, %vm2467_vm5  ;;  %v2485_v53 = vand.u32 2147483647, %v4898_v50  ;;  %vm2481_vm10 = vweird.f32 %v4898_v50 }
 0x28a   : > { %v1770_v57 = vpop.f32.mrf.mxu3  ;;  %v2454_v35 = vsel %vm2453_vm1, %v3193_v4, %v2450_v33  ;;  %3200 = vpow2.f32 %v2135_v11  ;;  %v2463_v51 = vsub.f32 1.0, %v2462_v6  ;;  %v4906_v44 = vadd.f32 %v4802_v28, %v2016_v48 }
 0x28b   : > { %v1457_v56 = vpop.f32.mrf.mxu1  ;;  %v2459_v0 = vsel %vm2456_vm3, %v2458_v1, %v2454_v35  ;;  %v1662_v62 = vadd.f32 %v1610_v61, %v1506_v59  ;;  %vm2486_vm12 = vcmp.eq.f32.partialorder %v2485_v53, 8.507059e+37 }
 0x28c   : > { %v2688_v13 = vmul.f32 %v2459_v0, %v4845_v19  ;;  %v2464_v58 = vmul.f32 %v3197_v54, %v2463_v51  ;;  %v2084_v24 = vsub.f32 0.0, %v4906_v44  ;;  %v2473_v19 = vor.u32 1.1754944e-38, %v2472_v34 }
 0x28d   : > { %v1932_v8 = vpop.f32.mrf.mxu0  ;;  %v1822_v7 = vadd.f32 %v1770_v57, %v1662_v62  ;;  %v1507_v4 = vadd.f32 %v1457_v56, %v4312_v14 }
 0x28e   : > { %2720 = vst.msk [vmem:[%s4494_s21 + $0x88] sm:$0xff] %vm384_vm2, %v2688_v13  ;;  %v2465_v30 = vadd.f32 %v3197_v54, %v2464_v58  ;;  %v2137_v29 = vmul.f32 1.442695, %v2084_v24 }
 0x28f   : > { %v3199_v26 = vpop.eup %3198  ;;  %v1981_v31 = vadd.f32 %v1929_v38, %v1822_v7  ;;  %v2487_v38 = vand.u32 2147483648, %v4898_v50 }
 0x290   : > { %v3201_v22 = vpop.eup %3200  ;;  %v2477_v45 = vmul.f32 %v3199_v26, %v4898_v50  ;;  %v2469_v49 = vsel %vm2468_vm7, %v3197_v54, %v2465_v30  ;;  %3202 = vpow2.f32 %v2137_v29  ;;  %vm2482_vm9 = vweird.f32 %v3199_v26 }
 0x291   : > { %v1613_v60 = vpop.f32.mrf.mxu2  ;;  %v2179_v2 = vadd.f32 1.0, %v3201_v22  ;;  %v2017_v42 = vmul.f32 %v4821_v52, %v1981_v31  ;;  %v2474_v36 = vsel %vm2471_vm8, %v2473_v19, %v2469_v49  ;;  %vm2483_vm11 = vmor %vm2481_vm10, %vm2482_vm9  ;;  %v2488_v10 = vor.u32 1.1754944e-38, %v2487_v38 }
 0x292   : > { %v1773_v9 = vpop.f32.mrf.mxu3  ;;  %v2478_v47 = vsub.f32 1.0, %v2477_v45  ;;  %v1663_v12 = vadd.f32 %v1613_v60, %v1507_v4  ;;  %v2689_v18 = vmul.f32 %v2474_v36, %v4857_v41 }
 0x293   : > { %v1460_v15 = vpop.f32.mrf.mxu1  ;;  %3204 = vrcp.f32 %v2179_v2  ;;  %v4922_v23 = vadd.f32 %v4802_v28, %v2017_v42  ;;  %v2500_v20 = vand.u32 2147483647, %v2179_v2  ;;  %v2502_v34 = vand.u32 2147483648, %v2179_v2 }
 0x294   : > { %v2479_v14 = vmul.f32 %v3199_v26, %v2478_v47  ;;  %v1823_v43 = vadd.f32 %v1773_v9, %v1663_v12  ;;  %2721 = vst.msk [vmem:[%s4494_s21 + $0x90] sm:$0xff] %vm384_vm2, %v2689_v18  ;;  %v1508_v11 = vadd.f32 %v1460_v15, %v4323_v40  ;;  %vm2496_vm14 = vweird.f32 %v2179_v2 }
 0x295   : > { %v1935_v16 = vpop.f32.mrf.mxu0  ;;  %v2085_v39 = vsub.f32 0.0, %v4922_v23  ;;  %vm2501_vm0 = vcmp.eq.f32.partialorder %v2500_v20, 8.507059e+37  ;;  %v2503_v45 = vor.u32 1.1754944e-38, %v2502_v34 }
 0x296   : > { %v2480_v63 = vadd.f32 %v3199_v26, %v2479_v14  ;;  %v1982_v41 = vadd.f32 %v1932_v8, %v1823_v43  ;;  %v3203_v3 = vpop.eup %3202 }
 0x297   : > { %v4929_v33 = vadd.f32 1.0, %v3203_v3  ;;  %v2139_v48 = vmul.f32 1.442695, %v2085_v39 }
 0x298   : > { %v2484_v54 = vsel %vm2483_vm11, %v3199_v26, %v2480_v63  ;;  %v2018_v61 = vmul.f32 %v4821_v52, %v1982_v41 }
 0x299   : > { %v1616_v57 = vpop.f32.mrf.mxu2  ;;  %v3205_v6 = vpop.eup %3204  ;;  %v2489_v50 = vsel %vm2486_vm12, %v2488_v10, %v2484_v54  ;;  %3206 = vrcp.f32 %v4929_v33  ;;  %v2515_v12 = vand.u32 2147483647, %v4929_v33  ;;  %v2517_v18 = vand.u32 2147483648, %v4929_v33 }
 0x29a   : > { %v1776_v1 = vpop.f32.mrf.mxu3  ;;  %v1664_v59 = vadd.f32 %v1616_v57, %v1508_v11  ;;  %v2690_v35 = vmul.f32 %v2489_v50, %v4872_v17  ;;  %v2492_v0 = vmul.f32 %v3205_v6, %v2179_v2  ;;  %3208 = vpow2.f32 %v2139_v48 }
 0x29b   : > { %v1463_v56 = vpop.f32.mrf.mxu1  ;;  %v4937_v51 = vadd.f32 %v4802_v28, %v2018_v61  ;;  %vm2497_vm13 = vweird.f32 %v3205_v6  ;;  %vm2511_vm1 = vweird.f32 %v4929_v33  ;;  %vm2516_vm5 = vcmp.eq.f32.partialorder %v2515_v12, 8.507059e+37 }
 0x29c   : > { %2722 = vst.msk [vmem:[%s4494_s21 + $0x98] sm:$0xff] %vm384_vm2, %v2690_v35  ;;  %v2493_v40 = vsub.f32 1.0, %v2492_v0  ;;  %v1824_v62 = vadd.f32 %v1776_v1, %v1664_v59  ;;  %v1509_v17 = vadd.f32 %v1463_v56, %v4334_v27  ;;  %vm2498_vm15 = vmor %vm2496_vm14, %vm2497_vm13  ;;  %v2518_v41 = vor.u32 1.1754944e-38, %v2517_v18 }
 0x29d   : > { %v1938_v13 = vpop.f32.mrf.mxu0  ;;  %v2086_v58 = vsub.f32 0.0, %v4937_v51 }
 0x29e   : > { %v2494_v8 = vmul.f32 %v3205_v6, %v2493_v40  ;;  %v1983_v24 = vadd.f32 %v1935_v16, %v1824_v62 }
 0x29f   : > { %v3207_v7 = vpop.eup %3206  ;;  %v2141_v30 = vmul.f32 1.442695, %v2086_v58 }
 0x2a0   : > { %v2495_v26 = vadd.f32 %v3205_v6, %v2494_v8  ;;  %v2019_v29 = vmul.f32 %v4821_v52, %v1983_v24  ;;  %v3209_v19 = vpop.eup %3208  ;;  %v2507_v4 = vmul.f32 %v3207_v7, %v4929_v33  ;;  %vm2512_vm4 = vweird.f32 %v3207_v7 }
 0x2a1   : > { %v1619_v31 = vpop.f32.mrf.mxu2  ;;  %v4943_v42 = vadd.f32 1.0, %v3209_v19  ;;  %3210 = vpow2.f32 %v2141_v30  ;;  %vm2513_vm3 = vmor %vm2511_vm1, %vm2512_vm4 }
 0x2a2   : > { %v1779_v22 = vpop.f32.mrf.mxu3  ;;  %v1665_v60 = vadd.f32 %v1619_v31, %v1509_v17  ;;  %v2499_v49 = vsel %vm2498_vm15, %v3205_v6, %v2495_v26  ;;  %v4946_v27 = vadd.f32 %v4802_v28, %v2019_v29  ;;  %v2508_v15 = vsub.f32 1.0, %v2507_v4 }
 0x2a3   : > { %v1466_v9 = vpop.f32.mrf.mxu1  ;;  %v2504_v2 = vsel %vm2501_vm0, %v2503_v45, %v2499_v49  ;;  %3212 = vrcp.f32 %v4943_v42  ;;  %v2530_v40 = vand.u32 2147483647, %v4943_v42  ;;  %v2532_v62 = vand.u32 2147483648, %v4943_v42 }
 0x2a4   : > { %v1825_v36 = vadd.f32 %v1779_v22, %v1665_v60  ;;  %v2691_v47 = vmul.f32 %v2504_v2, %v4890_v21  ;;  %v2509_v38 = vmul.f32 %v3207_v7, %v2508_v15  ;;  %v2087_v14 = vsub.f32 0.0, %v4946_v27 }
 0x2a5   : > { %v1941_v53 = vpop.f32.mrf.mxu0  ;;  %v1510_v3 = vadd.f32 %v1466_v9, %v4345_v37  ;;  %vm2526_vm7 = vweird.f32 %v4943_v42  ;;  %v2533_v22 = vor.u32 1.1754944e-38, %v2532_v62  ;;  %vm2531_vm9 = vcmp.eq.f32.partialorder %v2530_v40, 8.507059e+37 }
 0x2a6   : > { %v1984_v43 = vadd.f32 %v1938_v13, %v1825_v36  ;;  %2723 = vst.msk [vmem:[%s4494_s21 + $0xa0] sm:$0xff] %vm384_vm2, %v2691_v47  ;;  %v2510_v16 = vadd.f32 %v3207_v7, %v2509_v38  ;;  %v2143_v63 = vmul.f32 1.442695, %v2087_v14 }
 0x2a7   : > { %v3211_v39 = vpop.eup %3210 }
 0x2a8   : > { %v2020_v21 = vmul.f32 %v4821_v52, %v1984_v43  ;;  %v2514_v54 = vsel %vm2513_vm3, %v3207_v7, %v2510_v16  ;;  %v4958_v48 = vadd.f32 1.0, %v3211_v39  ;;  %3214 = vpow2.f32 %v2143_v63 }
 0x2a9   : > { %v1622_v10 = vpop.f32.mrf.mxu2  ;;  %v3213_v57 = vpop.eup %3212  ;;  %v2519_v1 = vsel %vm2516_vm5, %v2518_v41, %v2514_v54 }
 0x2aa   : > { %v1782_v11 = vpop.f32.mrf.mxu3  ;;  %v4961_v61 = vadd.f32 %v4802_v28, %v2020_v21  ;;  %v1666_v6 = vadd.f32 %v1622_v10, %v1510_v3  ;;  %v2692_v50 = vmul.f32 %v2519_v1, %v4906_v44  ;;  %v2522_v59 = vmul.f32 %v3213_v57, %v4943_v42 }
 0x2ab   : > { %v1469_v33 = vpop.f32.mrf.mxu1  ;;  %3216 = vrcp.f32 %v4958_v48  ;;  %vm2527_vm6 = vweird.f32 %v3213_v57  ;;  %v2547_v2 = vand.u32 2147483648, %v4958_v48  ;;  %v2545_v12 = vand.u32 2147483647, %v4958_v48 }
 0x2ac   : > { %v2088_v37 = vsub.f32 0.0, %v4961_v61  ;;  %2724 = vst.msk [vmem:[%s4494_s21 + $0xa8] sm:$0xff] %vm384_vm2, %v2692_v50  ;;  %v2523_v35 = vsub.f32 1.0, %v2522_v59  ;;  %v1826_v0 = vadd.f32 %v1782_v11, %v1666_v6  ;;  %v1511_v44 = vadd.f32 %v1469_v33, %v4356_v46  ;;  %vm2528_vm8 = vmor %vm2526_vm7, %vm2527_vm6 }
 0x2ad   : > { %v1944_v56 = vpop.f32.mrf.mxu0  ;;  %vm2541_vm11 = vweird.f32 %v4958_v48  ;;  %v2548_v21 = vor.u32 1.1754944e-38, %v2547_v2  ;;  %vm2546_vm13 = vcmp.eq.f32.partialorder %v2545_v12, 8.507059e+37 }
 0x2ae   : > { %v2145_v13 = vmul.f32 1.442695, %v2088_v37  ;;  %v3215_v20 = vpop.eup %3214  ;;  %v2524_v34 = vmul.f32 %v3213_v57, %v2523_v35  ;;  %v1985_v8 = vadd.f32 %v1941_v53, %v1826_v0 }
 0x2af   : > { %v4972_v58 = vadd.f32 1.0, %v3215_v20 }
 0x2b0   : > { %3218 = vpow2.f32 %v2145_v13  ;;  %v2525_v26 = vadd.f32 %v3213_v57, %v2524_v34  ;;  %v2021_v30 = vmul.f32 %v4821_v52, %v1985_v8 }
 0x2b1   : > { %v1625_v24 = vpop.f32.mrf.mxu2  ;;  %v3217_v7 = vpop.eup %3216  ;;  %3220 = vrcp.f32 %v4972_v58  ;;  %v2560_v1 = vand.u32 2147483647, %v4972_v58  ;;  %v2562_v6 = vand.u32 2147483648, %v4972_v58  ;;  %vm2556_vm15 = vweird.f32 %v4972_v58 }
 0x2b2   : > { %v1785_v17 = vpop.f32.mrf.mxu3  ;;  %v1667_v29 = vadd.f32 %v1625_v24, %v1511_v44  ;;  %v2537_v19 = vmul.f32 %v3217_v7, %v4958_v48  ;;  %v2529_v46 = vsel %vm2528_vm8, %v3213_v57, %v2525_v26  ;;  %v4979_v45 = vadd.f32 %v4802_v28, %v2021_v30 }
 0x2b3   : > { %v1472_v31 = vpop.f32.mrf.mxu1  ;;  %v2534_v4 = vsel %vm2531_vm9, %v2533_v22, %v2529_v46  ;;  %vm2542_vm10 = vweird.f32 %v3217_v7  ;;  %vm2561_vm4 = vcmp.eq.f32.partialorder %v2560_v1, 8.507059e+37 }
 0x2b4   : > { %v2538_v60 = vsub.f32 1.0, %v2537_v19  ;;  %v1827_v9 = vadd.f32 %v1785_v17, %v1667_v29  ;;  %v2693_v42 = vmul.f32 %v2534_v4, %v4922_v23  ;;  %v2089_v15 = vsub.f32 0.0, %v4979_v45  ;;  %vm2543_vm12 = vmor %vm2541_vm11, %vm2542_vm10 }
 0x2b5   : > { %v1947_v49 = vpop.f32.mrf.mxu0  ;;  %v1512_v41 = vadd.f32 %v1472_v31, %v4367_v55 }
 0x2b6   : > { %v3219_v36 = vpop.eup %3218  ;;  %v2539_v47 = vmul.f32 %v3217_v7, %v2538_v60  ;;  %v1986_v18 = vadd.f32 %v1944_v56, %v1827_v9  ;;  %2725 = vst.msk [vmem:[%s4494_s21 + $0xb0] sm:$0xff] %vm384_vm2, %v2693_v42  ;;  %v2147_v38 = vmul.f32 1.442695, %v2089_v15 }
 0x2b7   : > { %v4987_v53 = vadd.f32 1.0, %v3219_v36  ;;  %v3221_v14 = vpop.eup %3220 }
 0x2b8   : > { %v2540_v43 = vadd.f32 %v3217_v7, %v2539_v47  ;;  %v2022_v23 = vmul.f32 %v4821_v52, %v1986_v18  ;;  %v2552_v39 = vmul.f32 %v3221_v14, %v4972_v58  ;;  %vm2557_vm14 = vweird.f32 %v3221_v14 }
 0x2b9   : > { %v1628_v16 = vpop.f32.mrf.mxu2  ;;  %3222 = vrcp.f32 %v4987_v53  ;;  %vm2558_vm0 = vmor %vm2556_vm15, %vm2557_vm14  ;;  %v2575_v31 = vand.u32 2147483647, %v4987_v53  ;;  %v2577_v22 = vand.u32 2147483648, %v4987_v53  ;;  %vm2571_vm3 = vweird.f32 %v4987_v53 }
 0x2ba   : > { %v1788_v63 = vpop.f32.mrf.mxu3  ;;  %v2544_v10 = vsel %vm2543_vm12, %v3217_v7, %v2540_v43  ;;  %3224 = vpow2.f32 %v2147_v38  ;;  %v2553_v54 = vsub.f32 1.0, %v2552_v39  ;;  %v4995_v48 = vadd.f32 %v4802_v28, %v2022_v23 }
 0x2bb   : > { %v1475_v3 = vpop.f32.mrf.mxu1  ;;  %v2549_v11 = vsel %vm2546_vm13, %v2548_v21, %v2544_v10  ;;  %v1668_v33 = vadd.f32 %v1628_v16, %v1512_v41  ;;  %vm2576_vm6 = vcmp.eq.f32.partialorder %v2575_v31, 8.507059e+37 }
 0x2bc   : > { %v2694_v57 = vmul.f32 %v2549_v11, %v4937_v51  ;;  %v2554_v50 = vmul.f32 %v3221_v14, %v2553_v54  ;;  %v2090_v55 = vsub.f32 0.0, %v4995_v48  ;;  %v2563_v51 = vor.u32 1.1754944e-38, %v2562_v6 }
 0x2bd   : > { %v1828_v59 = vadd.f32 %v1788_v63, %v1668_v33  ;;  %v1950_v37 = vpop.f32.mrf.mxu0  ;;  %v1513_v20 = vadd.f32 %v1475_v3, %v4378_v32 }
 0x2be   : > { %2726 = vst.msk [vmem:[%s4494_s21 + $0xb8] sm:$0xff] %vm384_vm2, %v2694_v57  ;;  %v2555_v35 = vadd.f32 %v3221_v14, %v2554_v50  ;;  %v2149_v0 = vmul.f32 1.442695, %v2090_v55 }
 0x2bf   : > { %v3223_v56 = vpop.eup %3222  ;;  %v1987_v40 = vadd.f32 %v1947_v49, %v1828_v59  ;;  %v2578_v49 = vor.u32 1.1754944e-38, %v2577_v22 }
 0x2c0   : > { %v3225_v62 = vpop.eup %3224  ;;  %v2567_v13 = vmul.f32 %v3223_v56, %v4987_v53  ;;  %v2559_v8 = vsel %vm2558_vm0, %v3221_v14, %v2555_v35  ;;  %3226 = vpow2.f32 %v2149_v0  ;;  %vm2572_vm1 = vweird.f32 %v3223_v56 }
 0x2c1   : > { %v1631_v34 = vpop.f32.mrf.mxu2  ;;  %v2185_v24 = vadd.f32 1.0, %v3225_v62  ;;  %v2023_v17 = vmul.f32 %v4821_v52, %v1987_v40  ;;  %v2564_v7 = vsel %vm2561_vm4, %v2563_v51, %v2559_v8  ;;  %vm2573_vm5 = vmor %vm2571_vm3, %vm2572_vm1 }
 0x2c2   : > { %v1791_v44 = vpop.f32.mrf.mxu3  ;;  %v2568_v58 = vsub.f32 1.0, %v2567_v13  ;;  %v1669_v26 = vadd.f32 %v1631_v34, %v1513_v20  ;;  %v2695_v29 = vmul.f32 %v2564_v7, %v4946_v27 }
 0x2c3   : > { %v1478_v30 = vpop.f32.mrf.mxu1  ;;  %3228 = vrcp.f32 %v2185_v24  ;;  %v5011_v19 = vadd.f32 %v4802_v28, %v2023_v17  ;;  %v2590_v41 = vand.u32 2147483647, %v2185_v24  ;;  %v2592_v3 = vand.u32 2147483648, %v2185_v24 }
 0x2c4   : > { %v2569_v32 = vmul.f32 %v3223_v56, %v2568_v58  ;;  %v1829_v46 = vadd.f32 %v1791_v44, %v1669_v26  ;;  %2727 = vst.msk [vmem:[%s4494_s21 + $0xc0] sm:$0xff] %vm384_vm2, %v2695_v29  ;;  %v1514_v42 = vadd.f32 %v1478_v30, %v4389_v25  ;;  %vm2586_vm8 = vweird.f32 %v2185_v24 }
 0x2c5   : > { %v2091_v60 = vsub.f32 0.0, %v5011_v19  ;;  %v1953_v2 = vpop.f32.mrf.mxu0  ;;  %vm2591_vm10 = vcmp.eq.f32.partialorder %v2590_v41, 8.507059e+37 }
 0x2c6   : > { %v2570_v4 = vadd.f32 %v3223_v56, %v2569_v32  ;;  %v1988_v9 = vadd.f32 %v1950_v37, %v1829_v46  ;;  %v3227_v27 = vpop.eup %3226  ;;  %v2593_v37 = vor.u32 1.1754944e-38, %v2592_v3 }
 0x2c7   : > { %v2186_v36 = vadd.f32 1.0, %v3227_v27  ;;  %v2151_v47 = vmul.f32 1.442695, %v2091_v60 }
 0x2c8   : > { %v2574_v15 = vsel %vm2573_vm5, %v3223_v56, %v2570_v4  ;;  %v2024_v12 = vmul.f32 %v4821_v52, %v1988_v9 }
 0x2c9   : > { %v1634_v18 = vpop.f32.mrf.mxu2  ;;  %v3229_v14 = vpop.eup %3228  ;;  %v2579_v53 = vsel %vm2576_vm6, %v2578_v49, %v2574_v15  ;;  %3230 = vrcp.f32 %v2186_v36  ;;  %v2605_v44 = vand.u32 2147483647, %v2186_v36  ;;  %v2607_v8 = vand.u32 2147483648, %v2186_v36 }
 0x2ca   : > { %v1794_v38 = vpop.f32.mrf.mxu3  ;;  %v1670_v43 = vadd.f32 %v1634_v18, %v1514_v42  ;;  %v2696_v23 = vmul.f32 %v2579_v53, %v4961_v61  ;;  %v2582_v16 = vmul.f32 %v3229_v14, %v2185_v24  ;;  %3232 = vpow2.f32 %v2151_v47 }
 0x2cb   : > { %v5023_v25 = vadd.f32 %v4802_v28, %v2024_v12  ;;  %v1481_v21 = vpop.f32.mrf.mxu1  ;;  %vm2587_vm7 = vweird.f32 %v3229_v14  ;;  %vm2601_vm12 = vweird.f32 %v2186_v36  ;;  %vm2606_vm14 = vcmp.eq.f32.partialorder %v2605_v44, 8.507059e+37 }
 0x2cc   : > { %2728 = vst.msk [vmem:[%s4494_s21 + $0xc8] sm:$0xff] %vm384_vm2, %v2696_v23  ;;  %v2583_v63 = vsub.f32 1.0, %v2582_v16  ;;  %v1830_v39 = vadd.f32 %v1794_v38, %v1670_v43  ;;  %v1515_v61 = vadd.f32 %v1481_v21, %v4400_v5  ;;  %vm2588_vm9 = vmor %vm2586_vm8, %vm2587_vm7 }
 0x2cd   : > { %v2092_v11 = vsub.f32 0.0, %v5023_v25  ;;  %v1956_v62 = vpop.f32.mrf.mxu0 }
 0x2ce   : > { %v2584_v10 = vmul.f32 %v3229_v14, %v2583_v63  ;;  %v1989_v54 = vadd.f32 %v1953_v2, %v1830_v39 }
 0x2cf   : > { %v3231_v33 = vpop.eup %3230  ;;  %v2153_v1 = vmul.f32 1.442695, %v2092_v11 }
 0x2d0   : > { %v2585_v57 = vadd.f32 %v3229_v14, %v2584_v10  ;;  %v2025_v6 = vmul.f32 %v4821_v52, %v1989_v54  ;;  %v3233_v59 = vpop.eup %3232  ;;  %v2597_v56 = vmul.f32 %v3231_v33, %v2186_v36  ;;  %vm2602_vm11 = vweird.f32 %v3231_v33 }
 0x2d1   : > { %v1637_v50 = vpop.f32.mrf.mxu2  ;;  %v2187_v40 = vadd.f32 1.0, %v3233_v59  ;;  %3234 = vpow2.f32 %v2153_v1  ;;  %vm2603_vm13 = vmor %vm2601_vm12, %vm2602_vm11 }
 0x2d2   : > { %v1797_v55 = vpop.f32.mrf.mxu3  ;;  %v1671_v35 = vadd.f32 %v1637_v50, %v1515_v61  ;;  %v2589_v0 = vsel %vm2588_vm9, %v3229_v14, %v2585_v57  ;;  %v5029_v5 = vadd.f32 %v4802_v28, %v2025_v6  ;;  %v2598_v13 = vsub.f32 1.0, %v2597_v56 }
 0x2d3   : > { %v2594_v51 = vsel %vm2591_vm10, %v2593_v37, %v2589_v0  ;;  %3236 = vrcp.f32 %v2187_v40  ;;  %v2622_v49 = vand.u32 2147483648, %v2187_v40  ;;  %v2620_v36 = vand.u32 2147483647, %v2187_v40 }
 0x2d4   : > { %v1831_v20 = vadd.f32 %v1797_v55, %v1671_v35  ;;  %v2697_v34 = vmul.f32 %v2594_v51, %v4979_v45  ;;  %v2599_v24 = vmul.f32 %v3231_v33, %v2598_v13  ;;  %v2093_v17 = vsub.f32 0.0, %v5029_v5 }
 0x2d5   : > { %v2608_v45 = vor.u32 1.1754944e-38, %v2607_v8  ;;  %vm2616_vm0 = vweird.f32 %v2187_v40  ;;  %vm2621_vm1 = vcmp.eq.f32.partialorder %v2620_v36, 8.507059e+37 }
 0x2d6   : > { %v1990_v7 = vadd.f32 %v1956_v62, %v1831_v20  ;;  %2729 = vst.msk [vmem:[%s4494_s21 + $0xd0] sm:$0xff] %vm384_vm2, %v2697_v34  ;;  %v2600_v58 = vadd.f32 %v3231_v33, %v2599_v24  ;;  %v2155_v26 = vmul.f32 1.442695, %v2093_v17 }
 0x2d7   : > { %v3235_v29 = vpop.eup %3234 }
 0x2d8   : > { %v2026_v30 = vmul.f32 %v4821_v52, %v1990_v7  ;;  %v2604_v31 = vsel %vm2603_vm13, %v3231_v33, %v2600_v58  ;;  %v2188_v22 = vadd.f32 1.0, %v3235_v29  ;;  %3238 = vpow2.f32 %v2155_v26 }
 0x2d9   : > { %v3237_v46 = vpop.eup %3236  ;;  %v2609_v4 = vsel %vm2606_vm14, %v2608_v45, %v2604_v31 }
 0x2da   : > { %v5037_v32 = vadd.f32 %v4802_v28, %v2026_v30  ;;  %v2698_v60 = vmul.f32 %v2609_v4, %v4995_v48  ;;  %v2612_v9 = vmul.f32 %v3237_v46, %v2187_v40  ;;  %3240 = vrcp.f32 %v2188_v22 }
 0x2db   : > { %vm2617_vm15 = vweird.f32 %v3237_v46  ;;  %v2623_v48 = vor.u32 1.1754944e-38, %v2622_v49  ;;  %v2637_v23 = vand.u32 2147483648, %v2188_v22  ;;  %v2635_v21 = vand.u32 2147483647, %v2188_v22 }
 0x2dc   : > { %v2094_v27 = vsub.f32 0.0, %v5037_v32  ;;  %2730 = vst.msk [vmem:[%s4494_s21 + $0xd8] sm:$0xff] %vm384_vm2, %v2698_v60  ;;  %v2613_v52 = vsub.f32 1.0, %v2612_v9  ;;  %vm2618_vm4 = vmor %vm2616_vm0, %vm2617_vm15  ;;  %vm2631_vm5 = vweird.f32 %v2188_v22 }
 0x2dd   : > { %v2638_v10 = vor.u32 1.1754944e-38, %v2637_v23  ;;  %vm2636_vm7 = vcmp.eq.f32.partialorder %v2635_v21, 8.507059e+37 }
 0x2de   : > { %v2157_v42 = vmul.f32 1.442695, %v2094_v27  ;;  %v3239_v2 = vpop.eup %3238  ;;  %v2614_v15 = vmul.f32 %v3237_v46, %v2613_v52 }
 0x2df   : > { %v2189_v47 = vadd.f32 1.0, %v3239_v2 }
 0x2e0   : > { %3242 = vpow2.f32 %v2157_v42  ;;  %v3241_v28 = vpop.eup %3240  ;;  %v2615_v12 = vadd.f32 %v3237_v46, %v2614_v15 }
 0x2e1   : > { %v2627_v18 = vmul.f32 %v3241_v28, %v2188_v22  ;;  %3244 = vrcp.f32 %v2189_v47  ;;  %vm2632_vm3 = vweird.f32 %v3241_v28  ;;  %v2652_v57 = vand.u32 2147483648, %v2189_v47 }
 0x2e2   : > { %v2619_v38 = vsel %vm2618_vm4, %v3237_v46, %v2615_v12  ;;  %vm2633_vm6 = vmor %vm2631_vm5, %vm2632_vm3  ;;  %v2650_v6 = vand.u32 2147483647, %v2189_v47  ;;  %vm2646_vm9 = vweird.f32 %v2189_v47 }
 0x2e3   : > { %v2624_v14 = vsel %vm2621_vm1, %v2623_v48, %v2619_v38  ;;  %v2628_v53 = vsub.f32 1.0, %v2627_v18  ;;  %v2653_v59 = vor.u32 1.1754944e-38, %v2652_v57 }
 0x2e4   : > { %v2699_v43 = vmul.f32 %v2624_v14, %v5011_v19  ;;  %vm2651_vm11 = vcmp.eq.f32.partialorder %v2650_v6, 8.507059e+37 }
 0x2e5   : > { %v2629_v63 = vmul.f32 %v3241_v28, %v2628_v53 }
 0x2e6   : > { %v3243_v16 = vpop.eup %3242  ;;  %2731 = vst.msk [vmem:[%s4494_s21 + $0xe0] sm:$0xff] %vm384_vm2, %v2699_v43 }
 0x2e7   : > { %v2190_v39 = vadd.f32 1.0, %v3243_v16  ;;  %v3245_v41 = vpop.eup %3244  ;;  %v2630_v3 = vadd.f32 %v3241_v28, %v2629_v63 }
 0x2e8   : > { %v2642_v11 = vmul.f32 %v3245_v41, %v2189_v47  ;;  %vm2647_vm8 = vweird.f32 %v3245_v41 }
 0x2e9   : > { %3246 = vrcp.f32 %v2190_v39  ;;  %v2634_v54 = vsel %vm2633_vm6, %v3241_v28, %v2630_v3  ;;  %vm2648_vm10 = vmor %vm2646_vm9, %vm2647_vm8  ;;  %v2667_v40 = vand.u32 2147483648, %v2190_v39  ;;  %v2665_v51 = vand.u32 2147483647, %v2190_v39 }
 0x2ea   : > { %v2639_v61 = vsel %vm2636_vm7, %v2638_v10, %v2634_v54  ;;  %v2643_v19 = vsub.f32 1.0, %v2642_v11  ;;  %vm2661_vm13 = vweird.f32 %v2190_v39 }
 0x2eb   : > { %v2700_v33 = vmul.f32 %v2639_v61, %v5023_v25  ;;  %v2668_v20 = vor.u32 1.1754944e-38, %v2667_v40  ;;  %vm2666_vm15 = vcmp.eq.f32.partialorder %v2665_v51, 8.507059e+37 }
 0x2ec   : > { %v2644_v1 = vmul.f32 %v3245_v41, %v2643_v19 }
 0x2ed   : > { %2732 = vst.msk [vmem:[%s4494_s21 + $0xe8] sm:$0xff] %vm384_vm2, %v2700_v33 }
 0x2ee   : > { %v2645_v55 = vadd.f32 %v3245_v41, %v2644_v1 }
 0x2ef   : > { %v3247_v50 = vpop.eup %3246 }
 0x2f0   : > { %v2657_v37 = vmul.f32 %v3247_v50, %v2190_v39  ;;  %v2649_v56 = vsel %vm2648_vm10, %v3245_v41, %v2645_v55  ;;  %vm2662_vm12 = vweird.f32 %v3247_v50 }
 0x2f1   : > { %v2654_v35 = vsel %vm2651_vm11, %v2653_v59, %v2649_v56  ;;  %vm2663_vm14 = vmor %vm2661_vm13, %vm2662_vm12 }
 0x2f2   : > { %v2658_v0 = vsub.f32 1.0, %v2657_v37  ;;  %v2701_v25 = vmul.f32 %v2654_v35, %v5029_v5 }
 0x2f4   : > { %v2659_v62 = vmul.f32 %v3247_v50, %v2658_v0  ;;  %2733 = vst.msk [vmem:[%s4494_s21 + $0xf0] sm:$0xff] %vm384_vm2, %v2701_v25 }
 0x2f6   : > { %v2660_v13 = vadd.f32 %v3247_v50, %v2659_v62 }
 0x2f8   : > { %v2664_v34 = vsel %vm2663_vm14, %v3247_v50, %v2660_v13 }
 0x2f9   : > { %v2669_v44 = vsel %vm2666_vm15, %v2668_v20, %v2664_v34 }
 0x2fa   : > { %v2702_v8 = vmul.f32 %v2669_v44, %v5037_v32 }
 0x2fc   : > { %2734 = vst.msk [vmem:[%s4494_s21 + $0xf8] sm:$0xff] %vm384_vm2, %v2702_v8 }
 0x2fd PF: > { %s14_s15 = sadd.s32 1, %s3283_s15  }
 0x2fe   : > { %p11_p4 = scmp.ge.s32.totalorder %s14_s15, 4  }
 0x300   :  { %13 = sbr.rel (!%p11_p4) target bundleno = 1 (0x1), region = 74 }

</bundles_post_ra>
